<compile_context>
chip_gen: v5e
topology: v5e:2x2
jax: 0.10.0
libtpu: 0.0.40
codegen_flags: <defaults>
</compile_context>

<pallas_src>
import math

import jax
import jax.numpy as jnp
from jax import lax
from jax.experimental import pallas as pl
from jax.experimental.pallas import tpu as pltpu


# ----------------------------------------------------------------------------
# Config (small, TPU-tile friendly)
# ----------------------------------------------------------------------------
EMBED_DIM  = 64
KDIM       = 64
VDIM       = 64
NUM_EXPERT = 4
TOP_K      = 2
EXPERT_DIM = 128
HEAD_DIM   = 64
NUM_HEADS  = EXPERT_DIM // HEAD_DIM           # 2
SCALING    = HEAD_DIM ** (-0.25)              # module scales q AND k by this
QK_SCALE   = HEAD_DIM ** (-0.5)               # folded into wq at init (exactly 1/8)

TGT_LEN = 16
SRC_LEN = 16
BSZ     = 2
# Kernel uses a bitwise-AND cross-batch mask -> batch must be a power of two.
assert BSZ & (BSZ - 1) == 0


# ----------------------------------------------------------------------------
# Fused Pallas kernel: gating + all projections + attention + MoE reduce.
# Single invocation, whole (flattened) arrays resident in VMEM (<1 MiB total).
# ----------------------------------------------------------------------------
def _moa_attention_kernel(q_ref, k_ref, v_ref, gw_ref, wq_ref, wk_ref, wv_ref,
                          wo_ref, o_ref):
    N = q_ref.shape[0]          # T*B   (row n = t*B + b, i.e. batch = n mod B)
    M = k_ref.shape[0]          # S*B
    B = BSZ
    E = NUM_EXPERT
    H = NUM_HEADS
    d = HEAD_DIM

    xq = q_ref[...]             # (N, D)     f32
    xk = k_ref[...]             # (M, KDIM)  f32
    xv = v_ref[...]             # (M, VDIM)  f32

    # ---- MoE gating (kept in f32 so expert selection matches the reference) ----
    g_logits = jnp.dot(xq, gw_ref[...].astype(jnp.float32),
                       preferred_element_type=jnp.float32)              # (N, E)
    g_logits = g_logits - jnp.max(g_logits, axis=-1, keepdims=True)
    g_exp = jnp.exp(g_logits)
    probs = g_exp / jnp.sum(g_exp, axis=-1, keepdims=True)               # (N, E)

    # dense top-k mask via ranking; ties -> lower expert index wins (== lax.top_k)
    col = lax.broadcasted_iota(jnp.int32, (N, E), 1)
    rank = jnp.zeros((N, E), jnp.float32)
    for e in range(E):                        # unrolled, E == 4, pure VPU work
        pe = probs[:, e:e + 1]
        beats = jnp.logical_or(pe > probs,
                               jnp.logical_and(pe == probs, col > e))
        rank = rank + beats.astype(jnp.float32)
    gates = probs * (rank < float(TOP_K)).astype(jnp.float32)
    gates = gates / (jnp.sum(gates, axis=-1, keepdims=True) + 1e-6)      # (N, E)

    # ---- projections: bf16 operands, f32 accumulation on the MXU ----
    xq_b = xq.astype(jnp.bfloat16)
    k = jnp.dot(xk.astype(jnp.bfloat16), wk_ref[...],
                preferred_element_type=jnp.float32)                      # (M, 128)
    v = jnp.dot(xv.astype(jnp.bfloat16), wv_ref[...],
                preferred_element_type=jnp.float32)                      # (M, 128)
    k_b = k.astype(jnp.bfloat16)
    v_b = v.astype(jnp.bfloat16)

    # Per-expert q projection (QK scaling already folded into wq at init), stacked
    # expert-major into one (E*N, EXPERT_DIM) slab so attention batches per head.
    q_slab = jnp.concatenate(
        [jnp.dot(xq_b, wq_ref[e],
                 preferred_element_type=jnp.float32).astype(jnp.bfloat16)
         for e in range(E)], axis=0)                                     # (E*N, 128)

    # ---- cross-batch mask: slab row r has batch r & (B-1) (N is a multiple of B),
    #      key row m has batch m & (B-1); mismatched pairs get -1e30.
    rb = lax.broadcasted_iota(jnp.int32, (E * N, M), 0)
    cb = lax.broadcasted_iota(jnp.int32, (E * N, M), 1)
    same_batch = ((rb - cb) & (B - 1)) == 0
    mask_bias = jnp.where(same_batch, 0.0, -1e30)                        # (E*N, M) f32

    # ---- attention: ONE score matmul / softmax / PV matmul per head (experts batched
    #      along rows), then gate-weighted output projection accumulated in place.
    acc = jnp.zeros((N, EMBED_DIM), jnp.float32)
    for h in range(H):
        q_h = q_slab[:, h * d:(h + 1) * d]                               # (E*N, d)
        k_h = k_b[:, h * d:(h + 1) * d]                                  # (M, d)
        v_h = v_b[:, h * d:(h + 1) * d]                                  # (M, d)
        s = lax.dot_general(q_h, k_h, (((1,), (1,)), ((), ())),
                            preferred_element_type=jnp.float32)          # (E*N, M)
        s = s + mask_bias
        s = s - jnp.max(s, axis=-1, keepdims=True)
        p = jnp.exp(s)
        p = p / jnp.sum(p, axis=-1, keepdims=True)     # exact divide (torch parity)
        pv = jnp.dot(p.astype(jnp.bfloat16), v_h,
                     preferred_element_type=jnp.float32)                 # (E*N, d)
        for e in range(E):                              # MoE reduce, accumulated
            piece = pv[e * N:(e + 1) * N, :] * gates[:, e:e + 1]         # (N, d)
            w_eh = wo_ref[e * EXPERT_DIM + h * d:
                          e * EXPERT_DIM + (h + 1) * d, :]               # (d, D)
            acc = acc + jnp.dot(piece.astype(jnp.bfloat16), w_eh,
                                preferred_element_type=jnp.float32)

    # TODO(synk): output last dim is 64 (<128 lanes) -> masked store; a lane-dense
    # (N/2, 128) re-layout would cost more than the 4 KiB store it saves here.
    o_ref[...] = acc.astype(o_ref.dtype)


def fused_moa_attention(xq, xk, xv, gate_w, wq_e, wk, wv, wo_all):
    N, D = xq.shape
    M = xk.shape[0]
    return pl.pallas_call(
        _moa_attention_kernel,
        out_shape=jax.ShapeDtypeStruct((N, D), xq.dtype),
        grid=(1,),
        in_specs=[
            pl.BlockSpec((N, D), lambda i: (0, 0)),
            pl.BlockSpec((M, KDIM), lambda i: (0, 0)),
            pl.BlockSpec((M, VDIM), lambda i: (0, 0)),
            pl.BlockSpec((EMBED_DIM, NUM_EXPERT), lambda i: (0, 0)),
            pl.BlockSpec((NUM_EXPERT, EMBED_DIM, EXPERT_DIM), lambda i: (0, 0, 0)),
            pl.BlockSpec((KDIM, EXPERT_DIM), lambda i: (0, 0)),
            pl.BlockSpec((VDIM, EXPERT_DIM), lambda i: (0, 0)),
            pl.BlockSpec((NUM_EXPERT * EXPERT_DIM, EMBED_DIM), lambda i: (0, 0)),
        ],
        out_specs=pl.BlockSpec((N, D), lambda i: (0, 0)),
        compiler_params=pltpu.CompilerParams(
            dimension_semantics=("arbitrary",)),
    )(xq, xk, xv, gate_w, wq_e, wk, wv, wo_all)


# ----------------------------------------------------------------------------
# Parameters (deterministic, xavier-style init)
# ----------------------------------------------------------------------------
def xavier_uniform(key, shape, fan_in, fan_out, gain=1.0):
    bound = gain * math.sqrt(6.0 / (fan_in + fan_out))
    return jax.random.uniform(key, shape, jnp.float32, -bound, bound)


def init_params(key):
    ks = jax.random.split(key, 5)
    gain = 1.0 / math.sqrt(2.0)  # qkv_same_dim => gain 1/sqrt(2) for k/v proj
    wk = xavier_uniform(ks[0], (KDIM, EXPERT_DIM), KDIM, EXPERT_DIM, gain)
    wv = xavier_uniform(ks[1], (VDIM, EXPERT_DIM), VDIM, EXPERT_DIM, gain)
    gate_w = xavier_uniform(ks[2], (EMBED_DIM, NUM_EXPERT), EMBED_DIM, NUM_EXPERT)
    expert_wq = xavier_uniform(
        ks[3], (NUM_EXPERT, EMBED_DIM, EXPERT_DIM), EMBED_DIM, EXPERT_DIM)
    expert_wo = xavier_uniform(
        ks[4], (NUM_EXPERT, EXPERT_DIM, EMBED_DIM), EXPERT_DIM, EMBED_DIM)

    # Kernel weights: bf16 storage (halves weight DMA / vreg footprint); the QK
    # scaling (exactly 1/8) is folded into wq so no runtime scaling multiply remains.
    gate_b = gate_w.astype(jnp.bfloat16)
    wk_b = wk.astype(jnp.bfloat16)
    wv_b = wv.astype(jnp.bfloat16)
    wq_e_b = (expert_wq * QK_SCALE).astype(jnp.bfloat16)                 # (E, 64, 128)
    wo_all_b = expert_wo.reshape(
        NUM_EXPERT * EXPERT_DIM, EMBED_DIM).astype(jnp.bfloat16)         # (512, 64)

    return {
        # packed kernel weights
        "gate_w": gate_b, "wk": wk_b, "wv": wv_b, "wq_e": wq_e_b, "wo_all": wo_all_b,
        # f32 upcasts of the SAME bf16-quantized weights for the pure-JAX reference
        # (QK_SCALE is a power of two, so un-folding it is exact)
        "ref_gate_w": gate_b.astype(jnp.float32),
        "ref_wk": wk_b.astype(jnp.float32),
        "ref_wv": wv_b.astype(jnp.float32),
        "ref_expert_wq": wq_e_b.astype(jnp.float32) / QK_SCALE,
        "ref_expert_wo": wo_all_b.astype(jnp.float32).reshape(
            NUM_EXPERT, EXPERT_DIM, EMBED_DIM),
    }


# ----------------------------------------------------------------------------
# Forward pass: contiguous reshapes (free) + one fused Pallas kernel
# ----------------------------------------------------------------------------
def multihead_attention_forward(params, query, key, value):
    T, B, D = query.shape
    S = key.shape[0]
    assert D == EMBED_DIM
    # (Time, Batch, Channel) consumed through contiguous, metadata-only reshapes
    # (no transposes); flattened row n corresponds to (t = n // B, b = n % B).
    xq = query.reshape(T * B, D)
    xk = key.reshape(S * B, KDIM)
    xv = value.reshape(S * B, VDIM)

    out = fused_moa_attention(xq, xk, xv,
                              params["gate_w"], params["wq_e"],
                              params["wk"], params["wv"], params["wo_all"])
    out = out.reshape(T, B, D)
    aux_loss = jnp.zeros((), jnp.float32)     # all aux-loss coefficients are 0
    return out, aux_loss


# ----------------------------------------------------------------------------
# Pure-JAX reference (same MoE convention), used only for the correctness check
# ----------------------------------------------------------------------------
def reference_forward(params, query, key, value):
    T, B, D = query.shape
    S = key.shape[0]
    N = T * B
    xq = query.reshape(N, D)
    gate_probs = jax.nn.softmax(xq @ params["ref_gate_w"], axis=-1)
    top_gates, top_idx = lax.top_k(gate_probs, TOP_K)
    top_gates = top_gates / (jnp.sum(top_gates, axis=-1, keepdims=True) + 1e-6)
    q_all = jnp.einsum("nd,edh->enh", xq, params["ref_expert_wq"])       # (E, N, 128)
    q = q_all[top_idx, jnp.arange(N)[:, None], :]                        # (N, K, 128)
    k = (key.reshape(S * B, KDIM) @ params["ref_wk"]).reshape(S, B, EXPERT_DIM)
    v = (value.reshape(S * B, VDIM) @ params["ref_wv"]).reshape(S, B, EXPERT_DIM)
    q = q * SCALING
    k = k * SCALING
    q = q.reshape(T, B, TOP_K, NUM_HEADS, HEAD_DIM).transpose(1, 2, 3, 0, 4)
    k = k.reshape(S, B, NUM_HEADS, HEAD_DIM).transpose(1, 2, 0, 3)
    v = v.reshape(S, B, NUM_HEADS, HEAD_DIM).transpose(1, 2, 0, 3)
    s = jnp.einsum("bkhtd,bhsd->bkhts", q, k)
    p = jax.nn.softmax(s, axis=-1)
    attn = jnp.einsum("bkhts,bhsd->bkhtd", p, v)
    attn = attn.transpose(3, 0, 1, 2, 4).reshape(N, TOP_K, EXPERT_DIM)
    wo_sel = params["ref_expert_wo"][top_idx]                            # (N, K, 128, D)
    out = jnp.einsum("nkh,nkhd->nd", attn * top_gates[..., None], wo_sel)
    return out.reshape(T, B, D)


# ----------------------------------------------------------------------------
if __name__ == "__main__":
    root = jax.random.PRNGKey(0)
    kp, kq, kk, kv = jax.random.split(root, 4)

    params = init_params(kp)
    query = jax.random.normal(kq, (TGT_LEN, BSZ, EMBED_DIM), jnp.float32)
    key = jax.random.normal(kk, (SRC_LEN, BSZ, KDIM), jnp.float32)
    value = jax.random.normal(kv, (SRC_LEN, BSZ, VDIM), jnp.float32)

    fwd = jax.jit(multihead_attention_forward)
    attn_out, aux_loss = fwd(params, query, key, value)
    jax.block_until_ready((attn_out, aux_loss))

    assert attn_out.shape == (TGT_LEN, BSZ, EMBED_DIM)
    assert bool(jnp.all(jnp.isfinite(attn_out)))

    # correctness check against a pure-JAX f32 reference using the same bf16-quantized
    # weights; bf16 matmul operands (f32 accumulation) account for the tolerance.
    ref_out = jax.jit(reference_forward)(params, query, key, value)
    err = float(jnp.max(jnp.abs(attn_out - ref_out)))
    assert err < 5e-2, f"max abs err {err}"

    print("KERNEL_OK")
</pallas_src>

<mosaic_0001>
module attributes {stable_mosaic.version = 11 : i64} {
  func.func @_moa_attention_kernel(%arg0: i32, %arg1: memref<32x64xf32, #tpu.memory_space<vmem>>, %arg2: memref<32x64xf32, #tpu.memory_space<vmem>>, %arg3: memref<32x64xf32, #tpu.memory_space<vmem>>, %arg4: memref<64x4xbf16, #tpu.memory_space<vmem>>, %arg5: memref<4x64x128xbf16, #tpu.memory_space<vmem>>, %arg6: memref<64x128xbf16, #tpu.memory_space<vmem>>, %arg7: memref<64x128xbf16, #tpu.memory_space<vmem>>, %arg8: memref<512x64xbf16, #tpu.memory_space<vmem>>, %arg9: memref<32x64xf32, #tpu.memory_space<vmem>>) attributes {dimension_semantics = [#tpu.dimension_semantics<arbitrary>], iteration_bounds = array<i64: 1>, scalar_prefetch = 0 : i64, scratch_operands = 0 : i64, tpu.core_type = #tpu.core_type<tc>, window_params = [{pipeline_mode = #tpu.pipeline_mode<synchronous>, transform_indices = @transform_0, window_bounds = array<i64: 32, 64>}, {pipeline_mode = #tpu.pipeline_mode<synchronous>, transform_indices = @transform_1, window_bounds = array<i64: 32, 64>}, {pipeline_mode = #tpu.pipeline_mode<synchronous>, transform_indices = @transform_2, window_bounds = array<i64: 32, 64>}, {pipeline_mode = #tpu.pipeline_mode<synchronous>, transform_indices = @transform_3, window_bounds = array<i64: 64, 4>}, {pipeline_mode = #tpu.pipeline_mode<synchronous>, transform_indices = @transform_4, window_bounds = array<i64: 4, 64, 128>}, {pipeline_mode = #tpu.pipeline_mode<synchronous>, transform_indices = @transform_5, window_bounds = array<i64: 64, 128>}, {pipeline_mode = #tpu.pipeline_mode<synchronous>, transform_indices = @transform_6, window_bounds = array<i64: 64, 128>}, {pipeline_mode = #tpu.pipeline_mode<synchronous>, transform_indices = @transform_7, window_bounds = array<i64: 512, 64>}, {pipeline_mode = #tpu.pipeline_mode<synchronous>, transform_indices = @transform_8, window_bounds = array<i64: 32, 64>}]} {
    %c0 = arith.constant 0 : index
    %c0_0 = arith.constant 0 : index
    %0 = vector.load %arg1[%c0, %c0_0] : memref<32x64xf32, #tpu.memory_space<vmem>>, vector<32x64xf32>
    %c0_1 = arith.constant 0 : index
    %c0_2 = arith.constant 0 : index
    %1 = vector.load %arg2[%c0_1, %c0_2] : memref<32x64xf32, #tpu.memory_space<vmem>>, vector<32x64xf32>
    %c0_3 = arith.constant 0 : index
    %c0_4 = arith.constant 0 : index
    %2 = vector.load %arg3[%c0_3, %c0_4] : memref<32x64xf32, #tpu.memory_space<vmem>>, vector<32x64xf32>
    %c0_5 = arith.constant 0 : index
    %c0_6 = arith.constant 0 : index
    %3 = vector.load %arg4[%c0_5, %c0_6] : memref<64x4xbf16, #tpu.memory_space<vmem>>, vector<64x4xbf16>
    %4 = arith.extf %3 : vector<64x4xbf16> to vector<64x4xf32>
    %cst = arith.constant dense<0.000000e+00> : vector<32x4xf32>
    %5 = tpu.matmul %0, %4, %cst {dimension_numbers = #tpu.dot_dimension_numbers<[1], [0], [0], [1], [0, 0, 1, 1], [], []>} : vector<32x64xf32>, vector<64x4xf32>, vector<32x4xf32> -> vector<32x4xf32>
    %cst_7 = arith.constant dense<0xFF800000> : vector<32xf32>
    %6 = vector.multi_reduction <maximumf>, %5, %cst_7 [1] : vector<32x4xf32> to vector<32xf32>
    %7 = vector.shape_cast %6 : vector<32xf32> to vector<32x1xf32>
    %8 = vector.broadcast %7 : vector<32x1xf32> to vector<32x4xf32>
    %9 = arith.subf %5, %8 : vector<32x4xf32>
    %10 = math.exp %9 : vector<32x4xf32>
    %cst_8 = arith.constant dense<0.000000e+00> : vector<32xf32>
    %11 = vector.multi_reduction <add>, %10, %cst_8 [1] : vector<32x4xf32> to vector<32xf32>
    %12 = vector.shape_cast %11 : vector<32xf32> to vector<32x1xf32>
    %13 = vector.broadcast %12 : vector<32x1xf32> to vector<32x4xf32>
    %14 = arith.divf %10, %13 : vector<32x4xf32>
    %15 = tpu.iota {dimensions = array<i32: 1>} : vector<32x4xi32>
    %cst_9 = arith.constant 0.000000e+00 : f32
    %16 = vector.broadcast %cst_9 : f32 to vector<32x4xf32>
    %17 = vector.extract_strided_slice %14 {offsets = [0, 0], sizes = [32, 1], strides = [1, 1]} : vector<32x4xf32> to vector<32x1xf32>
    %18 = vector.broadcast %17 : vector<32x1xf32> to vector<32x4xf32>
    %19 = arith.cmpf ogt, %18, %14 : vector<32x4xf32>
    %20 = vector.broadcast %17 : vector<32x1xf32> to vector<32x4xf32>
    %21 = arith.cmpf oeq, %20, %14 : vector<32x4xf32>
    %c0_i32 = arith.constant 0 : i32
    %22 = vector.broadcast %c0_i32 : i32 to vector<32x4xi32>
    %23 = arith.cmpi sgt, %15, %22 : vector<32x4xi32>
    %24 = arith.andi %21, %23 : vector<32x4xi1>
    %25 = arith.ori %19, %24 : vector<32x4xi1>
    %26 = arith.extui %25 : vector<32x4xi1> to vector<32x4xi32>
    %27 = arith.sitofp %26 : vector<32x4xi32> to vector<32x4xf32>
    %28 = arith.addf %16, %27 : vector<32x4xf32>
    %29 = vector.extract_strided_slice %14 {offsets = [0, 1], sizes = [32, 1], strides = [1, 1]} : vector<32x4xf32> to vector<32x1xf32>
    %30 = vector.broadcast %29 : vector<32x1xf32> to vector<32x4xf32>
    %31 = arith.cmpf ogt, %30, %14 : vector<32x4xf32>
    %32 = vector.broadcast %29 : vector<32x1xf32> to vector<32x4xf32>
    %33 = arith.cmpf oeq, %32, %14 : vector<32x4xf32>
    %c1_i32 = arith.constant 1 : i32
    %34 = vector.broadcast %c1_i32 : i32 to vector<32x4xi32>
    %35 = arith.cmpi sgt, %15, %34 : vector<32x4xi32>
    %36 = arith.andi %33, %35 : vector<32x4xi1>
    %37 = arith.ori %31, %36 : vector<32x4xi1>
    %38 = arith.extui %37 : vector<32x4xi1> to vector<32x4xi32>
    %39 = arith.sitofp %38 : vector<32x4xi32> to vector<32x4xf32>
    %40 = arith.addf %28, %39 : vector<32x4xf32>
    %41 = vector.extract_strided_slice %14 {offsets = [0, 2], sizes = [32, 1], strides = [1, 1]} : vector<32x4xf32> to vector<32x1xf32>
    %42 = vector.broadcast %41 : vector<32x1xf32> to vector<32x4xf32>
    %43 = arith.cmpf ogt, %42, %14 : vector<32x4xf32>
    %44 = vector.broadcast %41 : vector<32x1xf32> to vector<32x4xf32>
    %45 = arith.cmpf oeq, %44, %14 : vector<32x4xf32>
    %c2_i32 = arith.constant 2 : i32
    %46 = vector.broadcast %c2_i32 : i32 to vector<32x4xi32>
    %47 = arith.cmpi sgt, %15, %46 : vector<32x4xi32>
    %48 = arith.andi %45, %47 : vector<32x4xi1>
    %49 = arith.ori %43, %48 : vector<32x4xi1>
    %50 = arith.extui %49 : vector<32x4xi1> to vector<32x4xi32>
    %51 = arith.sitofp %50 : vector<32x4xi32> to vector<32x4xf32>
    %52 = arith.addf %40, %51 : vector<32x4xf32>
    %53 = vector.extract_strided_slice %14 {offsets = [0, 3], sizes = [32, 1], strides = [1, 1]} : vector<32x4xf32> to vector<32x1xf32>
    %54 = vector.broadcast %53 : vector<32x1xf32> to vector<32x4xf32>
    %55 = arith.cmpf ogt, %54, %14 : vector<32x4xf32>
    %56 = vector.broadcast %53 : vector<32x1xf32> to vector<32x4xf32>
    %57 = arith.cmpf oeq, %56, %14 : vector<32x4xf32>
    %c3_i32 = arith.constant 3 : i32
    %58 = vector.broadcast %c3_i32 : i32 to vector<32x4xi32>
    %59 = arith.cmpi sgt, %15, %58 : vector<32x4xi32>
    %60 = arith.andi %57, %59 : vector<32x4xi1>
    %61 = arith.ori %55, %60 : vector<32x4xi1>
    %62 = arith.extui %61 : vector<32x4xi1> to vector<32x4xi32>
    %63 = arith.sitofp %62 : vector<32x4xi32> to vector<32x4xf32>
    %64 = arith.addf %52, %63 : vector<32x4xf32>
    %cst_10 = arith.constant 2.000000e+00 : f32
    %65 = vector.broadcast %cst_10 : f32 to vector<32x4xf32>
    %66 = arith.cmpf olt, %64, %65 : vector<32x4xf32>
    %67 = arith.extui %66 : vector<32x4xi1> to vector<32x4xi32>
    %68 = arith.sitofp %67 : vector<32x4xi32> to vector<32x4xf32>
    %69 = arith.mulf %14, %68 : vector<32x4xf32>
    %cst_11 = arith.constant dense<0.000000e+00> : vector<32xf32>
    %70 = vector.multi_reduction <add>, %69, %cst_11 [1] : vector<32x4xf32> to vector<32xf32>
    %71 = vector.shape_cast %70 : vector<32xf32> to vector<32x1xf32>
    %cst_12 = arith.constant 9.99999997E-7 : f32
    %72 = vector.broadcast %cst_12 : f32 to vector<32x1xf32>
    %73 = arith.addf %71, %72 : vector<32x1xf32>
    %74 = vector.broadcast %73 : vector<32x1xf32> to vector<32x4xf32>
    %75 = arith.divf %69, %74 : vector<32x4xf32>
    %76 = arith.truncf %0 : vector<32x64xf32> to vector<32x64xbf16>
    %77 = arith.truncf %1 : vector<32x64xf32> to vector<32x64xbf16>
    %c0_13 = arith.constant 0 : index
    %c0_14 = arith.constant 0 : index
    %78 = vector.load %arg6[%c0_13, %c0_14] : memref<64x128xbf16, #tpu.memory_space<vmem>>, vector<64x128xbf16>
    %cst_15 = arith.constant dense<0.000000e+00> : vector<32x128xf32>
    %79 = tpu.matmul %77, %78, %cst_15 {dimension_numbers = #tpu.dot_dimension_numbers<[1], [0], [0], [1], [0, 0, 1, 1], [], []>} : vector<32x64xbf16>, vector<64x128xbf16>, vector<32x128xf32> -> vector<32x128xf32>
    %80 = arith.truncf %2 : vector<32x64xf32> to vector<32x64xbf16>
    %c0_16 = arith.constant 0 : index
    %c0_17 = arith.constant 0 : index
    %81 = vector.load %arg7[%c0_16, %c0_17] : memref<64x128xbf16, #tpu.memory_space<vmem>>, vector<64x128xbf16>
    %cst_18 = arith.constant dense<0.000000e+00> : vector<32x128xf32>
    %82 = tpu.matmul %80, %81, %cst_18 {dimension_numbers = #tpu.dot_dimension_numbers<[1], [0], [0], [1], [0, 0, 1, 1], [], []>} : vector<32x64xbf16>, vector<64x128xbf16>, vector<32x128xf32> -> vector<32x128xf32>
    %83 = arith.truncf %79 : vector<32x128xf32> to vector<32x128xbf16>
    %84 = arith.truncf %82 : vector<32x128xf32> to vector<32x128xbf16>
    %c0_19 = arith.constant 0 : index
    %c0_20 = arith.constant 0 : index
    %c0_21 = arith.constant 0 : index
    %85 = vector.load %arg5[%c0_19, %c0_20, %c0_21] : memref<4x64x128xbf16, #tpu.memory_space<vmem>>, vector<1x64x128xbf16>
    %86 = vector.shape_cast %85 : vector<1x64x128xbf16> to vector<64x128xbf16>
    %cst_22 = arith.constant dense<0.000000e+00> : vector<32x128xf32>
    %87 = tpu.matmul %76, %86, %cst_22 {dimension_numbers = #tpu.dot_dimension_numbers<[1], [0], [0], [1], [0, 0, 1, 1], [], []>} : vector<32x64xbf16>, vector<64x128xbf16>, vector<32x128xf32> -> vector<32x128xf32>
    %88 = arith.truncf %87 : vector<32x128xf32> to vector<32x128xbf16>
    %c1 = arith.constant 1 : index
    %c0_23 = arith.constant 0 : index
    %c0_24 = arith.constant 0 : index
    %89 = vector.load %arg5[%c1, %c0_23, %c0_24] : memref<4x64x128xbf16, #tpu.memory_space<vmem>>, vector<1x64x128xbf16>
    %90 = vector.shape_cast %89 : vector<1x64x128xbf16> to vector<64x128xbf16>
    %cst_25 = arith.constant dense<0.000000e+00> : vector<32x128xf32>
    %91 = tpu.matmul %76, %90, %cst_25 {dimension_numbers = #tpu.dot_dimension_numbers<[1], [0], [0], [1], [0, 0, 1, 1], [], []>} : vector<32x64xbf16>, vector<64x128xbf16>, vector<32x128xf32> -> vector<32x128xf32>
    %92 = arith.truncf %91 : vector<32x128xf32> to vector<32x128xbf16>
    %c2 = arith.constant 2 : index
    %c0_26 = arith.constant 0 : index
    %c0_27 = arith.constant 0 : index
    %93 = vector.load %arg5[%c2, %c0_26, %c0_27] : memref<4x64x128xbf16, #tpu.memory_space<vmem>>, vector<1x64x128xbf16>
    %94 = vector.shape_cast %93 : vector<1x64x128xbf16> to vector<64x128xbf16>
    %cst_28 = arith.constant dense<0.000000e+00> : vector<32x128xf32>
    %95 = tpu.matmul %76, %94, %cst_28 {dimension_numbers = #tpu.dot_dimension_numbers<[1], [0], [0], [1], [0, 0, 1, 1], [], []>} : vector<32x64xbf16>, vector<64x128xbf16>, vector<32x128xf32> -> vector<32x128xf32>
    %96 = arith.truncf %95 : vector<32x128xf32> to vector<32x128xbf16>
    %c3 = arith.constant 3 : index
    %c0_29 = arith.constant 0 : index
    %c0_30 = arith.constant 0 : index
    %97 = vector.load %arg5[%c3, %c0_29, %c0_30] : memref<4x64x128xbf16, #tpu.memory_space<vmem>>, vector<1x64x128xbf16>
    %98 = vector.shape_cast %97 : vector<1x64x128xbf16> to vector<64x128xbf16>
    %cst_31 = arith.constant dense<0.000000e+00> : vector<32x128xf32>
    %99 = tpu.matmul %76, %98, %cst_31 {dimension_numbers = #tpu.dot_dimension_numbers<[1], [0], [0], [1], [0, 0, 1, 1], [], []>} : vector<32x64xbf16>, vector<64x128xbf16>, vector<32x128xf32> -> vector<32x128xf32>
    %100 = arith.truncf %99 : vector<32x128xf32> to vector<32x128xbf16>
    %101 = tpu.concatenate %88, %92, %96, %100 in 0 : vector<32x128xbf16>, vector<32x128xbf16>, vector<32x128xbf16>, vector<32x128xbf16> -> vector<128x128xbf16>
    %102 = tpu.iota {dimensions = array<i32: 0>} : vector<128x32xi32>
    %103 = tpu.iota {dimensions = array<i32: 1>} : vector<128x32xi32>
    %104 = arith.subi %102, %103 : vector<128x32xi32>
    %c1_i32_32 = arith.constant 1 : i32
    %105 = vector.broadcast %c1_i32_32 : i32 to vector<128x32xi32>
    %106 = arith.andi %104, %105 : vector<128x32xi32>
    %c0_i32_33 = arith.constant 0 : i32
    %107 = vector.broadcast %c0_i32_33 : i32 to vector<128x32xi32>
    %108 = arith.cmpi eq, %106, %107 : vector<128x32xi32>
    %cst_34 = arith.constant 0.000000e+00 : f32
    %cst_35 = arith.constant -1.000000e+30 : f32
    %109 = vector.broadcast %cst_34 : f32 to vector<128x32xf32>
    %110 = vector.broadcast %cst_35 : f32 to vector<128x32xf32>
    %111 = arith.select %108, %109, %110 : vector<128x32xi1>, vector<128x32xf32>
    %cst_36 = arith.constant 0.000000e+00 : f32
    %112 = vector.broadcast %cst_36 : f32 to vector<32x64xf32>
    %113 = vector.extract_strided_slice %101 {offsets = [0, 0], sizes = [128, 64], strides = [1, 1]} : vector<128x128xbf16> to vector<128x64xbf16>
    %114 = vector.extract_strided_slice %83 {offsets = [0, 0], sizes = [32, 64], strides = [1, 1]} : vector<32x128xbf16> to vector<32x64xbf16>
    %115 = vector.extract_strided_slice %84 {offsets = [0, 0], sizes = [32, 64], strides = [1, 1]} : vector<32x128xbf16> to vector<32x64xbf16>
    %cst_37 = arith.constant dense<0.000000e+00> : vector<128x32xf32>
    %116 = tpu.matmul %113, %114, %cst_37 {dimension_numbers = #tpu.dot_dimension_numbers<[1], [1], [0], [0], [0, 0, 1, 0], [], []>} : vector<128x64xbf16>, vector<32x64xbf16>, vector<128x32xf32> -> vector<128x32xf32>
    %117 = arith.addf %116, %111 : vector<128x32xf32>
    %cst_38 = arith.constant dense<0xFF800000> : vector<128xf32>
    %118 = vector.multi_reduction <maximumf>, %117, %cst_38 [1] : vector<128x32xf32> to vector<128xf32>
    %119 = vector.shape_cast %118 : vector<128xf32> to vector<128x1xf32>
    %120 = vector.broadcast %119 : vector<128x1xf32> to vector<128x32xf32>
    %121 = arith.subf %117, %120 : vector<128x32xf32>
    %122 = math.exp %121 : vector<128x32xf32>
    %cst_39 = arith.constant dense<0.000000e+00> : vector<128xf32>
    %123 = vector.multi_reduction <add>, %122, %cst_39 [1] : vector<128x32xf32> to vector<128xf32>
    %124 = vector.shape_cast %123 : vector<128xf32> to vector<128x1xf32>
    %125 = vector.broadcast %124 : vector<128x1xf32> to vector<128x32xf32>
    %126 = arith.divf %122, %125 : vector<128x32xf32>
    %127 = arith.truncf %126 : vector<128x32xf32> to vector<128x32xbf16>
    %cst_40 = arith.constant dense<0.000000e+00> : vector<128x64xf32>
    %128 = tpu.matmul %127, %115, %cst_40 {dimension_numbers = #tpu.dot_dimension_numbers<[1], [0], [0], [1], [0, 0, 1, 1], [], []>} : vector<128x32xbf16>, vector<32x64xbf16>, vector<128x64xf32> -> vector<128x64xf32>
    %129 = vector.extract_strided_slice %128 {offsets = [0, 0], sizes = [32, 64], strides = [1, 1]} : vector<128x64xf32> to vector<32x64xf32>
    %130 = vector.extract_strided_slice %75 {offsets = [0, 0], sizes = [32, 1], strides = [1, 1]} : vector<32x4xf32> to vector<32x1xf32>
    %131 = vector.broadcast %130 : vector<32x1xf32> to vector<32x64xf32>
    %132 = arith.mulf %129, %131 : vector<32x64xf32>
    %c0_41 = arith.constant 0 : index
    %c0_42 = arith.constant 0 : index
    %133 = vector.load %arg8[%c0_41, %c0_42] : memref<512x64xbf16, #tpu.memory_space<vmem>>, vector<64x64xbf16>
    %134 = arith.truncf %132 : vector<32x64xf32> to vector<32x64xbf16>
    %cst_43 = arith.constant dense<0.000000e+00> : vector<32x64xf32>
    %135 = tpu.matmul %134, %133, %cst_43 {dimension_numbers = #tpu.dot_dimension_numbers<[1], [0], [0], [1], [0, 0, 1, 1], [], []>} : vector<32x64xbf16>, vector<64x64xbf16>, vector<32x64xf32> -> vector<32x64xf32>
    %136 = arith.addf %112, %135 : vector<32x64xf32>
    %137 = vector.extract_strided_slice %128 {offsets = [32, 0], sizes = [32, 64], strides = [1, 1]} : vector<128x64xf32> to vector<32x64xf32>
    %138 = vector.extract_strided_slice %75 {offsets = [0, 1], sizes = [32, 1], strides = [1, 1]} : vector<32x4xf32> to vector<32x1xf32>
    %139 = vector.broadcast %138 : vector<32x1xf32> to vector<32x64xf32>
    %140 = arith.mulf %137, %139 : vector<32x64xf32>
    %c128 = arith.constant 128 : index
    %c0_44 = arith.constant 0 : index
    %141 = vector.load %arg8[%c128, %c0_44] : memref<512x64xbf16, #tpu.memory_space<vmem>>, vector<64x64xbf16>
    %142 = arith.truncf %140 : vector<32x64xf32> to vector<32x64xbf16>
    %cst_45 = arith.constant dense<0.000000e+00> : vector<32x64xf32>
    %143 = tpu.matmul %142, %141, %cst_45 {dimension_numbers = #tpu.dot_dimension_numbers<[1], [0], [0], [1], [0, 0, 1, 1], [], []>} : vector<32x64xbf16>, vector<64x64xbf16>, vector<32x64xf32> -> vector<32x64xf32>
    %144 = arith.addf %136, %143 : vector<32x64xf32>
    %145 = vector.extract_strided_slice %128 {offsets = [64, 0], sizes = [32, 64], strides = [1, 1]} : vector<128x64xf32> to vector<32x64xf32>
    %146 = vector.extract_strided_slice %75 {offsets = [0, 2], sizes = [32, 1], strides = [1, 1]} : vector<32x4xf32> to vector<32x1xf32>
    %147 = vector.broadcast %146 : vector<32x1xf32> to vector<32x64xf32>
    %148 = arith.mulf %145, %147 : vector<32x64xf32>
    %c256 = arith.constant 256 : index
    %c0_46 = arith.constant 0 : index
    %149 = vector.load %arg8[%c256, %c0_46] : memref<512x64xbf16, #tpu.memory_space<vmem>>, vector<64x64xbf16>
    %150 = arith.truncf %148 : vector<32x64xf32> to vector<32x64xbf16>
    %cst_47 = arith.constant dense<0.000000e+00> : vector<32x64xf32>
    %151 = tpu.matmul %150, %149, %cst_47 {dimension_numbers = #tpu.dot_dimension_numbers<[1], [0], [0], [1], [0, 0, 1, 1], [], []>} : vector<32x64xbf16>, vector<64x64xbf16>, vector<32x64xf32> -> vector<32x64xf32>
    %152 = arith.addf %144, %151 : vector<32x64xf32>
    %153 = vector.extract_strided_slice %128 {offsets = [96, 0], sizes = [32, 64], strides = [1, 1]} : vector<128x64xf32> to vector<32x64xf32>
    %154 = vector.extract_strided_slice %75 {offsets = [0, 3], sizes = [32, 1], strides = [1, 1]} : vector<32x4xf32> to vector<32x1xf32>
    %155 = vector.broadcast %154 : vector<32x1xf32> to vector<32x64xf32>
    %156 = arith.mulf %153, %155 : vector<32x64xf32>
    %c384 = arith.constant 384 : index
    %c0_48 = arith.constant 0 : index
    %157 = vector.load %arg8[%c384, %c0_48] : memref<512x64xbf16, #tpu.memory_space<vmem>>, vector<64x64xbf16>
    %158 = arith.truncf %156 : vector<32x64xf32> to vector<32x64xbf16>
    %cst_49 = arith.constant dense<0.000000e+00> : vector<32x64xf32>
    %159 = tpu.matmul %158, %157, %cst_49 {dimension_numbers = #tpu.dot_dimension_numbers<[1], [0], [0], [1], [0, 0, 1, 1], [], []>} : vector<32x64xbf16>, vector<64x64xbf16>, vector<32x64xf32> -> vector<32x64xf32>
    %160 = arith.addf %152, %159 : vector<32x64xf32>
    %161 = vector.extract_strided_slice %101 {offsets = [0, 64], sizes = [128, 64], strides = [1, 1]} : vector<128x128xbf16> to vector<128x64xbf16>
    %162 = vector.extract_strided_slice %83 {offsets = [0, 64], sizes = [32, 64], strides = [1, 1]} : vector<32x128xbf16> to vector<32x64xbf16>
    %163 = vector.extract_strided_slice %84 {offsets = [0, 64], sizes = [32, 64], strides = [1, 1]} : vector<32x128xbf16> to vector<32x64xbf16>
    %cst_50 = arith.constant dense<0.000000e+00> : vector<128x32xf32>
    %164 = tpu.matmul %161, %162, %cst_50 {dimension_numbers = #tpu.dot_dimension_numbers<[1], [1], [0], [0], [0, 0, 1, 0], [], []>} : vector<128x64xbf16>, vector<32x64xbf16>, vector<128x32xf32> -> vector<128x32xf32>
    %165 = arith.addf %164, %111 : vector<128x32xf32>
    %cst_51 = arith.constant dense<0xFF800000> : vector<128xf32>
    %166 = vector.multi_reduction <maximumf>, %165, %cst_51 [1] : vector<128x32xf32> to vector<128xf32>
    %167 = vector.shape_cast %166 : vector<128xf32> to vector<128x1xf32>
    %168 = vector.broadcast %167 : vector<128x1xf32> to vector<128x32xf32>
    %169 = arith.subf %165, %168 : vector<128x32xf32>
    %170 = math.exp %169 : vector<128x32xf32>
    %cst_52 = arith.constant dense<0.000000e+00> : vector<128xf32>
    %171 = vector.multi_reduction <add>, %170, %cst_52 [1] : vector<128x32xf32> to vector<128xf32>
    %172 = vector.shape_cast %171 : vector<128xf32> to vector<128x1xf32>
    %173 = vector.broadcast %172 : vector<128x1xf32> to vector<128x32xf32>
    %174 = arith.divf %170, %173 : vector<128x32xf32>
    %175 = arith.truncf %174 : vector<128x32xf32> to vector<128x32xbf16>
    %cst_53 = arith.constant dense<0.000000e+00> : vector<128x64xf32>
    %176 = tpu.matmul %175, %163, %cst_53 {dimension_numbers = #tpu.dot_dimension_numbers<[1], [0], [0], [1], [0, 0, 1, 1], [], []>} : vector<128x32xbf16>, vector<32x64xbf16>, vector<128x64xf32> -> vector<128x64xf32>
    %177 = vector.extract_strided_slice %176 {offsets = [0, 0], sizes = [32, 64], strides = [1, 1]} : vector<128x64xf32> to vector<32x64xf32>
    %178 = vector.extract_strided_slice %75 {offsets = [0, 0], sizes = [32, 1], strides = [1, 1]} : vector<32x4xf32> to vector<32x1xf32>
    %179 = vector.broadcast %178 : vector<32x1xf32> to vector<32x64xf32>
    %180 = arith.mulf %177, %179 : vector<32x64xf32>
    %c64 = arith.constant 64 : index
    %c0_54 = arith.constant 0 : index
    %181 = vector.load %arg8[%c64, %c0_54] : memref<512x64xbf16, #tpu.memory_space<vmem>>, vector<64x64xbf16>
    %182 = arith.truncf %180 : vector<32x64xf32> to vector<32x64xbf16>
    %cst_55 = arith.constant dense<0.000000e+00> : vector<32x64xf32>
    %183 = tpu.matmul %182, %181, %cst_55 {dimension_numbers = #tpu.dot_dimension_numbers<[1], [0], [0], [1], [0, 0, 1, 1], [], []>} : vector<32x64xbf16>, vector<64x64xbf16>, vector<32x64xf32> -> vector<32x64xf32>
    %184 = arith.addf %160, %183 : vector<32x64xf32>
    %185 = vector.extract_strided_slice %176 {offsets = [32, 0], sizes = [32, 64], strides = [1, 1]} : vector<128x64xf32> to vector<32x64xf32>
    %186 = vector.extract_strided_slice %75 {offsets = [0, 1], sizes = [32, 1], strides = [1, 1]} : vector<32x4xf32> to vector<32x1xf32>
    %187 = vector.broadcast %186 : vector<32x1xf32> to vector<32x64xf32>
    %188 = arith.mulf %185, %187 : vector<32x64xf32>
    %c192 = arith.constant 192 : index
    %c0_56 = arith.constant 0 : index
    %189 = vector.load %arg8[%c192, %c0_56] : memref<512x64xbf16, #tpu.memory_space<vmem>>, vector<64x64xbf16>
    %190 = arith.truncf %188 : vector<32x64xf32> to vector<32x64xbf16>
    %cst_57 = arith.constant dense<0.000000e+00> : vector<32x64xf32>
    %191 = tpu.matmul %190, %189, %cst_57 {dimension_numbers = #tpu.dot_dimension_numbers<[1], [0], [0], [1], [0, 0, 1, 1], [], []>} : vector<32x64xbf16>, vector<64x64xbf16>, vector<32x64xf32> -> vector<32x64xf32>
    %192 = arith.addf %184, %191 : vector<32x64xf32>
    %193 = vector.extract_strided_slice %176 {offsets = [64, 0], sizes = [32, 64], strides = [1, 1]} : vector<128x64xf32> to vector<32x64xf32>
    %194 = vector.extract_strided_slice %75 {offsets = [0, 2], sizes = [32, 1], strides = [1, 1]} : vector<32x4xf32> to vector<32x1xf32>
    %195 = vector.broadcast %194 : vector<32x1xf32> to vector<32x64xf32>
    %196 = arith.mulf %193, %195 : vector<32x64xf32>
    %c320 = arith.constant 320 : index
    %c0_58 = arith.constant 0 : index
    %197 = vector.load %arg8[%c320, %c0_58] : memref<512x64xbf16, #tpu.memory_space<vmem>>, vector<64x64xbf16>
    %198 = arith.truncf %196 : vector<32x64xf32> to vector<32x64xbf16>
    %cst_59 = arith.constant dense<0.000000e+00> : vector<32x64xf32>
    %199 = tpu.matmul %198, %197, %cst_59 {dimension_numbers = #tpu.dot_dimension_numbers<[1], [0], [0], [1], [0, 0, 1, 1], [], []>} : vector<32x64xbf16>, vector<64x64xbf16>, vector<32x64xf32> -> vector<32x64xf32>
    %200 = arith.addf %192, %199 : vector<32x64xf32>
    %201 = vector.extract_strided_slice %176 {offsets = [96, 0], sizes = [32, 64], strides = [1, 1]} : vector<128x64xf32> to vector<32x64xf32>
    %202 = vector.extract_strided_slice %75 {offsets = [0, 3], sizes = [32, 1], strides = [1, 1]} : vector<32x4xf32> to vector<32x1xf32>
    %203 = vector.broadcast %202 : vector<32x1xf32> to vector<32x64xf32>
    %204 = arith.mulf %201, %203 : vector<32x64xf32>
    %c448 = arith.constant 448 : index
    %c0_60 = arith.constant 0 : index
    %205 = vector.load %arg8[%c448, %c0_60] : memref<512x64xbf16, #tpu.memory_space<vmem>>, vector<64x64xbf16>
    %206 = arith.truncf %204 : vector<32x64xf32> to vector<32x64xbf16>
    %cst_61 = arith.constant dense<0.000000e+00> : vector<32x64xf32>
    %207 = tpu.matmul %206, %205, %cst_61 {dimension_numbers = #tpu.dot_dimension_numbers<[1], [0], [0], [1], [0, 0, 1, 1], [], []>} : vector<32x64xbf16>, vector<64x64xbf16>, vector<32x64xf32> -> vector<32x64xf32>
    %208 = arith.addf %200, %207 : vector<32x64xf32>
    %c0_62 = arith.constant 0 : index
    %c0_63 = arith.constant 0 : index
    %209 = vector.load %arg9[%c0_62, %c0_63] : memref<32x64xf32, #tpu.memory_space<vmem>>, vector<32x64xf32>
    tpu.vector_store %arg9[%c0_62, %c0_63], %208 {strides = array<i32>} : memref<32x64xf32, #tpu.memory_space<vmem>>, vector<32x64xf32>,
    return
  }
  func.func @transform_0(%arg0: i32) -> (i32, i32) {
    %c0_i32 = arith.constant 0 : i32
    %c0_i32_0 = arith.constant 0 : i32
    %c0_i32_1 = arith.constant 0 : i32
    return %c0_i32, %c0_i32_0 : i32, i32
  }
  func.func @transform_1(%arg0: i32) -> (i32, i32) {
    %c0_i32 = arith.constant 0 : i32
    %c0_i32_0 = arith.constant 0 : i32
    %c0_i32_1 = arith.constant 0 : i32
    return %c0_i32, %c0_i32_0 : i32, i32
  }
  func.func @transform_2(%arg0: i32) -> (i32, i32) {
    %c0_i32 = arith.constant 0 : i32
    %c0_i32_0 = arith.constant 0 : i32
    %c0_i32_1 = arith.constant 0 : i32
    return %c0_i32, %c0_i32_0 : i32, i32
  }
  func.func @transform_3(%arg0: i32) -> (i32, i32) {
    %c0_i32 = arith.constant 0 : i32
    %c0_i32_0 = arith.constant 0 : i32
    %c0_i32_1 = arith.constant 0 : i32
    return %c0_i32, %c0_i32_0 : i32, i32
  }
  func.func @transform_4(%arg0: i32) -> (i32, i32, i32) {
    %c0_i32 = arith.constant 0 : i32
    %c0_i32_0 = arith.constant 0 : i32
    %c0_i32_1 = arith.constant 0 : i32
    %c0_i32_2 = arith.constant 0 : i32
    return %c0_i32, %c0_i32_0, %c0_i32_1 : i32, i32, i32
  }
  func.func @transform_5(%arg0: i32) -> (i32, i32) {
    %c0_i32 = arith.constant 0 : i32
    %c0_i32_0 = arith.constant 0 : i32
    %c0_i32_1 = arith.constant 0 : i32
    return %c0_i32, %c0_i32_0 : i32, i32
  }
  func.func @transform_6(%arg0: i32) -> (i32, i32) {
    %c0_i32 = arith.constant 0 : i32
    %c0_i32_0 = arith.constant 0 : i32
    %c0_i32_1 = arith.constant 0 : i32
    return %c0_i32, %c0_i32_0 : i32, i32
  }
  func.func @transform_7(%arg0: i32) -> (i32, i32) {
    %c0_i32 = arith.constant 0 : i32
    %c0_i32_0 = arith.constant 0 : i32
    %c0_i32_1 = arith.constant 0 : i32
    return %c0_i32, %c0_i32_0 : i32, i32
  }
  func.func @transform_8(%arg0: i32) -> (i32, i32) {
    %c0_i32 = arith.constant 0 : i32
    %c0_i32_0 = arith.constant 0 : i32
    %c0_i32_1 = arith.constant 0 : i32
    return %c0_i32, %c0_i32_0 : i32, i32
  }
}

</mosaic_0001>

<bundles_post_ra>
// kernel: multihead_attention_forward.1
= control target key start
LH: loop header
LB: loop body
LE: loop exit
PB: predicated region body
PF: predicated region fallthrough
CT: control target
= control target key end

     0   :  { %s4773_s0 = inlined_call_operand.vmem [shape: f32[32,64], index: 0, kind: input, shape index: {}]   ;;  %s4774_s1 = inlined_call_operand.vmem [shape: f32[32,64], index: 1, kind: input, shape index: {}]   ;;  %s4775_s2 = inlined_call_operand.vmem [shape: f32[32,64], index: 2, kind: input, shape index: {}]   ;;  %s4776_s3 = inlined_call_operand.vmem [shape: bf16[64,4], index: 3, kind: input, shape index: {}]   ;;  %s4777_s4 = inlined_call_operand.vmem [shape: bf16[4,64,128], index: 4, kind: input, shape index: {}]   ;;  %s4778_s5 = inlined_call_operand.vmem [shape: bf16[64,128], index: 5, kind: input, shape index: {}]   ;;  %s4779_s6 = inlined_call_operand.vmem [shape: bf16[64,128], index: 6, kind: input, shape index: {}]   ;;  %s4780_s7 = inlined_call_operand.vmem [shape: bf16[512,64], index: 7, kind: input, shape index: {}]   ;;  %s4781_s8 = inlined_call_operand.hbm [shape: f32[32,64], index: 8, kind: output, shape index: {}]  }
   0x1   :  { %v3115_v0 = vld [vmem:[%s4776_s3 + $0x18] sm:$0xff]   ;;  %v3114_v2 = vld [vmem:[%s4776_s3 + $0x10] sm:$0xff]   ;;  %v3113_v7 = vld [vmem:[%s4776_s3 + $0x8] sm:$0xff]  }
   0x2   :  { %v3044_v1 = vld [vmem:[%s4778_s5 + $0x18] sm:$0xff]  ;;  %v3112_v3 = vunpack.c.h.bf16 %v3115_v0  ;;  %v3111_v4 = vunpack.c.l.bf16 %v3115_v0  ;;  %v3043_v5 = vld [vmem:[%s4778_s5 + $0x10] sm:$0xff]  ;;  %v3108_v6 = vunpack.c.h.bf16 %v3114_v2  ;;  %v3107_v8 = vunpack.c.l.bf16 %v3114_v2  ;;  %v3042_v9 = vld [vmem:[%s4778_s5 + $0x8] sm:$0xff] }
   0x3   :  { %522 = vmatpush.bf16.msra.mxu1 %v3044_v1 }
   0x4   :  { %80 = vmatpush.msra.mxu0 %v3112_v3  ;;  %3116 = vmatpush.msra.mxu3 %v3112_v3 }
   0x6   :  { %81 = vmatpush.msra.mxu0 %v3111_v4  ;;  %3117 = vmatpush.msra.mxu3 %v3111_v4 }
   0x7   :  { %523 = vmatpush.bf16.msra.mxu1 %v3043_v5 }
   0x8   :  { %13 = vsyncpa [#allocation3], 0  ;;  %82 = vmatpush.msra.mxu0 %v3108_v6  ;;  %3118 = vmatpush.msra.mxu3 %v3108_v6  ;;  %v3104_v10 = vunpack.c.h.bf16 %v3113_v7  ;;  %v3098_v11 = vld [vmem:[%s4776_s3] sm:$0xff]   ;;  %v3103_v12 = vunpack.c.l.bf16 %v3113_v7  ;;  %v36_v16 = vld [vmem:[%s4774_s1 + $0x8] sm:$0xff]  ;;  %vm4783_vm0 = vcmask 523264   ;;  %vm4782_vm1 = vcmask 31744  }
   0x9   :  { %v3041_v13 = vld [vmem:[%s4778_s5] sm:$0xff]  ;;  %v3100_v14 = vunpack.c.h.bf16 %v3098_v11  ;;  %v3099_v17 = vunpack.c.l.bf16 %v3098_v11  ;;  %v33_v19 = vld [vmem:[%s4773_s0 + $0x10] sm:$0xff]  ;;  %v3052_v21 = vld [vmem:[%s4777_s4 + $0x18] sm:$0xff]  ;;  %vm1043_vm3 = vcmask 261120   ;;  %s2697_s16 = sshll.u32 %s4781_s8, 4  ;;  %s3345_s17 = smov 128   ;;  %s2698_s16 = int_to_ptr.hbm [resolvable:$true] %s2697_s16 }
   0xa   :  { %83 = vmatpush.msra.mxu0 %v3107_v8  ;;  %3119 = vmatpush.msra.mxu3 %v3107_v8  ;;  %v35_v15 = vld [vmem:[%s4774_s1] sm:$0xff]  ;;  %v3056_v22 = vld [vmem:[%s4777_s4 + $0x38] sm:$0xff]  ;;  %v3051_v23 = vld [vmem:[%s4777_s4 + $0x10] sm:$0xff]  ;;  %s3346_s18 = smov 8  }
   0xb   :  { %524 = vmatpush.bf16.msra.mxu1 %v3042_v9  ;;  %v31_v18 = vld [vmem:[%s4773_s0] sm:$0xff]  ;;  %v478_v20 = vpack.c.bf16 %v36_v16, %v35_v15  ;;  %v3060_v24 = vld [vmem:[%s4777_s4 + $0x58] sm:$0xff]  ;;  %v3055_v25 = vld [vmem:[%s4777_s4 + $0x30] sm:$0xff] }
   0xc   :  { %84 = vmatpush.msra.mxu0 %v3104_v10  ;;  %3120 = vmatpush.msra.mxu3 %v3104_v10  ;;  %v3059_v26 = vld [vmem:[%s4777_s4 + $0x50] sm:$0xff]  ;;  %v32_v27 = vld [vmem:[%s4773_s0 + $0x8] sm:$0xff]  ;;  %v34_v28 = vld [vmem:[%s4773_s0 + $0x18] sm:$0xff] }
   0xd   :  { %v3050_v29 = vld [vmem:[%s4777_s4 + $0x8] sm:$0xff]  ;;  %v3049_v32 = vld [vmem:[%s4777_s4] sm:$0xff]  ;;  %v37_v33 = vld [vmem:[%s4774_s1 + $0x10] sm:$0xff]  ;;  %v3481_v37 = vpack.c.bf16 %v32_v27, %v31_v18  ;;  %v3488_v39 = vpack.c.bf16 %v34_v28, %v33_v19 }
   0xe   :  { %85 = vmatpush.msra.mxu0 %v3103_v12  ;;  %3121 = vmatpush.msra.mxu3 %v3103_v12  ;;  %v3054_v30 = vld [vmem:[%s4777_s4 + $0x28] sm:$0xff]  ;;  %v38_v34 = vld [vmem:[%s4774_s1 + $0x18] sm:$0xff]  ;;  %v3053_v35 = vld [vmem:[%s4777_s4 + $0x20] sm:$0xff] }
   0xf   :  { %525 = vmatpush.bf16.msra.mxu1 %v3041_v13  ;;  %v3058_v31 = vld [vmem:[%s4777_s4 + $0x48] sm:$0xff]  ;;  %v3057_v36 = vld [vmem:[%s4777_s4 + $0x40] sm:$0xff]  ;;  %v479_v38 = vpack.c.bf16 %v38_v34, %v37_v33 }
  0x10   :  { %86 = vmatpush.msra.mxu0 %v3100_v14  ;;  %3122 = vmatpush.msra.mxu3 %v3100_v14 }
  0x12   :  { %87 = vmatpush.msra.mxu0 %v3099_v17  ;;  %3123 = vmatpush.msra.mxu3 %v3099_v17 }
  0x13   :  { %2709 = vmatmul.msk.f32.vlgmr.msra.gmra.mxu0 %vm4783_vm0, %v31_v18  ;;  %2711 = vmatmul.msk.f32.vlgmr.msra.gmra.mxu3 %vm4783_vm0, %v33_v19 }
  0x14   :  { %2749 = vmatmul.msk.bf16.vlgmr.msra.gmra.mxu1 %vm4783_vm0, %v478_v20  ;;  %646 = vmatpush.bf16.msrb.mxu3 %v3052_v21 }
  0x15   :  { %702 = vmatpush.bf16.msrb.mxu0 %v3056_v22  ;;  %758 = vmatpush.bf16.msrb.mxu1 %v3060_v24 }
  0x18   :  { %647 = vmatpush.bf16.msrb.mxu3 %v3051_v23 }
  0x19   :  { %703 = vmatpush.bf16.msrb.mxu0 %v3055_v25  ;;  %759 = vmatpush.bf16.msrb.mxu1 %v3059_v26 }
  0x1b   :  { %2710 = vmatmul.msk.f32.gmra.mxu0 %vm4783_vm0, %v32_v27  ;;  %2712 = vmatmul.msk.f32.gmra.mxu3 %vm4783_vm0, %v34_v28 }
  0x1c   :  { %648 = vmatpush.bf16.msrb.mxu3 %v3050_v29 }
  0x1d   :  { %704 = vmatpush.bf16.msrb.mxu0 %v3054_v30  ;;  %760 = vmatpush.bf16.msrb.mxu1 %v3058_v31 }
  0x20   :  { %649 = vmatpush.bf16.msrb.mxu3 %v3049_v32 }
  0x21   :  { %705 = vmatpush.bf16.msrb.mxu0 %v3053_v35  ;;  %761 = vmatpush.bf16.msrb.mxu1 %v3057_v36 }
  0x23   :  { %2785 = vmatmul.msk.bf16.vlgmr.msrb.gmra.mxu3 %vm4783_vm0, %v3481_v37 }
  0x24   :  { %2750 = vmatmul.msk.bf16.gmra.mxu1 %vm4783_vm0, %v479_v38  ;;  %2811 = vmatmul.msk.bf16.vlgmr.msrb.gmra.mxu0 %vm4783_vm0, %v3481_v37 }
  0x33   :  { %2786 = vmatmul.msk.bf16.gmra.mxu3 %vm4783_vm0, %v3488_v39 }
  0x34   :  { %2812 = vmatmul.msk.bf16.gmra.mxu0 %vm4783_vm0, %v3488_v39  ;;  %2837 = vmatmul.msk.bf16.vlgmr.msrb.gmra.mxu1 %vm4783_vm0, %v3481_v37 }
  0x44   :  { %2838 = vmatmul.msk.bf16.gmra.mxu1 %vm4783_vm0, %v3488_v39 }
  0x90   :  { %v3498_v40 = vpop.f32.mrf.mxu0 }
  0x91   :  { %v527_v41 = vpop.f32.mrf.mxu1  ;;  %v102_v42 = vsel %vm4782_vm1, %v3498_v40, -inf }
  0x92   :  { %103 = vmax.xlane.f32.xlu1 %v102_v42  ;;  %v596_v58 = vpack.c.bf16 %v527_v41, %v527_v41 }
  0x94   :  { %v958_v63 = vunpack.c.l.b16 %v596_v58 }
  0x96   :  { %v3502_v43 = vpop.f32.mrf.mxu3 }
  0x97   :  { %v108_v44 = vsel %vm4782_vm1, %v3502_v43, -inf }
  0x98   :  { %109 = vmax.xlane.f32.xlu0 %v108_v44  ;;  %v3506_v45 = vpop.f32.mrf.mxu0 }
  0x99   :  { %v529_v46 = vpop.f32.mrf.mxu1  ;;  %v105_v47 = vsel %vm4782_vm1, %v3506_v45, -inf }
  0x9a   :  { %106 = vmax.xlane.f32.xlu1 %v105_v47  ;;  %v597_v55 = vpack.c.bf16 %v529_v46, %v529_v46 }
  0x9c   :  { %v959_v61 = vunpack.c.l.b16 %v597_v55 }
  0x9e   :  { %v3510_v48 = vpop.f32.mrf.mxu3  ;;  %v3518_v0 = vpack.c.b16 %v959_v61, %v958_v63 }
  0x9f   :  { %v111_v49 = vsel %vm4782_vm1, %v3510_v48, -inf }
  0xa0   :  { %v989_v3 = vsel %vm4783_vm0, %v3518_v0, 0 }
  0xa1   :  { %v532_v50 = vpop.f32.mrf.mxu1  ;;  %v707_v9 = vpop.f32.mrf.mxu0 }
  0xa2   :  { %112 = vmax.xlane.f32.xlu1 %v111_v49  ;;  %v598_v52 = vpack.c.bf16 %v532_v50, %v532_v50  ;;  %v717_v16 = vpack.c.bf16 %v707_v9, %v707_v9 }
  0xa4   :  { %v960_v56 = vunpack.c.l.b16 %v598_v52  ;;  %v847_v19 = vunpack.c.l.b16 %v717_v16 }
  0xa6   :  { %v651_v51 = vpop.f32.mrf.mxu3 }
  0xa7   :  { %v661_v1 = vpack.c.bf16 %v651_v51, %v651_v51 }
  0xa9   :  { %v534_v53 = vpop.f32.mrf.mxu1  ;;  %v837_v5 = vunpack.c.l.b16 %v661_v1  ;;  %v709_v15 = vpop.f32.mrf.mxu0 }
  0xaa   :  { %v599_v54 = vpack.c.bf16 %v534_v53, %v534_v53  ;;  %v718_v17 = vpack.c.bf16 %v709_v15, %v709_v15 }
  0xac   :  { %v961_v57 = vunpack.c.l.b16 %v599_v54  ;;  %v848_v20 = vunpack.c.l.b16 %v718_v17 }
  0xae   :  { %v3514_v59 = vpack.c.b16 %v961_v57, %v960_v56  ;;  %v653_v60 = vpop.f32.mrf.mxu3  ;;  %v3530_v21 = vpack.c.b16 %v848_v20, %v847_v19 }
  0xaf   :  { %v662_v2 = vpack.c.bf16 %v653_v60, %v653_v60 }
  0xb0   :  { %v992_v62 = vsel %vm4783_vm0, %v3514_v59, 0 }
  0xb1   :  { %1000 = vmatpush.bf16.xpose.msra.mxu3 %v992_v62  ;;  %v838_v6 = vunpack.c.l.b16 %v662_v2  ;;  %v712_v18 = vpop.f32.mrf.mxu0  ;;  %v763_v23 = vpop.f32.mrf.mxu1 }
  0xb2   :  { %v719_v24 = vpack.c.bf16 %v712_v18, %v712_v18  ;;  %v773_v30 = vpack.c.bf16 %v763_v23, %v763_v23 }
  0xb3   :  { %v3522_v7 = vpack.c.b16 %v838_v6, %v837_v5 }
  0xb4   :  { %v849_v26 = vunpack.c.l.b16 %v719_v24  ;;  %v857_v33 = vunpack.c.l.b16 %v773_v30 }
  0xb6   :  { %v656_v4 = vpop.f32.mrf.mxu3 }
  0xb7   :  { %v663_v10 = vpack.c.bf16 %v656_v4, %v656_v4 }
  0xb9   :  { %1001 = vmatpush.bf16.xpose.msra.mxu3 %v989_v3  ;;  %v839_v12 = vunpack.c.l.b16 %v663_v10  ;;  %v714_v22 = vpop.f32.mrf.mxu0  ;;  %v765_v29 = vpop.f32.mrf.mxu1  ;;  %v198_v3 = vlaneseq  ;;  %v4786_v10 = vmov -1e+30  }
  0xba   :  { %v720_v25 = vpack.c.bf16 %v714_v22, %v714_v22  ;;  %v774_v31 = vpack.c.bf16 %v765_v29, %v765_v29 }
  0xbb   :  { %v3568_v4 = vshrl.u32 %v198_v3, 7 }
  0xbc   :  { %v850_v27 = vunpack.c.l.b16 %v720_v25  ;;  %v858_v34 = vunpack.c.l.b16 %v774_v31 }
  0xbd   :  { %v877_v22 = vadd.s32 24, %v3568_v4  ;;  %v878_v30 = vadd.s32 32, %v3568_v4 }
  0xbe   :  { %v658_v8 = vpop.f32.mrf.mxu3  ;;  %v3534_v28 = vpack.c.b16 %v850_v27, %v849_v26  ;;  %v3538_v35 = vpack.c.b16 %v858_v34, %v857_v33 }
  0xbf   :  { %v664_v11 = vpack.c.bf16 %v658_v8, %v658_v8  ;;  %v875_v8 = vadd.s32 8, %v3568_v4 }
  0xc0   :  { %2865 = vmatmul.msk.bf16.vlgmr.msra.gmra.mxu3 %vm4783_vm0, %v3522_v7 }
  0xc1   :  { %v840_v13 = vunpack.c.l.b16 %v664_v11  ;;  %v768_v32 = vpop.f32.mrf.mxu1 }
  0xc2   :  { %v775_v38 = vpack.c.bf16 %v768_v32, %v768_v32 }
  0xc3   :  { %v3526_v14 = vpack.c.b16 %v840_v13, %v839_v12  ;;  %v876_v13 = vadd.s32 16, %v3568_v4 }
  0xc4   :  { %v859_v46 = vunpack.c.l.b16 %v775_v38 }
  0xc9   :  { %v770_v36 = vpop.f32.mrf.mxu1 }
  0xca   :  { %v776_v41 = vpack.c.bf16 %v770_v36, %v770_v36 }
  0xcc   :  { %v860_v49 = vunpack.c.l.b16 %v776_v41  ;;  %v879_v41 = vadd.s32 40, %v3568_v4 }
  0xce   :  { %v3544_v52 = vpack.c.b16 %v860_v49, %v859_v46 }
  0xd0   :  { %2866 = vmatmul.msk.bf16.gmra.mxu3 %vm4783_vm0, %v3526_v14 }
  0xe0   :  { %2867 = vmatmul.msk.bf16.gmra.mxu3 %vm4783_vm0, %v3530_v21 }
  0xf0   :  { %2868 = vmatmul.msk.bf16.gmra.mxu3 %vm4783_vm0, %v3534_v28 }
 0x100   :  { %2869 = vmatmul.msk.bf16.gmra.mxu3 %vm4783_vm0, %v3538_v35 }
 0x105   :  { %v104_v42 = vpop.xlane.xlu1 %103 }
 0x106   :  { %v114_v44 = vsub.f32 %v3498_v40, %v104_v42 }
 0x108   :  { %v118_v47 = vmul.f32 1.442695, %v114_v44 }
 0x10a   :  { %3159 = vpow2.f32 %v118_v47 }
 0x10b   :  { %v110_v50 = vpop.xlane.xlu0 %109 }
 0x10c   :  { %v116_v51 = vsub.f32 %v3502_v43, %v110_v50 }
 0x10d   :  { %v107_v53 = vpop.xlane.xlu1 %106 }
 0x10e   :  { %v122_v54 = vmul.f32 1.442695, %v116_v51  ;;  %v115_v55 = vsub.f32 %v3506_v45, %v107_v53  ;;  %v880_v51 = vadd.s32 48, %v3568_v4 }
 0x110   :  { %v3547_v56 = vpop.eup %3159  ;;  %3161 = vpow2.f32 %v122_v54  ;;  %v120_v57 = vmul.f32 1.442695, %v115_v55  ;;  %2870 = vmatmul.msk.bf16.gmra.mxu3 %vm4783_vm0, %v3544_v52 }
 0x111   :  { %v126_v40 = vsel %vm4782_vm1, %v3547_v56, 0.0 }
 0x112   :  { %3163 = vpow2.f32 %v120_v57  ;;  %127 = vadd.xlane.f32.xlu1 %v126_v40 }
 0x115   :  { %v113_v58 = vpop.xlane.xlu1 %112 }
 0x116   :  { %v3553_v43 = vpop.eup %3161  ;;  %v117_v60 = vsub.f32 %v3510_v48, %v113_v58  ;;  %v3566_v48 = vand.u32 127, %v198_v3 }
 0x117   :  { %v132_v62 = vsel %vm4782_vm1, %v3553_v43, 0.0 }
 0x118   :  { %v3556_v61 = vpop.eup %3163  ;;  %v124_v45 = vmul.f32 1.442695, %v117_v60  ;;  %v890_v5 = vsub.s32 %v3568_v4, %v3566_v48  ;;  %v891_v9 = vsub.s32 %v875_v8, %v3566_v48  ;;  %v892_v18 = vsub.s32 %v876_v13, %v3566_v48 }
 0x119   :  { %v129_v63 = vsel %vm4782_vm1, %v3556_v61, 0.0  ;;  %v893_v26 = vsub.s32 %v877_v22, %v3566_v48  ;;  %v894_v34 = vsub.s32 %v878_v30, %v3566_v48  ;;  %v895_v47 = vsub.s32 %v879_v41, %v3566_v48 }
 0x11a   :  { %3165 = vpow2.f32 %v124_v45  ;;  %133 = vadd.xlane.f32.xlu1 %v132_v62  ;;  %130 = vadd.xlane.f32.xlu2 %v129_v63  ;;  %v906_v6 = vand.u32 1, %v890_v5  ;;  %v907_v12 = vand.u32 1, %v891_v9  ;;  %v908_v20 = vand.u32 1, %v892_v18 }
 0x11b   :  { %v909_v29 = vand.u32 1, %v893_v26  ;;  %v910_v38 = vand.u32 1, %v894_v34  ;;  %v911_v50 = vand.u32 1, %v895_v47  ;;  %v896_v57 = vsub.s32 %v880_v51, %v3566_v48 }
 0x11c   :  { %vm922_vm2 = vcmp.eq.s32.totalorder %v906_v6, 0  ;;  %vm923_vm4 = vcmp.eq.s32.totalorder %v907_v12, 0  ;;  %vm924_vm5 = vcmp.eq.s32.totalorder %v908_v20, 0  ;;  %v881_v60 = vadd.s32 56, %v3568_v4 }
 0x11d   :  { %v3575_v11 = vsel %vm922_vm2, 0.0, %v4786_v10  ;;  %v3585_v19 = vsel %vm923_vm4, 0.0, %v4786_v10  ;;  %v3595_v27 = vsel %vm924_vm5, 0.0, %v4786_v10  ;;  %vm925_vm6 = vcmp.eq.s32.totalorder %v909_v29, 0 }
 0x11e   :  { %v3605_v36 = vsel %vm925_vm6, 0.0, %v4786_v10  ;;  %vm926_vm7 = vcmp.eq.s32.totalorder %v910_v38, 0  ;;  %vm927_vm8 = vcmp.eq.s32.totalorder %v911_v50, 0  ;;  %v912_v58 = vand.u32 1, %v896_v57 }
 0x11f   :  { %v3615_v49 = vsel %vm926_vm7, 0.0, %v4786_v10  ;;  %v3625_v40 = vsel %vm927_vm8, 0.0, %v4786_v10  ;;  %v882_v6 = vadd.s32 64, %v3568_v4  ;;  %v883_v18 = vadd.s32 72, %v3568_v4 }
 0x120   :  { %v3562_v1 = vpop.eup %3165  ;;  %vm928_vm9 = vcmp.eq.s32.totalorder %v912_v58, 0  ;;  %v4788_v38 = vmov 0   ;;  %v3340_v57 = vmov 1  }
 0x121   :  { %v135_v2 = vsel %vm4782_vm1, %v3562_v1, 0.0  ;;  %v3635_v3 = vsel %vm928_vm9, 0.0, %v4786_v10  ;;  %v898_v13 = vsub.s32 %v882_v6, %v3566_v48  ;;  %v899_v26 = vsub.s32 %v883_v18, %v3566_v48  ;;  %3134 = vset.pattern.permute.xlu0 %v4788_v38  ;;  %3135 = vset.pattern.permute.xlu2 %v3340_v57 }
 0x122   :  { %136 = vadd.xlane.f32.xlu2 %v135_v2  ;;  %v897_v2 = vsub.s32 %v881_v60, %v3566_v48 }
 0x123   :  { %v915_v30 = vand.u32 1, %v899_v26 }
 0x124   :  { %v913_v5 = vand.u32 1, %v897_v2 }
 0x125   :  { %vm931_vm12 = vcmp.eq.s32.totalorder %v915_v30, 0 }
 0x126   :  { %vm929_vm10 = vcmp.eq.s32.totalorder %v913_v5, 0  ;;  %v3667_v47 = vsel %vm931_vm12, 0.0, %v4786_v10 }
 0x127   :  { %4802 = vst [vmem:[#allocation7_spill] sm:$0xff] %v3667_v47 }
 0x143   :  { %v1003_v15 = vpop.f32.mrf.mxu3 }
 0x144   :  { %v3579_v16 = vadd.f32 %v1003_v15, %v3575_v11  ;;  %v3645_v15 = vsel %vm929_vm10, 0.0, %v4786_v10 }
 0x145   :  { %4800 = vst [vmem:[#allocation5_spill] sm:$0xff] %v3645_v15 }
 0x146   :  { %v1044_v17 = vsel %vm1043_vm3, %v3579_v16, -inf }
 0x147   :  { %1045 = vmax.xlane.f32.xlu0 %v1044_v17  ;;  %v914_v17 = vand.u32 1, %v898_v13 }
 0x149   :  { %vm930_vm11 = vcmp.eq.s32.totalorder %v914_v17, 0 }
 0x14a   :  { %v3656_v29 = vsel %vm930_vm11, 0.0, %v4786_v10 }
 0x14b   :  { %v1005_v23 = vpop.f32.mrf.mxu3  ;;  %4801 = vst [vmem:[#allocation6_spill] sm:$0xff] %v3656_v29 }
 0x14c   :  { %v3589_v24 = vadd.f32 %v1005_v23, %v3585_v19  ;;  %v4790_v23 = vmov 2  }
 0x14d   :  { %3136 = vset.pattern.permute.xlu1 %v4790_v23 }
 0x14e   :  { %v1047_v25 = vsel %vm1043_vm3, %v3589_v24, -inf }
 0x14f   :  { %1048 = vmax.xlane.f32.xlu0 %v1047_v25 }
 0x153   :  { %v1008_v31 = vpop.f32.mrf.mxu3 }
 0x154   :  { %v3599_v32 = vadd.f32 %v1008_v31, %v3595_v27  ;;  %v884_v31 = vadd.s32 80, %v3568_v4 }
 0x156   :  { %v1050_v33 = vsel %vm1043_vm3, %v3599_v32, -inf }
 0x157   :  { %1051 = vmax.xlane.f32.xlu2 %v1050_v33 }
 0x15b   :  { %v1010_v42 = vpop.f32.mrf.mxu3 }
 0x15c   :  { %v3609_v44 = vadd.f32 %v1010_v42, %v3605_v36  ;;  %v900_v42 = vsub.s32 %v884_v31, %v3566_v48 }
 0x15e   :  { %v1053_v46 = vsel %vm1043_vm3, %v3609_v44, -inf  ;;  %v916_v50 = vand.u32 1, %v900_v42 }
 0x15f   :  { %1054 = vmax.xlane.f32.xlu2 %v1053_v46 }
 0x160   :  { %vm932_vm13 = vcmp.eq.s32.totalorder %v916_v50, 0 }
 0x163   :  { %v1013_v53 = vpop.f32.mrf.mxu3 }
 0x164   :  { %v3619_v54 = vadd.f32 %v1013_v53, %v3615_v49 }
 0x166   :  { %v1056_v55 = vsel %vm1043_vm3, %v3619_v54, -inf }
 0x167   :  { %1057 = vmax.xlane.f32.xlu2 %v1056_v55 }
 0x16b   :  { %v1015_v45 = vpop.f32.mrf.mxu3 }
 0x16c   :  { %v3629_v62 = vadd.f32 %v1015_v45, %v3625_v40 }
 0x16e   :  { %v1059_v63 = vsel %vm1043_vm3, %v3629_v62, -inf }
 0x16f   :  { %1060 = vmax.xlane.f32.xlu0 %v1059_v63 }
 0x173   :  { %v1018_v8 = vpop.f32.mrf.mxu3 }
 0x174   :  { %v3639_v9 = vadd.f32 %v1018_v8, %v3635_v3  ;;  %v3676_v8 = vsel %vm932_vm13, 0.0, %v4786_v10 }
 0x175   :  { %4803 = vst [vmem:[#allocation8_spill] sm:$0xff] %v3676_v8 }
 0x176   :  { %v1062_v12 = vsel %vm1043_vm3, %v3639_v9, -inf }
 0x177   :  { %1063 = vmax.xlane.f32.xlu1 %v1062_v12 }
 0x17b   :  { %v1020_v20 = vpop.f32.mrf.mxu3 }
 0x17c   :  { %v3649_v22 = vadd.f32 %v1020_v20, %v3645_v15 }
 0x17e   :  { %v1065_v25 = vsel %vm1043_vm3, %v3649_v22, -inf }
 0x17f   :  { %1066 = vmax.xlane.f32.xlu2 %v1065_v25 }
 0x183   :  { %v1023_v33 = vpop.f32.mrf.mxu3 }
 0x184   :  { %v3660_v34 = vadd.f32 %v1023_v33, %v3656_v29 }
 0x185   :  { %v128_v41 = vpop.xlane.xlu1 %127 }
 0x186   :  { %3167 = vrcp.f32 %v128_v41  ;;  %v1068_v46 = vsel %vm1043_vm3, %v3660_v34, -inf  ;;  %v149_v63 = vand.u32 2147483648, %v128_v41  ;;  %v147_v6 = vand.u32 2147483647, %v128_v41 }
 0x187   :  { %1069 = vmax.xlane.f32.xlu2 %v1068_v46  ;;  %vm143_vm15 = vweird.f32 %v128_v41 }
 0x188   :  { %v150_v18 = vor.u32 1.1754944e-38, %v149_v63  ;;  %vm148_vm4 = vcmp.eq.f32.partialorder %v147_v6, 8.507059e+37 }
 0x18b   :  { %v1025_v51 = vpop.f32.mrf.mxu3 }
 0x18c   :  { %v3168_v53 = vpop.eup %3167  ;;  %v3670_v55 = vadd.f32 %v1025_v51, %v3667_v47 }
 0x18d   :  { %v139_v58 = vmul.f32 %v3168_v53, %v128_v41  ;;  %v131_v60 = vpop.xlane.xlu2 %130  ;;  %vm144_vm14 = vweird.f32 %v3168_v53 }
 0x18e   :  { %3169 = vrcp.f32 %v131_v60  ;;  %v1071_v2 = vsel %vm1043_vm3, %v3670_v55, -inf  ;;  %vm145_vm2 = vmor %vm143_vm15, %vm144_vm14  ;;  %v164_v50 = vand.u32 2147483648, %v131_v60  ;;  %vm158_vm6 = vweird.f32 %v131_v60 }
 0x18f   :  { %v140_v45 = vsub.f32 1.0, %v139_v58  ;;  %1072 = vmax.xlane.f32.xlu0 %v1071_v2  ;;  %v162_v51 = vand.u32 2147483647, %v131_v60 }
 0x190   :  { %v165_v58 = vor.u32 1.1754944e-38, %v164_v50 }
 0x191   :  { %v141_v5 = vmul.f32 %v3168_v53, %v140_v45  ;;  %vm163_vm8 = vcmp.eq.f32.partialorder %v162_v51, 8.507059e+37 }
 0x193   :  { %v142_v12 = vadd.f32 %v3168_v53, %v141_v5  ;;  %v1028_v13 = vpop.f32.mrf.mxu3 }
 0x194   :  { %v3170_v17 = vpop.eup %3169  ;;  %v3679_v20 = vadd.f32 %v1028_v13, %v3676_v8 }
 0x195   :  { %v146_v25 = vsel %vm145_vm2, %v3168_v53, %v142_v12  ;;  %v154_v26 = vmul.f32 %v3170_v17, %v131_v60  ;;  %vm159_vm5 = vweird.f32 %v3170_v17  ;;  %v4784_v53 = vmov 3   ;;  %v137_v63 = vpop.xlane.xlu2 %136 }
 0x196   :  { %v151_v30 = vsel %vm148_vm4, %v150_v18, %v146_v25  ;;  %v1074_v42 = vsel %vm1043_vm3, %v3679_v20, -inf  ;;  %vm160_vm7 = vmor %vm158_vm6, %vm159_vm5  ;;  %3171 = vrcp.f32 %v137_v63  ;;  %v885_v12 = vadd.s32 88, %v3568_v4  ;;  %v134_v18 = vpop.xlane.xlu1 %133 }
 0x197   :  { %v3682_v31 = vmul.f32 %v3547_v56, %v151_v30  ;;  %v155_v33 = vsub.f32 1.0, %v154_v26  ;;  %1075 = vmax.xlane.f32.xlu2 %v1074_v42  ;;  %v194_v26 = vand.u32 2147483648, %v137_v63  ;;  %vm188_vm10 = vweird.f32 %v137_v63 }
 0x198   :  { %3173 = vrcp.f32 %v134_v18  ;;  %vm173_vm15 = vweird.f32 %v134_v18  ;;  %vm318_vm5 = vcmp.gt.s32.totalorder %v3566_v48, 2 }
 0x199   :  { %295 = vperm.xlu1 %3136, %v3682_v31   ;;  %v156_v41 = vmul.f32 %v3170_v17, %v155_v33  ;;  %v192_v33 = vand.u32 2147483647, %v137_v63  ;;  %v195_v50 = vor.u32 1.1754944e-38, %v194_v26 }
 0x19b   :  { %v157_v46 = vadd.f32 %v3170_v17, %v156_v41  ;;  %vm193_vm13 = vcmp.eq.f32.partialorder %v192_v33, 8.507059e+37 }
 0x19c   :  { %v3172_v60 = vpop.eup %3171 }
 0x19d   :  { %v161_v56 = vsel %vm160_vm7, %v3170_v17, %v157_v46  ;;  %v184_v5 = vmul.f32 %v3172_v60, %v137_v63  ;;  %v901_v17 = vsub.s32 %v885_v12, %v3566_v48  ;;  %vm189_vm9 = vweird.f32 %v3172_v60 }
 0x19e   :  { %v166_v45 = vsel %vm163_vm8, %v165_v58, %v161_v56  ;;  %vm190_vm11 = vmor %vm188_vm10, %vm189_vm9  ;;  %v3174_v63 = vpop.eup %3173  ;;  %vm273_vm9 = vcmp.gt.s32.totalorder %v3566_v48, 1 }
 0x19f   :  { %v3691_v2 = vmul.f32 %v3556_v61, %v166_v45  ;;  %v185_v6 = vsub.f32 1.0, %v184_v5  ;;  %v917_v30 = vand.u32 1, %v901_v17  ;;  %v1030_v45 = vpop.f32.mrf.mxu3  ;;  %v3047_v17 = vld [vmem:[%s4779_s6 + $0x10] sm:$0xff]  ;;  %vm174_vm14 = vweird.f32 %v3174_v63 }
 0x1a0   :  { %vm175_vm2 = vmor %vm173_vm15, %vm174_vm14 }
 0x1a1   :  { %3137 = vset.pattern.permute.xlu1 %v4784_v53  ;;  %v186_v61 = vmul.f32 %v3172_v60, %v185_v6  ;;  %vm933_vm12 = vcmp.eq.s32.totalorder %v917_v30, 0 }
 0x1a2   :  { %340 = vperm.xlu1 %3137, %v3682_v31   ;;  %v3706_v58 = vsel %vm933_vm12, 0.0, %v4786_v10 }
 0x1a3   :  { %202 = vperm.xlu0 %3134, %v3682_v31   ;;  %v187_v25 = vadd.f32 %v3172_v60, %v186_v61  ;;  %4804 = vst [vmem:[#allocation9_spill] sm:$0xff] %v3706_v58  ;;  %v3713_v6 = vadd.f32 %v1030_v45, %v3706_v58  ;;  %v3048_v61 = vld [vmem:[%s4779_s6 + $0x18] sm:$0xff] }
 0x1a4   :  { %581 = vmatpush.bf16.msra.mxu2 %v3048_v61  ;;  %v40_v61 = vld [vmem:[%s4775_s2 + $0x8] sm:$0xff] }
 0x1a5   :  { %v191_v41 = vsel %vm190_vm11, %v3172_v60, %v187_v25  ;;  %v1077_v12 = vsel %vm1043_vm3, %v3713_v6, -inf }
 0x1a6   :  { %v196_v51 = vsel %vm193_vm13, %v195_v50, %v191_v41  ;;  %vm363_vm13 = vcmp.gt.s32.totalorder %v3566_v48, 3 }
 0x1a7   :  { %v3709_v5 = vmul.f32 %v3562_v1, %v196_v51  ;;  %v179_v51 = vand.u32 2147483648, %v134_v18 }
 0x1a8   :  { %582 = vmatpush.bf16.msra.mxu2 %v3047_v17 }
 0x1aa   :  { %3138 = vset.pattern.permute.xlu1 %v4788_v38 }
 0x1ab   :  { %207 = vperm.xlu1 %3138, %v3691_v2  }
 0x1af   :  { %250 = vperm.xlu2 %3135, %v3682_v31  }
 0x1b3   :  { %3144 = vset.pattern.permute.xlu1 %v4790_v23 }
 0x1b7   :  { %254 = vperm.xlu2 %3135, %v3691_v2  }
 0x1ba   :  { %v3699_v13 = vpop.xlane.xlu0 %1045 }
 0x1bf   :  { %3139 = vset.pattern.permute.xlu2 %v4790_v23 }
 0x1c0   :  { %299 = vperm.xlu2 %3139, %v3691_v2  }
 0x1c2   :  { %v1049_v42 = vpop.xlane.xlu0 %1048 }
 0x1c3   :  { %v1093_v46 = vsub.f32 %v3589_v24, %v1049_v42  ;;  %v169_v24 = vmul.f32 %v3174_v63, %v134_v18 }
 0x1c5   :  { %v1110_v56 = vmul.f32 1.442695, %v1093_v46  ;;  %v170_v1 = vsub.f32 1.0, %v169_v24  ;;  %v3046_v46 = vld [vmem:[%s4779_s6 + $0x8] sm:$0xff]  ;;  %v180_v24 = vor.u32 1.1754944e-38, %v179_v51 }
 0x1c6   :  { %583 = vmatpush.bf16.msra.mxu2 %v3046_v46 }
 0x1c7   :  { %3175 = vpow2.f32 %v1110_v56  ;;  %v171_v30 = vmul.f32 %v3174_v63, %v170_v1  ;;  %v177_v56 = vand.u32 2147483647, %v134_v18 }
 0x1c8   :  { %3143 = vset.pattern.permute.xlu2 %v3340_v57 }
 0x1c9   :  { %262 = vperm.xlu2 %3143, %v3709_v5   ;;  %v172_v50 = vadd.f32 %v3174_v63, %v171_v30  ;;  %vm178_vm4 = vcmp.eq.f32.partialorder %v177_v56, 8.507059e+37 }
 0x1ca   :  { %v3715_v60 = vpop.xlane.xlu2 %1051 }
 0x1cb   :  { %v176_v45 = vsel %vm175_vm2, %v3174_v63, %v172_v50  ;;  %v41_v50 = vld [vmem:[%s4775_s2 + $0x10] sm:$0xff]  ;;  %vm228_vm2 = vcmp.gt.s32.totalorder %v3566_v48, 0 }
 0x1cd   :  { %1078 = vmax.xlane.f32.xlu0 %v1077_v12  ;;  %v3726_v25 = vpop.eup %3175  ;;  %v39_v12 = vld [vmem:[%s4775_s2] sm:$0xff] }
 0x1ce   :  { %v1143_v42 = vsel %vm1043_vm3, %v3726_v25, 0.0  ;;  %v537_v17 = vpack.c.bf16 %v40_v61, %v39_v12 }
 0x1d1   :  { %3146 = vset.pattern.permute.xlu2 %v4784_v53 }
 0x1d2   :  { %v1055_v26 = vpop.xlane.xlu2 %1054 }
 0x1d3   :  { %v1095_v33 = vsub.f32 %v3609_v44, %v1055_v26  ;;  %v3045_v44 = vld [vmem:[%s4779_s6] sm:$0xff]  ;;  %v181_v26 = vsel %vm178_vm4, %v180_v24, %v176_v45 }
 0x1d4   :  { %584 = vmatpush.bf16.msra.mxu2 %v3045_v44  ;;  %v3750_v63 = vmul.f32 %v3553_v43, %v181_v26  ;;  %v42_v43 = vld [vmem:[%s4775_s2 + $0x18] sm:$0xff] }
 0x1d5   :  { %v1114_v41 = vmul.f32 1.442695, %v1095_v33  ;;  %1144 = vadd.xlane.f32.xlu1 %v1143_v42  ;;  %v538_v44 = vpack.c.bf16 %v42_v43, %v41_v50 }
 0x1d7   :  { %3177 = vpow2.f32 %v1114_v41  ;;  %2767 = vmatmul.msk.bf16.vlgmr.msra.gmra.mxu2 %vm4783_vm0, %v537_v17 }
 0x1dd   :  { %v3744_v1 = vpop.eup %3177 }
 0x1de   :  { %v1149_v18 = vsel %vm1043_vm3, %v3744_v1, 0.0 }
 0x1df   :  { %1150 = vadd.xlane.f32.xlu1 %v1149_v18 }
 0x1e1   :  { %212 = vperm.xlu0 %3134, %v3750_v63  }
 0x1e2   :  { %v1061_v30 = vpop.xlane.xlu0 %1060 }
 0x1e3   :  { %v1097_v33 = vsub.f32 %v3629_v62, %v1061_v30 }
 0x1e5   :  { %v1118_v42 = vmul.f32 1.442695, %v1097_v33  ;;  %v1092_v33 = vsub.f32 %v3579_v16, %v3699_v13  ;;  %v1094_v16 = vsub.f32 %v3599_v32, %v3715_v60 }
 0x1e7   :  { %3179 = vpow2.f32 %v1118_v42  ;;  %2768 = vmatmul.msk.bf16.gmra.mxu2 %vm4783_vm0, %v538_v44  ;;  %v1108_v43 = vmul.f32 1.442695, %v1092_v33 }
 0x1e9   :  { %3140 = vset.pattern.permute.xlu0 %v4784_v53 }
 0x1ea   :  { %v1064_v41 = vpop.xlane.xlu1 %1063  ;;  %344 = vperm.xlu0 %3140, %v3691_v2  }
 0x1eb   :  { %v1098_v46 = vsub.f32 %v3639_v9, %v1064_v41  ;;  %v3768_v9 = vpop.xlane.xlu2 %1057 }
 0x1ec   :  { %v1096_v33 = vsub.f32 %v3619_v54, %v3768_v9  ;;  %v3064_v9 = vld [vmem:[%s4777_s4 + $0x78] sm:$0xff] }
 0x1ed   :  { %v3763_v51 = vpop.eup %3179  ;;  %v1120_v62 = vmul.f32 1.442695, %v1098_v46  ;;  %814 = vmatpush.bf16.msrb.mxu2 %v3064_v9 }
 0x1ee   :  { %v1155_v56 = vsel %vm1043_vm3, %v3763_v51, 0.0 }
 0x1ef   :  { %3181 = vpow2.f32 %v1120_v62  ;;  %1156 = vadd.xlane.f32.xlu1 %v1155_v56  ;;  %v1112_v56 = vmul.f32 1.442695, %v1094_v16 }
 0x1f2   :  { %3141 = vset.pattern.permute.xlu0 %v4788_v38 }
 0x1f3   :  { %217 = vperm.xlu0 %3141, %v3709_v5   ;;  %v3776_v12 = vpop.xlane.xlu2 %1066 }
 0x1f5   :  { %v3771_v45 = vpop.eup %3181 }
 0x1f6   :  { %v1158_v24 = vsel %vm1043_vm3, %v3771_v45, 0.0 }
 0x1f7   :  { %1159 = vadd.xlane.f32.xlu2 %v1158_v24 }
 0x1fb   :  { %3142 = vset.pattern.permute.xlu0 %v3340_v57  ;;  %v1070_v61 = vpop.xlane.xlu2 %1069 }
 0x202   :  { %v1073_v17 = vpop.xlane.xlu0 %1072 }
 0x203   :  { %v1101_v26 = vsub.f32 %v3670_v55, %v1073_v17  ;;  %v4792_v17 = vmov 0.0  }
 0x205   :  { %v1126_v18 = vmul.f32 1.442695, %v1101_v26 }
 0x207   :  { %3183 = vpow2.f32 %v1126_v18 }
 0x208   :  { %303 = vperm.xlu1 %3144, %v3750_v63  }
 0x20a   :  { %v1076_v42 = vpop.xlane.xlu2 %1075 }
 0x20b   :  { %v296_v30 = vpop.permute.xlu1 %295  ;;  %v1102_v41 = vsub.f32 %v3679_v20, %v1076_v42 }
 0x20c   :  { %vm314_vm6 = vcmp.eq.f32.partialorder %v296_v30, %v3682_v31  ;;  %vm310_vm7 = vcmp.gt.f32.partialorder %v296_v30, %v3682_v31 }
 0x20d   :  { %v3784_v46 = vpop.eup %3183  ;;  %v1128_v50 = vmul.f32 1.442695, %v1102_v41  ;;  %vm319_vm8 = vmand %vm314_vm6, %vm318_vm5 }
 0x20e   :  { %v1167_v55 = vsel %vm1043_vm3, %v3784_v46, 0.0  ;;  %vm3797_vm10 = vmor %vm310_vm7, %vm319_vm8 }
 0x20f   :  { %3185 = vpow2.f32 %v1128_v50  ;;  %1168 = vadd.xlane.f32.xlu2 %v1167_v55  ;;  %v2721_v42 = vsel %vm3797_vm10, 1.0, %v4792_v17  ;;  %v1100_v55 = vsub.f32 %v3660_v34, %v1070_v61  ;;  %v3063_v34 = vld [vmem:[%s4777_s4 + $0x70] sm:$0xff] }
 0x210   :  { %3147 = vset.pattern.permute.xlu1 %v4784_v53  ;;  %3187 = vpow2.f32 %v1108_v43  ;;  %815 = vmatpush.bf16.msrb.mxu2 %v3063_v34 }
 0x211   :  { %3189 = vpow2.f32 %v1112_v56  ;;  %v3062_v56 = vld [vmem:[%s4777_s4 + $0x68] sm:$0xff] }
 0x212   :  { %v251_v20 = vpop.permute.xlu2 %250 }
 0x213   :  { %vm265_vm11 = vcmp.gt.f32.partialorder %v251_v20, %v3682_v31  ;;  %vm269_vm12 = vcmp.eq.f32.partialorder %v251_v20, %v3682_v31  ;;  %v1116_v20 = vmul.f32 1.442695, %v1096_v33 }
 0x214   :  { %v341_v13 = vpop.permute.xlu1 %340  ;;  %vm274_vm15 = vmand %vm269_vm12, %vm273_vm9  ;;  %816 = vmatpush.bf16.msrb.mxu2 %v3062_v56 }
 0x215   :  { %vm359_vm14 = vcmp.eq.f32.partialorder %v341_v13, %v3682_v31  ;;  %v3808_v32 = vpop.eup %3185  ;;  %vm278_vm4 = vmor %vm265_vm11, %vm274_vm15  ;;  %v203_v60 = vpop.permute.xlu0 %202  ;;  %vm355_vm1 = vcmp.gt.f32.partialorder %v341_v13, %v3682_v31  ;;  %3191 = vpow2.f32 %v1116_v20  ;;  %v1099_v20 = vsub.f32 %v3649_v22, %v3776_v12 }
 0x216   :  { %vm220_vm6 = vcmp.gt.f32.partialorder %v203_v60, %v3682_v31  ;;  %vm224_vm7 = vcmp.eq.f32.partialorder %v203_v60, %v3682_v31  ;;  %vm364_vm8 = vmand %vm359_vm14, %vm363_vm13  ;;  %v1170_v44 = vsel %vm1043_vm3, %v3808_v32, 0.0  ;;  %v3819_v24 = vpop.eup %3187  ;;  %v2717_v26 = vsel %vm278_vm4, 1.0, %v4792_v17 }
 0x217   :  { %vm229_vm12 = vmand %vm224_vm7, %vm228_vm2  ;;  %1171 = vadd.xlane.f32.xlu2 %v1170_v44  ;;  %v1140_v50 = vsel %vm1043_vm3, %v3819_v24, 0.0  ;;  %v3834_v13 = vpop.eup %3189  ;;  %v1124_v60 = vmul.f32 1.442695, %v1100_v55 }
 0x218   :  { %vm233_vm11 = vmor %vm220_vm6, %vm229_vm12  ;;  %v1146_v54 = vsel %vm1043_vm3, %v3834_v13, 0.0 }
 0x219   :  { %v2713_v18 = vsel %vm233_vm11, 1.0, %v4792_v17  ;;  %vm368_vm14 = vmor %vm355_vm1, %vm364_vm8  ;;  %3193 = vpow2.f32 %v1124_v60 }
 0x21a   :  { %v290_v30 = vadd.f32 %v2717_v26, %v2713_v18  ;;  %v2725_v43 = vsel %vm368_vm14, 1.0, %v4792_v17  ;;  %v3061_v18 = vld [vmem:[%s4777_s4 + $0x60] sm:$0xff]  ;;  %s3343_s4 = smov 64  }
 0x21b   :  { %v3844_v61 = vpop.eup %3191  ;;  %817 = vmatpush.bf16.msrb.mxu2 %v3061_v18 }
 0x21c   :  { %v335_v41 = vadd.f32 %v2721_v42, %v290_v30  ;;  %v1152_v44 = vsel %vm1043_vm3, %v3844_v61, 0.0 }
 0x21d   :  { %1141 = vadd.xlane.f32.xlu0 %v1140_v50 }
 0x21e   :  { %v3832_v16 = vadd.f32 %v2725_v43, %v335_v41  ;;  %2863 = vmatmul.msk.bf16.vlgmr.msrb.gmra.mxu2 %vm4783_vm0, %v3481_v37  ;;  %v255_v41 = vpop.permute.xlu2 %254  ;;  %v208_v43 = vpop.permute.xlu1 %207 }
 0x21f   :  { %v3846_v62 = vpop.eup %3193  ;;  %vm225_vm1 = vcmp.eq.f32.partialorder %v208_v43, %v3691_v2  ;;  %vm270_vm10 = vcmp.eq.f32.partialorder %v255_v41, %v3691_v2  ;;  %vm221_vm15 = vcmp.gt.f32.partialorder %v208_v43, %v3691_v2  ;;  %vm266_vm7 = vcmp.gt.f32.partialorder %v255_v41, %v3691_v2 }
 0x220   :  { %v1164_v26 = vsel %vm1043_vm3, %v3846_v62, 0.0  ;;  %vm230_vm4 = vmand %vm225_vm1, %vm228_vm2 }
 0x221   :  { %vm275_vm8 = vmand %vm270_vm10, %vm273_vm9 }
 0x222   :  { %vm234_vm12 = vmor %vm221_vm15, %vm230_vm4 }
 0x223   :  { %v2714_v55 = vsel %vm234_vm12, 1.0, %v4792_v17 }
 0x225   :  { %1147 = vadd.xlane.f32.xlu0 %v1146_v54 }
 0x22d   :  { %1153 = vadd.xlane.f32.xlu0 %v1152_v44  ;;  %v1122_v44 = vmul.f32 1.442695, %v1099_v20 }
 0x22e   :  { %2864 = vmatmul.msk.bf16.gmra.mxu2 %vm4783_vm0, %v3488_v39  ;;  %vm279_vm0 = vmor %vm266_vm7, %vm275_vm8 }
 0x22f   :  { %348 = vperm.xlu2 %3146, %v3750_v63   ;;  %v2718_v60 = vsel %vm279_vm0, 1.0, %v4792_v17 }
 0x230   :  { %v291_v54 = vadd.f32 %v2718_v60, %v2714_v55 }
 0x232   :  { %1165 = vadd.xlane.f32.xlu1 %v1164_v26 }
 0x237   :  { %3148 = vset.pattern.permute.xlu2 %v3340_v57 }
 0x240   :  { %v1079_v30 = vpop.xlane.xlu0 %1078 }
 0x241   :  { %v1103_v33 = vsub.f32 %v3713_v6, %v1079_v30  ;;  %258 = vperm.xlu0 %3142, %v3750_v63   ;;  %v300_v6 = vpop.permute.xlu2 %299 }
 0x242   :  { %vm315_vm6 = vcmp.eq.f32.partialorder %v300_v6, %v3691_v2  ;;  %vm311_vm11 = vcmp.gt.f32.partialorder %v300_v6, %v3691_v2 }
 0x243   :  { %v1130_v42 = vmul.f32 1.442695, %v1103_v33  ;;  %vm320_vm14 = vmand %vm315_vm6, %vm318_vm5 }
 0x244   :  { %vm324_vm1 = vmor %vm311_vm11, %vm320_vm14 }
 0x245   :  { %3195 = vpow2.f32 %v1130_v42  ;;  %v2722_v9 = vsel %vm324_vm1, 1.0, %v4792_v17 }
 0x246   :  { %v336_v26 = vadd.f32 %v2722_v9, %v291_v54  ;;  %3197 = vpow2.f32 %v1122_v44 }
 0x249   :  { %3145 = vset.pattern.permute.xlu0 %v4790_v23  ;;  %v263_v56 = vpop.permute.xlu2 %262 }
 0x24a   :  { %vm272_vm7 = vcmp.eq.f32.partialorder %v263_v56, %v3709_v5  ;;  %vm268_vm0 = vcmp.gt.f32.partialorder %v263_v56, %v3709_v5 }
 0x24b   :  { %v3867_v50 = vpop.eup %3195  ;;  %vm277_vm8 = vmand %vm272_vm7, %vm273_vm9 }
 0x24c   :  { %v1173_v37 = vsel %vm1043_vm3, %v3867_v50, 0.0  ;;  %vm281_vm11 = vmor %vm268_vm0, %vm277_vm8  ;;  %v3906_v41 = vpop.eup %3197 }
 0x24d   :  { %1174 = vadd.xlane.f32.xlu1 %v1173_v37  ;;  %v1161_v20 = vsel %vm1043_vm3, %v3906_v41, 0.0 }
 0x253   :  { %v3877_v39 = vpop.permute.xlu0 %212 }
 0x25a   :  { %v586_v12 = vpop.f32.mrf.mxu2 }
 0x25b   :  { %v600_v44 = vpack.c.bf16 %v586_v12, %v586_v12 }
 0x25c   :  { %v345_v34 = vpop.permute.xlu0 %344 }
 0x25d   :  { %vm356_vm10 = vcmp.gt.f32.partialorder %v345_v34, %v3691_v2  ;;  %vm360_vm15 = vcmp.eq.f32.partialorder %v345_v34, %v3691_v2 }
 0x25e   :  { %vm365_vm4 = vmand %vm360_vm15, %vm363_vm13  ;;  %vm4807_vm15 = vcmask 31744  }
 0x25f   :  { %vm369_vm6 = vmor %vm356_vm10, %vm365_vm4 }
 0x260   :  { %v2726_v22 = vsel %vm369_vm6, 1.0, %v4792_v17 }
 0x261   :  { %v381_v18 = vadd.f32 %v2726_v22, %v336_v26 }
 0x262   :  { %v588_v37 = vpop.f32.mrf.mxu2 }
 0x263   :  { %vm385_vm12 = vcmp.lt.f32.partialorder %v381_v18, 2.0  ;;  %v601_v56 = vpack.c.bf16 %v588_v37, %v588_v37 }
 0x264   :  { %v2730_v30 = vsel %vm385_vm12, 1.0, %v4792_v17 }
 0x265   :  { %v218_v33 = vpop.permute.xlu0 %217  ;;  %v3901_v42 = vmul.f32 %v2730_v30, %v3691_v2  ;;  %v2720_v2 = vsel %vm281_vm11, 1.0, %v4792_v17  ;;  %v1440_v30 = vunpack.c.l.b16 %v600_v44  ;;  %vm384_vm11 = vcmp.lt.f32.partialorder %v3832_v16, 2.0 }
 0x266   :  { %vm223_vm14 = vcmp.gt.f32.partialorder %v218_v33, %v3709_v5  ;;  %vm227_vm1 = vcmp.eq.f32.partialorder %v218_v33, %v3709_v5  ;;  %352 = vperm.xlu1 %3147, %v3709_v5   ;;  %v1441_v33 = vunpack.c.l.b16 %v601_v56 }
 0x267   :  { %vm232_vm10 = vmand %vm227_vm1, %vm228_vm2  ;;  %v403_v43 = vsel %vm4807_vm15, %v3901_v42, 0.0 }
 0x268   :  { %vm236_vm4 = vmor %vm223_vm14, %vm232_vm10  ;;  %404 = vadd.xlane.f32.xlu2 %v403_v43  ;;  %v1145_v43 = vpop.xlane.xlu1 %1144 }
 0x269   :  { %v2716_v6 = vsel %vm236_vm4, 1.0, %v4792_v17  ;;  %3199 = vrcp.f32 %v1145_v43  ;;  %vm1208_vm7 = vweird.f32 %v1145_v43  ;;  %vm4810_vm4 = vcmask 31744  }
 0x26a   :  { %v3914_v55 = vadd.f32 %v2720_v2, %v2716_v6  ;;  %v591_v60 = vpop.f32.mrf.mxu2  ;;  %v3923_v2 = vpack.c.b16 %v1441_v33, %v1440_v30 }
 0x26b   :  { %1162 = vadd.xlane.f32.xlu0 %v1161_v20  ;;  %v602_v54 = vpack.c.bf16 %v591_v60, %v591_v60 }
 0x26c   :  { %4808 = vst [vmem:[#allocation10_spill] sm:$0xff] %v3923_v2 }
 0x26d   :  { %v1442_v26 = vunpack.c.l.b16 %v602_v54  ;;  %v3929_v54 = vpop.xlane.xlu2 %1159 }
 0x26e   :  { %3149 = vset.pattern.permute.xlu1 %v3340_v57 }
 0x26f   :  { %v3200_v12 = vpop.eup %3199 }
 0x270   :  { %v1204_v37 = vmul.f32 %v3200_v12, %v1145_v43  ;;  %v3927_v60 = vpop.xlane.xlu1 %1150  ;;  %vm1209_vm6 = vweird.f32 %v3200_v12 }
 0x271   :  { %vm1210_vm0 = vmor %vm1208_vm7, %vm1209_vm6 }
 0x272   :  { %v593_v9 = vpop.f32.mrf.mxu2  ;;  %v1205_v20 = vsub.f32 1.0, %v1204_v37  ;;  %v1212_v37 = vand.u32 2147483647, %v1145_v43 }
 0x273   :  { %v603_v34 = vpack.c.bf16 %v593_v9, %v593_v9 }
 0x274   :  { %v1206_v9 = vmul.f32 %v3200_v12, %v1205_v20  ;;  %vm1213_vm14 = vcmp.eq.f32.partialorder %v1212_v37, 8.507059e+37 }
 0x275   :  { %v1443_v22 = vunpack.c.l.b16 %v603_v34 }
 0x277   :  { %v3919_v18 = vpack.c.b16 %v1443_v22, %v1442_v26  ;;  %v1207_v26 = vadd.f32 %v3200_v12, %v1206_v9  ;;  %v1214_v22 = vand.u32 2147483648, %v1145_v43 }
 0x279   :  { %1478 = vmatpush.bf16.msra.mxu0 %v3919_v18  ;;  %v1211_v38 = vsel %vm1210_vm0, %v3200_v12, %v1207_v26  ;;  %v1215_v23 = vor.u32 1.1754944e-38, %v1214_v22  ;;  %v3945_v26 = vpop.xlane.xlu1 %1156  ;;  %v4809_v22 = vmov 0.0  }
 0x27b   :  { %v1216_v58 = vsel %vm1213_vm14, %v1215_v23, %v1211_v38 }
 0x27d   :  { %1479 = vmatpush.bf16.msra.mxu0 %v3923_v2 }
 0x27f   :  { %307 = vperm.xlu0 %3145, %v3709_v5  }
 0x282   :  { %v3937_v30 = vpop.xlane.xlu2 %1168 }
 0x287   :  { %3150 = vset.pattern.permute.xlu0 %v3340_v57 }
 0x28a   :  { %v3952_v23 = vpop.xlane.xlu2 %1171 }
 0x290   :  { %v1142_v6 = vpop.xlane.xlu0 %1141 }
 0x291   :  { %3201 = vrcp.f32 %v1142_v6  ;;  %v1199_v53 = vand.u32 2147483648, %v1142_v6  ;;  %v1197_v20 = vand.u32 2147483647, %v1142_v6  ;;  %vm1193_vm12 = vweird.f32 %v1142_v6 }
 0x292   :  { %3203 = vrcp.f32 %v3927_v60 }
 0x293   :  { %vm1198_vm10 = vcmp.eq.f32.partialorder %v1197_v20, 8.507059e+37 }
 0x297   :  { %v3202_v34 = vpop.eup %3201 }
 0x298   :  { %v1189_v44 = vmul.f32 %v3202_v34, %v1142_v6  ;;  %v3932_v56 = vpop.xlane.xlu0 %1147  ;;  %v3935_v57 = vpop.eup %3203  ;;  %vm1194_vm8 = vweird.f32 %v3202_v34 }
 0x299   :  { %3205 = vrcp.f32 %v3932_v56  ;;  %v1234_v9 = vmul.f32 %v3935_v57, %v3927_v60  ;;  %vm1195_vm1 = vmor %vm1193_vm12, %vm1194_vm8  ;;  %vm1239_vm6 = vweird.f32 %v3935_v57  ;;  %vm1223_vm7 = vweird.f32 %v3932_v56 }
 0x29a   :  { %v1190_v33 = vsub.f32 1.0, %v1189_v44  ;;  %v1200_v44 = vor.u32 1.1754944e-38, %v1199_v53  ;;  %v1217_v53 = vmul.f32 %v3726_v25, %v1216_v58  ;;  %vm1238_vm8 = vweird.f32 %v3927_v60 }
 0x29b   :  { %v1235_v12 = vsub.f32 1.0, %v1234_v9  ;;  %vm3975_vm12 = vmor %vm1238_vm8, %vm1239_vm6 }
 0x29c   :  { %v1191_v10 = vmul.f32 %v3202_v34, %v1190_v33 }
 0x29e   :  { %v1192_v17 = vadd.f32 %v3202_v34, %v1191_v10  ;;  %v2729_v10 = vsel %vm384_vm11, 1.0, %v4809_v22  ;;  %vm226_vm11 = vcmp.eq.f32.partialorder %v3877_v39, %v3750_v63 }
 0x29f   :  { %v3206_v2 = vpop.eup %3205 }
 0x2a0   :  { %v1196_v43 = vsel %vm1195_vm1, %v3202_v34, %v1192_v17  ;;  %v1219_v33 = vmul.f32 %v3206_v2, %v3932_v56  ;;  %v3943_v8 = vpop.xlane.xlu0 %1153  ;;  %v3955_v17 = vmul.f32 %v2729_v10, %v3682_v31  ;;  %v1236_v34 = vmul.f32 %v3935_v57, %v1235_v12 }
 0x2a1   :  { %v1201_v29 = vsel %vm1198_vm10, %v1200_v44, %v1196_v43  ;;  %3207 = vrcp.f32 %v3943_v8  ;;  %vm1224_vm15 = vweird.f32 %v3206_v2  ;;  %v1227_v31 = vand.u32 2147483647, %v3932_v56  ;;  %v304_v43 = vpop.permute.xlu1 %303 }
 0x2a2   :  { %v1202_v6 = vmul.f32 %v3819_v24, %v1201_v29  ;;  %v1220_v16 = vsub.f32 1.0, %v1219_v33  ;;  %3209 = vrcp.f32 %v3945_v26  ;;  %v1229_v24 = vand.u32 2147483648, %v3932_v56  ;;  %vm1225_vm0 = vmor %vm1223_vm7, %vm1224_vm15 }
 0x2a3   :  { %v400_v58 = vsel %vm4810_vm4, %v3955_v17, 0.0  ;;  %v1237_v25 = vadd.f32 %v3935_v57, %v1236_v34  ;;  %v1244_v44 = vand.u32 2147483648, %v3927_v60  ;;  %v1242_v33 = vand.u32 2147483647, %v3927_v60  ;;  %vm231_vm4 = vmand %vm226_vm11, %vm228_vm2 }
 0x2a4   :  { %v1221_v38 = vmul.f32 %v3206_v2, %v1220_v16  ;;  %v1428_v37 = vpack.c.bf16 %v1217_v53, %v1202_v6  ;;  %v1230_v56 = vor.u32 1.1754944e-38, %v1229_v24  ;;  %vm316_vm14 = vcmp.eq.f32.partialorder %v304_v43, %v3750_v63 }
 0x2a5   :  { %vm1228_vm1 = vcmp.eq.f32.partialorder %v1227_v31, 8.507059e+37  ;;  %v1241_v60 = vsel %vm3975_vm12, %v3935_v57, %v1237_v25  ;;  %v1245_v53 = vor.u32 1.1754944e-38, %v1244_v44  ;;  %vm1243_vm10 = vcmp.eq.f32.partialorder %v1242_v33, 8.507059e+37  ;;  %vm321_vm7 = vmand %vm316_vm14, %vm318_vm5 }
 0x2a6   :  { %v1222_v20 = vadd.f32 %v3206_v2, %v1221_v38  ;;  %2873 = vmatmul.msk.bf16.vlgmr.msra.gmra.mxu0 %vm1043_vm3, %v1428_v37  ;;  %vm222_vm15 = vcmp.gt.f32.partialorder %v3877_v39, %v3750_v63  ;;  %vm312_vm6 = vcmp.gt.f32.partialorder %v304_v43, %v3750_v63  ;;  %v1259_v33 = vand.u32 2147483648, %v3943_v8 }
 0x2a7   :  { %v3959_v29 = vpop.eup %3207  ;;  %v1246_v37 = vsel %vm1243_vm10, %v1245_v53, %v1241_v60  ;;  %vm235_vm8 = vmor %vm222_vm15, %vm231_vm4  ;;  %v1274_v60 = vand.u32 2147483648, %v3945_v26  ;;  %3211 = vrcp.f32 %v3929_v54 }
 0x2a8   :  { %v3968_v9 = vpop.eup %3209  ;;  %v1249_v12 = vmul.f32 %v3959_v29, %v3943_v8  ;;  %v1226_v10 = vsel %vm1225_vm0, %v3206_v2, %v1222_v20  ;;  %v349_v2 = vpop.permute.xlu2 %348  ;;  %vm3996_vm12 = vmor %vm312_vm6, %vm321_vm7  ;;  %v1247_v25 = vmul.f32 %v3744_v1, %v1246_v37  ;;  %v2715_v44 = vsel %vm235_vm8, 1.0, %v4809_v22 }
 0x2a9   :  { %401 = vadd.xlane.f32.xlu0 %v400_v58  ;;  %v1264_v16 = vmul.f32 %v3968_v9, %v3945_v26  ;;  %v1231_v38 = vsel %vm1228_vm1, %v1230_v56, %v1226_v10  ;;  %vm361_vm0 = vcmp.eq.f32.partialorder %v349_v2, %v3750_v63  ;;  %vm357_vm1 = vcmp.gt.f32.partialorder %v349_v2, %v3750_v63  ;;  %v819_v10 = vpop.f32.mrf.mxu2 }
 0x2aa   :  { %v1250_v34 = vsub.f32 1.0, %v1249_v12  ;;  %v1232_v57 = vmul.f32 %v3834_v13, %v1231_v38  ;;  %vm366_vm2 = vmand %vm361_vm0, %vm363_vm13  ;;  %vm1254_vm4 = vweird.f32 %v3959_v29  ;;  %vm1269_vm6 = vweird.f32 %v3968_v9 }
 0x2ab   :  { %v1265_v20 = vsub.f32 1.0, %v1264_v16  ;;  %vm370_vm7 = vmor %vm357_vm1, %vm366_vm2  ;;  %v2723_v56 = vsel %vm3996_vm12, 1.0, %v4809_v22  ;;  %v1257_v16 = vand.u32 2147483647, %v3943_v8  ;;  %vm1268_vm8 = vweird.f32 %v3945_v26 }
 0x2ac   :  { %v1251_v39 = vmul.f32 %v3959_v29, %v1250_v34  ;;  %v1429_v13 = vpack.c.bf16 %v1247_v25, %v1232_v57  ;;  %v1272_v2 = vand.u32 2147483647, %v3945_v26  ;;  %v2727_v38 = vsel %vm370_vm7, 1.0, %v4809_v22  ;;  %vm1270_vm2 = vmor %vm1268_vm8, %vm1269_vm6 }
 0x2ad   :  { %v1266_v31 = vmul.f32 %v3968_v9, %v1265_v20  ;;  %v1260_v37 = vor.u32 1.1754944e-38, %v1259_v33  ;;  %vm1258_vm12 = vcmp.eq.f32.partialorder %v1257_v16, 8.507059e+37  ;;  %v1275_v57 = vor.u32 1.1754944e-38, %v1274_v60  ;;  %v3212_v60 = vpop.eup %3211 }
 0x2ae   :  { %v1252_v1 = vadd.f32 %v3959_v29, %v1251_v39  ;;  %v829_v39 = vpack.c.bf16 %v819_v10, %v819_v10  ;;  %vm4815_vm1 = vcmask 31744   ;;  %vm1283_vm6 = vweird.f32 %v3929_v54 }
 0x2af   :  { %v1267_v6 = vadd.f32 %v3968_v9, %v1266_v31 }
 0x2b1   :  { %v821_v31 = vpop.f32.mrf.mxu2 }
 0x2b3   :  { %v259_v58 = vpop.permute.xlu0 %258 }
 0x2b4   :  { %vm267_vm11 = vcmp.gt.f32.partialorder %v259_v58, %v3750_v63  ;;  %vm271_vm14 = vcmp.eq.f32.partialorder %v259_v58, %v3750_v63 }
 0x2b5   :  { %vm276_vm10 = vmand %vm271_vm14, %vm273_vm9  ;;  %vm1253_vm9 = vweird.f32 %v3943_v8  ;;  %v1271_v8 = vsel %vm1270_vm2, %v3968_v9, %v1267_v6  ;;  %vm1273_vm14 = vcmp.eq.f32.partialorder %v1272_v2, 8.507059e+37  ;;  %v4050_v2 = vpop.xlane.xlu1 %1165 }
 0x2b6   :  { %vm280_vm15 = vmor %vm267_vm11, %vm276_vm10  ;;  %2874 = vmatmul.msk.bf16.gmra.mxu0 %vm1043_vm3, %v1429_v13  ;;  %v1276_v25 = vsel %vm1273_vm14, %v1275_v57, %v1271_v8  ;;  %vm4816_vm10 = vcmask 523264   ;;  %3213 = vrcp.f32 %v4050_v2 }
 0x2b7   :  { %v2719_v43 = vsel %vm280_vm15, 1.0, %v4809_v22  ;;  %vm1255_vm0 = vmor %vm1253_vm9, %vm1254_vm4  ;;  %v1277_v9 = vmul.f32 %v3763_v51, %v1276_v25  ;;  %v1279_v51 = vmul.f32 %v3212_v60, %v3929_v54  ;;  %vm1284_vm4 = vweird.f32 %v3212_v60 }
 0x2b8   :  { %v292_v12 = vadd.f32 %v2719_v43, %v2715_v44  ;;  %v1256_v34 = vsel %vm1255_vm0, %v3959_v29, %v1252_v1  ;;  %v867_v44 = vunpack.c.l.b16 %v829_v39  ;;  %v830_v1 = vpack.c.bf16 %v821_v31, %v821_v31  ;;  %vm4817_vm15 = vmmov %vm4816_vm10 }
 0x2b9   :  { %v1261_v24 = vsel %vm1258_vm12, %v1260_v37, %v1256_v34  ;;  %v1280_v34 = vsub.f32 1.0, %v1279_v51  ;;  %v1287_v25 = vand.u32 2147483647, %v3929_v54  ;;  %vm4062_vm7 = vmor %vm1283_vm6, %vm1284_vm4 }
 0x2ba   :  { %v337_v53 = vadd.f32 %v2723_v56, %v292_v12  ;;  %v1262_v29 = vmul.f32 %v3844_v61, %v1261_v24  ;;  %v868_v43 = vunpack.c.l.b16 %v830_v1 }
 0x2bb   :  { %v1281_v8 = vmul.f32 %v3212_v60, %v1280_v34  ;;  %vm4069_vm9 = vcmp.eq.f32.partialorder %v1287_v25, 8.507059e+37 }
 0x2bc   :  { %v382_v20 = vadd.f32 %v2727_v38, %v337_v53  ;;  %v1430_v33 = vpack.c.bf16 %v1277_v9, %v1262_v29  ;;  %v4039_v12 = vpack.c.b16 %v868_v43, %v867_v44  ;;  %v4056_v24 = vpop.eup %3213  ;;  %v1289_v9 = vand.u32 2147483648, %v3929_v54 }
 0x2bd   :  { %v1309_v43 = vmul.f32 %v4056_v24, %v4050_v2 }
 0x2be   :  { %vm386_vm11 = vcmp.lt.f32.partialorder %v382_v20, 2.0  ;;  %2871 = vmatmul.msk.bf16.gmra.mxu3 %vm4816_vm10, %v4039_v12  ;;  %v1290_v25 = vor.u32 1.1754944e-38, %v1289_v9 }
 0x2bf   :  { %v2731_v58 = vsel %vm386_vm11, 1.0, %v4809_v22 }
 0x2c0   :  { %v4033_v26 = vmul.f32 %v2731_v58, %v3750_v63  ;;  %v824_v63 = vpop.f32.mrf.mxu2  ;;  %v4054_v57 = vpop.xlane.xlu1 %1174  ;;  %v1282_v58 = vadd.f32 %v3212_v60, %v1281_v8 }
 0x2c1   :  { %v831_v61 = vpack.c.bf16 %v824_v63, %v824_v63 }
 0x2c2   :  { %v406_v13 = vsel %vm4815_vm1, %v4033_v26, 0.0 }
 0x2c3   :  { %407 = vadd.xlane.f32.xlu1 %v406_v13  ;;  %v869_v6 = vunpack.c.l.b16 %v831_v61 }
 0x2c6   :  { %2875 = vmatmul.msk.bf16.gmra.mxu0 %vm1043_vm3, %v1430_v33 }
 0x2c8   :  { %v826_v10 = vpop.f32.mrf.mxu2 }
 0x2c9   :  { %v832_v56 = vpack.c.bf16 %v826_v10, %v826_v10 }
 0x2cb   :  { %v870_v16 = vunpack.c.l.b16 %v832_v56 }
 0x2cd   :  { %v4045_v53 = vpack.c.b16 %v870_v16, %v869_v6  ;;  %v1286_v6 = vsel %vm4062_vm7, %v3212_v60, %v1282_v58 }
 0x2cf   :  { %2872 = vmatmul.msk.bf16.gmra.mxu3 %vm4817_vm15, %v4045_v53 }
 0x2d8   :  { %v353_v56 = vpop.permute.xlu1 %352 }
 0x2d9   :  { %vm362_vm12 = vcmp.eq.f32.partialorder %v353_v56, %v3709_v5  ;;  %vm358_vm4 = vcmp.gt.f32.partialorder %v353_v56, %v3709_v5 }
 0x2da   :  { %vm367_vm6 = vmand %vm362_vm12, %vm363_vm13 }
 0x2db   :  { %v405_v38 = vpop.xlane.xlu2 %404  ;;  %vm4095_vm7 = vmor %vm358_vm4, %vm367_vm6  ;;  %vm4827_vm6 = vcmask 31744  }
 0x2dc   :  { %v413_v37 = vadd.f32 1e-06, %v405_v38 }
 0x2de   :  { %3215 = vrcp.f32 %v413_v37  ;;  %v1163_v20 = vpop.xlane.xlu0 %1162  ;;  %v442_v61 = vand.u32 2147483648, %v413_v37  ;;  %v440_v38 = vand.u32 2147483647, %v413_v37  ;;  %vm436_vm2 = vweird.f32 %v413_v37 }
 0x2df   :  { %3217 = vrcp.f32 %v1163_v20  ;;  %v1304_v51 = vand.u32 2147483648, %v1163_v20  ;;  %v1302_v8 = vand.u32 2147483647, %v1163_v20  ;;  %vm1298_vm11 = vweird.f32 %v1163_v20 }
 0x2e0   :  { %3219 = vrcp.f32 %v3937_v30  ;;  %v443_v60 = vor.u32 1.1754944e-38, %v442_v61  ;;  %vm441_vm10 = vcmp.eq.f32.partialorder %v440_v38, 8.507059e+37 }
 0x2e1   :  { %v1305_v58 = vor.u32 1.1754944e-38, %v1304_v51  ;;  %vm1303_vm15 = vcmp.eq.f32.partialorder %v1302_v8, 8.507059e+37  ;;  %3221 = vrcp.f32 %v4054_v57  ;;  %v2728_v8 = vsel %vm4095_vm7, 1.0, %v4809_v22 }
 0x2e2   :  { %3223 = vrcp.f32 %v3952_v23 }
 0x2e4   :  { %v3216_v39 = vpop.eup %3215 }
 0x2e5   :  { %v3218_v29 = vpop.eup %3217  ;;  %v432_v31 = vmul.f32 %v3216_v39, %v413_v37  ;;  %vm437_vm0 = vweird.f32 %v3216_v39 }
 0x2e6   :  { %v1294_v13 = vmul.f32 %v3218_v29, %v1163_v20  ;;  %v4060_v44 = vpop.eup %3219  ;;  %vm1299_vm8 = vweird.f32 %v3218_v29  ;;  %vm438_vm14 = vmor %vm436_vm2, %vm437_vm0 }
 0x2e7   :  { %v433_v33 = vsub.f32 1.0, %v432_v31  ;;  %v1324_v54 = vmul.f32 %v4060_v44, %v3937_v30  ;;  %v1310_v31 = vsub.f32 1.0, %v1309_v43  ;;  %vm1300_vm1 = vmor %vm1298_vm11, %vm1299_vm8  ;;  %vm1314_vm8 = vweird.f32 %v4056_v24 }
 0x2e8   :  { %v1295_v10 = vsub.f32 1.0, %v1294_v13  ;;  %vm1329_vm12 = vweird.f32 %v4060_v44  ;;  %vm1313_vm11 = vweird.f32 %v4050_v2 }
 0x2e9   :  { %v434_v16 = vmul.f32 %v3216_v39, %v433_v33  ;;  %v1291_v33 = vsel %vm4069_vm9, %v1290_v25, %v1286_v6  ;;  %v1311_v20 = vmul.f32 %v4056_v24, %v1310_v31  ;;  %v1332_v25 = vand.u32 2147483647, %v3937_v30 }
 0x2ea   :  { %v1296_v34 = vmul.f32 %v3218_v29, %v1295_v10  ;;  %v1325_v10 = vsub.f32 1.0, %v1324_v54  ;;  %v1334_v54 = vand.u32 2147483648, %v3937_v30 }
 0x2eb   :  { %v435_v47 = vadd.f32 %v3216_v39, %v434_v16  ;;  %v1317_v16 = vand.u32 2147483647, %v4050_v2  ;;  %vm1333_vm4 = vcmp.eq.f32.partialorder %v1332_v25, 8.507059e+37 }
 0x2ec   :  { %v1297_v13 = vadd.f32 %v3218_v29, %v1296_v34  ;;  %v1326_v63 = vmul.f32 %v4060_v44, %v1325_v10 }
 0x2ed   :  { %v439_v1 = vsel %vm438_vm14, %v3216_v39, %v435_v47  ;;  %v1292_v39 = vmul.f32 %v3771_v45, %v1291_v33  ;;  %v1312_v45 = vadd.f32 %v4056_v24, %v1311_v20  ;;  %vm4115_vm14 = vmor %vm1313_vm11, %vm1314_vm8  ;;  %vm1343_vm8 = vweird.f32 %v3952_v23 }
 0x2ee   :  { %v444_v15 = vsel %vm441_vm10, %v443_v60, %v439_v1  ;;  %v1301_v9 = vsel %vm1300_vm1, %v3218_v29, %v1297_v13  ;;  %v1327_v56 = vadd.f32 %v4060_v44, %v1326_v63  ;;  %v4826_v60 = vmov 2  }
 0x2ef   :  { %v4087_v37 = vmul.f32 %v444_v15, %v3901_v42  ;;  %v1306_v47 = vsel %vm1303_vm15, %v1305_v58, %v1301_v9  ;;  %v3222_v42 = vpop.eup %3221  ;;  %vm1318_vm10 = vcmp.eq.f32.partialorder %v1317_v16, 8.507059e+37 }
 0x2f0   :  { %v1307_v43 = vmul.f32 %v3906_v41, %v1306_v47  ;;  %v1319_v41 = vand.u32 2147483648, %v4050_v2  ;;  %v3224_v38 = vpop.eup %3223  ;;  %v1354_v31 = vmul.f32 %v3222_v42, %v4054_v57  ;;  %vm1359_vm7 = vweird.f32 %v3222_v42 }
 0x2f1   :  { %v308_v29 = vpop.permute.xlu0 %307  ;;  %1560 = vperm.xlu1 %3149, %v4087_v37   ;;  %v1339_v58 = vmul.f32 %v3224_v38, %v3952_v23 }
 0x2f2   :  { %vm313_vm13 = vcmp.gt.f32.partialorder %v308_v29, %v3709_v5  ;;  %vm317_vm9 = vcmp.eq.f32.partialorder %v308_v29, %v3709_v5  ;;  %v1431_v15 = vpack.c.bf16 %v1307_v43, %v1292_v39  ;;  %v1320_v13 = vor.u32 1.1754944e-38, %v1319_v41 }
 0x2f3   :  { %vm322_vm0 = vmand %vm317_vm9, %vm318_vm5  ;;  %vm1328_vm5 = vweird.f32 %v3937_v30  ;;  %v1335_v30 = vor.u32 1.1754944e-38, %v1334_v54  ;;  %v1355_v9 = vsub.f32 1.0, %v1354_v31  ;;  %v1340_v20 = vsub.f32 1.0, %v1339_v58 }
 0x2f4   :  { %vm326_vm2 = vmor %vm313_vm13, %vm322_vm0  ;;  %2876 = vmatmul.msk.bf16.gmra.mxu0 %vm1043_vm3, %v1431_v15  ;;  %vm1344_vm13 = vweird.f32 %v3224_v38  ;;  %vm1358_vm9 = vweird.f32 %v4054_v57 }
 0x2f5   :  { %v2724_v6 = vsel %vm326_vm2, 1.0, %v4809_v22  ;;  %vm1330_vm1 = vmor %vm1328_vm5, %vm1329_vm12  ;;  %v1356_v29 = vmul.f32 %v3222_v42, %v1355_v9  ;;  %v1341_v63 = vmul.f32 %v3224_v38, %v1340_v20 }
 0x2f6   :  { %v338_v51 = vadd.f32 %v2724_v6, %v3914_v55  ;;  %v1316_v55 = vsel %vm4115_vm14, %v4056_v24, %v1312_v45  ;;  %v1331_v1 = vsel %vm1330_vm1, %v4060_v44, %v1327_v56  ;;  %v1362_v45 = vand.u32 2147483647, %v4054_v57  ;;  %vm1360_vm0 = vmor %vm1358_vm9, %vm1359_vm7 }
 0x2f7   :  { %v1321_v10 = vsel %vm1318_vm10, %v1320_v13, %v1316_v55  ;;  %v1336_v47 = vsel %vm1333_vm4, %v1335_v30, %v1331_v1  ;;  %v1342_v15 = vadd.f32 %v3224_v38, %v1341_v63  ;;  %vm1345_vm2 = vmor %vm1343_vm8, %vm1344_vm13 }
 0x2f8   :  { %v383_v2 = vadd.f32 %v2728_v8, %v338_v51  ;;  %v1322_v43 = vmul.f32 %v3846_v62, %v1321_v10  ;;  %v1337_v44 = vmul.f32 %v3784_v46, %v1336_v47  ;;  %v1349_v62 = vand.u32 2147483648, %v3952_v23 }
 0x2f9   :  { %3151 = vset.pattern.permute.xlu1 %v4826_v60  ;;  %v1347_v46 = vand.u32 2147483647, %v3952_v23  ;;  %vm1363_vm12 = vcmp.eq.f32.partialorder %v1362_v45, 8.507059e+37  ;;  %v1346_v56 = vsel %vm1345_vm2, %v3224_v38, %v1342_v15 }
 0x2fa   :  { %vm387_vm15 = vcmp.lt.f32.partialorder %v383_v2, 2.0  ;;  %v1432_v61 = vpack.c.bf16 %v1337_v44, %v1322_v43  ;;  %v1350_v16 = vor.u32 1.1754944e-38, %v1349_v62  ;;  %v3071_v62 = vld [vmem:[%s4780_s7 + $0x50] sm:$0xff] }
 0x2fb   :  { %v2732_v33 = vsel %vm387_vm15, 1.0, %v4809_v22  ;;  %v1357_v22 = vadd.f32 %v3222_v42, %v1356_v29  ;;  %vm1348_vm11 = vcmp.eq.f32.partialorder %v1347_v46, 8.507059e+37  ;;  %v887_v46 = vadd.s32 104, %v3568_v4 }
 0x2fc   :  { %v4134_v24 = vmul.f32 %v2732_v33, %v3709_v5  ;;  %v1364_v5 = vand.u32 2147483648, %v4054_v57  ;;  %v1351_v54 = vsel %vm1348_vm11, %v1350_v16, %v1346_v56  ;;  %v3070_v16 = vld [vmem:[%s4780_s7 + $0x48] sm:$0xff] }
 0x2fd   :  { %v1361_v41 = vsel %vm1360_vm0, %v3222_v42, %v1357_v22  ;;  %v1352_v57 = vmul.f32 %v3808_v32, %v1351_v54  ;;  %v903_v56 = vsub.s32 %v887_v46, %v3566_v48 }
 0x2fe   :  { %v409_v39 = vsel %vm4827_vm6, %v4134_v24, 0.0  ;;  %v1365_v6 = vor.u32 1.1754944e-38, %v1364_v5  ;;  %v4828_v5 = vmov 0  }
 0x2ff   :  { %410 = vadd.xlane.f32.xlu0 %v409_v39  ;;  %v919_v54 = vand.u32 1, %v903_v56 }
 0x300   :  { %v1366_v51 = vsel %vm1363_vm12, %v1365_v6, %v1361_v41 }
 0x301   :  { %v1367_v34 = vmul.f32 %v3867_v50, %v1366_v51  ;;  %vm935_vm9 = vcmp.eq.s32.totalorder %v919_v54, 0 }
 0x303   :  { %v1433_v8 = vpack.c.bf16 %v1367_v34, %v1352_v57  ;;  %v889_v34 = vadd.s32 120, %v3568_v4  ;;  %v3069_v57 = vld [vmem:[%s4780_s7 + $0x40] sm:$0xff] }
 0x304   :  { %2877 = vmatmul.msk.bf16.gmra.mxu0 %vm1043_vm3, %v1432_v61 }
 0x314   :  { %2878 = vmatmul.msk.bf16.gmra.mxu0 %vm1043_vm3, %v1433_v8 }
 0x31c   :  { %v402_v25 = vpop.xlane.xlu0 %401 }
 0x31d   :  { %v412_v31 = vadd.f32 1e-06, %v402_v25  ;;  %v905_v25 = vsub.s32 %v889_v34, %v3566_v48  ;;  %v4831_v34 = vmov 3  }
 0x31f   :  { %3225 = vrcp.f32 %v412_v31  ;;  %v427_v55 = vand.u32 2147483648, %v412_v31  ;;  %v425_v38 = vand.u32 2147483647, %v412_v31  ;;  %vm421_vm14 = vweird.f32 %v412_v31 }
 0x321   :  { %v428_v1 = vor.u32 1.1754944e-38, %v427_v55  ;;  %vm426_vm10 = vcmp.eq.f32.partialorder %v425_v38, 8.507059e+37  ;;  %v921_v38 = vand.u32 1, %v905_v25 }
 0x323   :  { %v4166_v15 = vpop.f32.mrf.mxu0  ;;  %vm937_vm0 = vcmp.eq.s32.totalorder %v921_v38, 0 }
 0x325   :  { %v3226_v23 = vpop.eup %3225 }
 0x326   :  { %v417_v42 = vmul.f32 %v3226_v23, %v412_v31  ;;  %vm422_vm5 = vweird.f32 %v3226_v23 }
 0x327   :  { %vm423_vm1 = vmor %vm421_vm14, %vm422_vm5  ;;  %vm4830_vm5 = vcmask 523264  }
 0x328   :  { %v418_v2 = vsub.f32 1.0, %v417_v42 }
 0x32a   :  { %v419_v13 = vmul.f32 %v3226_v23, %v418_v2  ;;  %v4829_v2 = vmov -1e+30  }
 0x32c   :  { %v420_v58 = vadd.f32 %v3226_v23, %v419_v13  ;;  %v4196_v13 = vsel %vm935_vm9, 0.0, %v4829_v2 }
 0x32e   :  { %v424_v50 = vsel %vm423_vm1, %v3226_v23, %v420_v58  ;;  %vm4832_vm1 = vmmov %vm4830_vm5 }
 0x32f   :  { %v429_v32 = vsel %vm426_vm10, %v428_v1, %v424_v50  ;;  %vm4833_vm10 = vmmov %vm4832_vm1 }
 0x330   :  { %v4151_v30 = vmul.f32 %v429_v32, %v3955_v17  ;;  %vm4839_vm9 = vmmov %vm4832_vm1 }
 0x332   :  { %1556 = vperm.xlu2 %3148, %v4151_v30   ;;  %1684 = vperm.xlu1 %3151, %v4151_v30  }
 0x336   :  { %v408_v33 = vpop.xlane.xlu1 %407 }
 0x337   :  { %v414_v10 = vadd.f32 1e-06, %v408_v33 }
 0x339   :  { %3227 = vrcp.f32 %v414_v10  ;;  %v457_v39 = vand.u32 2147483648, %v414_v10  ;;  %v455_v29 = vand.u32 2147483647, %v414_v10  ;;  %vm451_vm4 = vweird.f32 %v414_v10 }
 0x33b   :  { %v458_v63 = vor.u32 1.1754944e-38, %v457_v39  ;;  %vm456_vm7 = vcmp.eq.f32.partialorder %v455_v29, 8.507059e+37 }
 0x33f   :  { %v3228_v9 = vpop.eup %3227 }
 0x340   :  { %v447_v47 = vmul.f32 %v3228_v9, %v414_v10  ;;  %vm452_vm15 = vweird.f32 %v3228_v9 }
 0x341   :  { %vm453_vm6 = vmor %vm451_vm4, %vm452_vm15  ;;  %v1033_v45 = vpop.f32.mrf.mxu3 }
 0x342   :  { %v448_v20 = vsub.f32 1.0, %v447_v47  ;;  %v4211_v47 = vsel %vm937_vm0, 0.0, %v4829_v2  ;;  %vm4834_vm15 = vmmov %vm4832_vm1 }
 0x343   :  { %vm4835_vm4 = vmmov %vm4832_vm1 }
 0x344   :  { %v449_v43 = vmul.f32 %v3228_v9, %v448_v20  ;;  %vm4840_vm0 = vmmov %vm4832_vm1 }
 0x346   :  { %v450_v44 = vadd.f32 %v3228_v9, %v449_v43 }
 0x348   :  { %v454_v17 = vsel %vm453_vm6, %v3228_v9, %v450_v44  ;;  %vm4836_vm6 = vmmov %vm4832_vm1 }
 0x349   :  { %v459_v61 = vsel %vm456_vm7, %v458_v63, %v454_v17  ;;  %v1035_v41 = vpop.f32.mrf.mxu3  ;;  %vm4837_vm7 = vmmov %vm4832_vm1 }
 0x34a   :  { %v4156_v22 = vmul.f32 %v459_v61, %v4033_v26  ;;  %v3072_v26 = vld [vmem:[%s4780_s7 + $0x58] sm:$0xff]  ;;  %v4202_v1 = vadd.f32 %v1035_v41, %v4196_v13 }
 0x34b   :  { %1619 = vmatpush.bf16.msra.mxu1 %v3072_v26 }
 0x34c   :  { %1692 = vperm.xlu1 %3151, %v4156_v22   ;;  %1564 = vperm.xlu0 %3150, %v4156_v22   ;;  %v1083_v10 = vsel %vm1043_vm3, %v4202_v1, -inf }
 0x34f   :  { %1620 = vmatpush.bf16.msra.mxu1 %v3071_v62 }
 0x352   :  { %v4190_v23 = vpop.f32.mrf.mxu3 }
 0x353   :  { %1621 = vmatpush.bf16.msra.mxu1 %v3070_v16 }
 0x354   :  { %1867 = vrot.lane.b32.xlu1 %v3514_v59, %s3343_s4  ;;  %1865 = vrot.lane.b32.xlu0 %v3518_v0, %s3343_s4  ;;  %v4174_v59 = vpop.f32.mrf.mxu0  ;;  %v886_v0 = vadd.s32 96, %v3568_v4 }
 0x355   :  { %3154 = vset.pattern.permute.xlu1 %v4828_v5  ;;  %3153 = vset.pattern.permute.xlu0 %v4828_v5 }
 0x356   :  { %v902_v6 = vsub.s32 %v886_v0, %v3566_v48 }
 0x357   :  { %1622 = vmatpush.bf16.msra.mxu1 %v3069_v57 }
 0x358   :  { %v918_v51 = vand.u32 1, %v902_v6 }
 0x35a   :  { %vm934_vm13 = vcmp.eq.s32.totalorder %v918_v51, 0  ;;  %v1040_v20 = vpop.f32.mrf.mxu3 }
 0x35b   :  { %v4193_v55 = vsel %vm934_vm13, 0.0, %v4829_v2  ;;  %v4214_v29 = vadd.f32 %v1040_v20, %v4211_v47  ;;  %vm4838_vm13 = vmmov %vm4832_vm1 }
 0x35c   :  { %v4187_v8 = vpop.f32.mrf.mxu0  ;;  %v4199_v58 = vadd.f32 %v1033_v45, %v4193_v55 }
 0x35d   :  { %v1089_v45 = vsel %vm1043_vm3, %v4214_v29, -inf }
 0x35e   :  { %v1080_v33 = vsel %vm1043_vm3, %v4199_v58, -inf }
 0x363   :  { %v4222_v41 = vpop.permute.xlu1 %1560 }
 0x364   :  { %v4204_v50 = vpop.f32.mrf.mxu0 }
 0x36c   :  { %v1491_v17 = vpop.f32.mrf.mxu0 }
 0x372   :  { %v411_v31 = vpop.xlane.xlu0 %410 }
 0x373   :  { %v415_v42 = vadd.f32 1e-06, %v411_v31 }
 0x374   :  { %v1493_v6 = vpop.f32.mrf.mxu0 }
 0x375   :  { %3229 = vrcp.f32 %v415_v42  ;;  %v472_v43 = vand.u32 2147483648, %v415_v42  ;;  %v470_v63 = vand.u32 2147483647, %v415_v42  ;;  %vm466_vm2 = vweird.f32 %v415_v42 }
 0x376   :  { %v1572_v16 = vmul.f32 %v4222_v41, %v1493_v6 }
 0x377   :  { %v473_v26 = vor.u32 1.1754944e-38, %v472_v43  ;;  %vm471_vm11 = vcmp.eq.f32.partialorder %v470_v63, 8.507059e+37 }
 0x37b   :  { %v3230_v32 = vpop.eup %3229 }
 0x37c   :  { %v462_v9 = vmul.f32 %v3230_v32, %v415_v42  ;;  %vm467_vm8 = vweird.f32 %v3230_v32 }
 0x37d   :  { %vm468_vm12 = vmor %vm466_vm2, %vm467_vm8 }
 0x37e   :  { %v463_v39 = vsub.f32 1.0, %v462_v9  ;;  %1081 = vmax.xlane.f32.xlu1 %v1080_v33  ;;  %1084 = vmax.xlane.f32.xlu0 %v1083_v10  ;;  %vm4841_vm8 = vmmov %vm4840_vm0 }
 0x37f   :  { %vm4842_vm2 = vmmov %vm4840_vm0 }
 0x380   :  { %v464_v44 = vmul.f32 %v3230_v32, %v463_v39 }
 0x382   :  { %v465_v61 = vadd.f32 %v3230_v32, %v464_v44 }
 0x384   :  { %v469_v62 = vsel %vm468_vm12, %v3230_v32, %v465_v61 }
 0x385   :  { %v474_v0 = vsel %vm471_vm11, %v473_v26, %v469_v62 }
 0x386   :  { %1090 = vmax.xlane.f32.xlu1 %v1089_v45  ;;  %v4219_v46 = vmul.f32 %v474_v0, %v4134_v24  ;;  %v3076_v24 = vld [vmem:[%s4780_s7 + $0x98] sm:$0xff] }
 0x387   :  { %1747 = vmatpush.bf16.msrb.mxu1 %v3076_v24 }
 0x388   :  { %1568 = vperm.xlu2 %3148, %v4219_v46  }
 0x38c   :  { %v4224_v56 = vpop.permute.xlu2 %1556 }
 0x38d   :  { %v1571_v51 = vmul.f32 %v4224_v56, %v1491_v17 }
 0x38f   :  { %v1583_v54 = vpack.c.bf16 %v1572_v16, %v1571_v51 }
 0x390   :  { %3152 = vset.pattern.permute.xlu2 %v4826_v60  ;;  %v3075_v60 = vld [vmem:[%s4780_s7 + $0x90] sm:$0xff] }
 0x391   :  { %1688 = vperm.xlu2 %3152, %v4087_v37   ;;  %2897 = vmatmul.msk.bf16.vlgmr.msra.gmra.mxu1 %vm4830_vm5, %v1583_v54 }
 0x392   :  { %1853 = vrot.lane.b32.xlu0 %v3530_v21, %s3343_s4  ;;  %1748 = vmatpush.bf16.msrb.mxu1 %v3075_v60  ;;  %v3074_v21 = vld [vmem:[%s4780_s7 + $0x88] sm:$0xff] }
 0x396   :  { %1749 = vmatpush.bf16.msrb.mxu1 %v3074_v21 }
 0x399   :  { %1696 = vperm.xlu2 %3152, %v4219_v46  }
 0x39a   :  { %1857 = vrot.lane.b32.xlu0 %v3538_v35, %s3343_s4  ;;  %v3073_v35 = vld [vmem:[%s4780_s7 + $0x80] sm:$0xff] }
 0x39b   :  { %1750 = vmatpush.bf16.msrb.mxu1 %v3073_v35 }
 0x39f   :  { %1855 = vrot.lane.b32.xlu1 %v3534_v28, %s3343_s4 }
 0x3a1   :  { %1849 = vrot.lane.b32.xlu2 %v3522_v7, %s3343_s4  ;;  %v888_v7 = vadd.s32 112, %v3568_v4 }
 0x3a2   :  { %3155 = vset.pattern.permute.xlu2 %v4831_v34 }
 0x3a3   :  { %v904_v57 = vsub.s32 %v888_v7, %v3566_v48  ;;  %v1496_v48 = vpop.f32.mrf.mxu0 }
 0x3a4   :  { %v4259_v28 = vpop.permute.xlu1 %1684 }
 0x3a7   :  { %1859 = vrot.lane.b32.xlu1 %v3544_v52, %s3343_s4  ;;  %v920_v52 = vand.u32 1, %v904_v57 }
 0x3a9   :  { %1851 = vrot.lane.b32.xlu2 %v3526_v14, %s3343_s4  ;;  %vm936_vm14 = vcmp.eq.s32.totalorder %v920_v52, 0 }
 0x3ab   :  { %v1498_v10 = vpop.f32.mrf.mxu0 }
 0x3af   :  { %1863 = vrot.lane.b32.xlu1 %v4045_v53, %s3343_s4  ;;  %v4271_v53 = vsel %vm936_vm14, 0.0, %v4829_v2 }
 0x3b0   :  { %v1039_v4 = vadd.f32 %v4190_v23, %v4271_v53 }
 0x3b2   :  { %v1086_v33 = vsel %vm1043_vm3, %v1039_v4, -inf }
 0x3b3   :  { %v1501_v9 = vpop.f32.mrf.mxu0 }
 0x3b4   :  { %v1699_v26 = vmul.f32 %v4259_v28, %v1501_v9 }
 0x3b7   :  { %1528 = vperm.xlu1 %3154, %v4087_v37  }
 0x3bb   :  { %v1503_v23 = vpop.f32.mrf.mxu0 }
 0x3be   :  { %v4264_v25 = vpop.permute.xlu1 %1692  ;;  %v4267_v31 = vpop.permute.xlu0 %1564 }
 0x3bf   :  { %3158 = vset.pattern.permute.xlu1 %v4831_v34  ;;  %v1573_v39 = vmul.f32 %v4267_v31, %v1496_v48 }
 0x3c3   :  { %v1506_v16 = vpop.f32.mrf.mxu0 }
 0x3c4   :  { %v1701_v52 = vmul.f32 %v4264_v25, %v1506_v16 }
 0x3c6   :  { %v1868_v14 = vpop.permute.xlu1 %1867  ;;  %v1866_v38 = vpop.permute.xlu0 %1865 }
 0x3c7   :  { %v1897_v42 = vsel %vm4832_vm1, %v1868_v14, 0  ;;  %v1894_v32 = vsel %vm4833_vm10, %v1866_v38, 0 }
 0x3c8   :  { %1905 = vmatpush.bf16.xpose.msra.mxu1 %v1897_v42 }
 0x3d0   :  { %1906 = vmatpush.bf16.xpose.msra.mxu1 %v1894_v32 }
 0x3d2   :  { %1087 = vmax.xlane.f32.xlu2 %v1086_v33 }
 0x3e2   :  { %v4277_v20 = vpop.permute.xlu2 %1568 }
 0x3e3   :  { %v1574_v2 = vmul.f32 %v4277_v20, %v1498_v10 }
 0x3e5   :  { %v1584_v43 = vpack.c.bf16 %v1574_v2, %v1573_v39 }
 0x3e7   :  { %2898 = vmatmul.msk.bf16.gmra.mxu1 %vm4834_vm15, %v1584_v43 }
 0x3eb   :  { %v4282_v44 = vpop.permute.xlu2 %1688 }
 0x3ec   :  { %v1700_v63 = vmul.f32 %v4282_v44, %v1503_v23 }
 0x3ee   :  { %v1711_v0 = vpack.c.bf16 %v1700_v63, %v1699_v26  ;;  %v3067_v26 = vld [vmem:[%s4780_s7 + $0x10] sm:$0xff] }
 0x3f1   :  { %v1082_v17 = vpop.xlane.xlu1 %1081  ;;  %v1085_v61 = vpop.xlane.xlu0 %1084 }
 0x3f2   :  { %v1104_v45 = vsub.f32 %v4199_v58, %v1082_v17  ;;  %v1105_v6 = vsub.f32 %v4202_v1, %v1085_v61  ;;  %v1508_v1 = vpop.f32.mrf.mxu0 }
 0x3f3   :  { %v4292_v35 = vpop.permute.xlu2 %1696 }
 0x3f4   :  { %v1132_v62 = vmul.f32 1.442695, %v1104_v45  ;;  %v1134_v51 = vmul.f32 1.442695, %v1105_v6  ;;  %v1702_v7 = vmul.f32 %v4292_v35, %v1508_v1  ;;  %v3065_v6 = vld [vmem:[%s4780_s7] sm:$0xff] }
 0x3f6   :  { %3231 = vpow2.f32 %v1132_v62  ;;  %v3066_v62 = vld [vmem:[%s4780_s7 + $0x8] sm:$0xff] }
 0x3f7   :  { %2933 = vmatmul.msk.bf16.vlgmr.msrb.gmra.mxu1 %vm4835_vm4, %v1711_v0  ;;  %3233 = vpow2.f32 %v1134_v51 }
 0x3f9   :  { %v1091_v54 = vpop.xlane.xlu1 %1090 }
 0x3fa   :  { %v1107_v24 = vsub.f32 %v4214_v29, %v1091_v54  ;;  %v1712_v29 = vpack.c.bf16 %v1702_v7, %v1701_v52 }
 0x3fb   :  { %v1850_v48 = vpop.permute.xlu2 %1849 }
 0x3fc   :  { %v1138_v60 = vmul.f32 1.442695, %v1107_v24  ;;  %v4290_v21 = vpop.eup %3231 }
 0x3fd   :  { %v1176_v58 = vsel %vm1043_vm3, %v4290_v21, 0.0  ;;  %v4297_v57 = vpop.eup %3233 }
 0x3fe   :  { %3235 = vpow2.f32 %v1138_v60  ;;  %1177 = vadd.xlane.f32.xlu2 %v1176_v58  ;;  %v1179_v38 = vsel %vm1043_vm3, %v4297_v57, 0.0 }
 0x403   :  { %v1852_v32 = vpop.permute.xlu2 %1851 }
 0x404   :  { %v4300_v14 = vpop.eup %3235  ;;  %v1854_v33 = vpop.permute.xlu0 %1853 }
 0x405   :  { %v1185_v42 = vsel %vm1043_vm3, %v4300_v14, 0.0 }
 0x406   :  { %1186 = vadd.xlane.f32.xlu0 %v1185_v42  ;;  %1180 = vadd.xlane.f32.xlu2 %v1179_v38 }
 0x407   :  { %2934 = vmatmul.msk.bf16.gmra.mxu1 %vm4836_vm6, %v1712_v29  ;;  %vm4844_vm6 = vmmov %vm4840_vm0 }
 0x40c   :  { %v1858_v17 = vpop.permute.xlu0 %1857 }
 0x40e   :  { %v4318_v63 = vpop.f32.mrf.mxu1 }
 0x411   :  { %v1856_v9 = vpop.permute.xlu1 %1855 }
 0x417   :  { %2953 = vmatmul.msk.bf16.vlgmr.msra.gmra.mxu1 %vm4837_vm7, %v1850_v48 }
 0x419   :  { %v1860_v45 = vpop.permute.xlu1 %1859 }
 0x41a   :  { %1523 = vperm.xlu0 %3153, %v4151_v30  }
 0x421   :  { %v4348_v7 = vpop.permute.xlu1 %1863 }
 0x422   :  { %1533 = vperm.xlu0 %3153, %v4156_v22  }
 0x427   :  { %2954 = vmatmul.msk.bf16.gmra.mxu1 %vm4838_vm13, %v1852_v32  ;;  %vm4845_vm13 = vmmov %vm4840_vm0 }
 0x42a   :  { %3157 = vset.pattern.permute.xlu0 %v4831_v34  ;;  %v4321_v34 = vpop.f32.mrf.mxu1 }
 0x437   :  { %2955 = vmatmul.msk.bf16.gmra.mxu1 %vm4839_vm9, %v1854_v33 }
 0x445   :  { %v1088_v10 = vpop.xlane.xlu2 %1087 }
 0x446   :  { %v1106_v39 = vsub.f32 %v1039_v4, %v1088_v10  ;;  %v3068_v4 = vld [vmem:[%s4780_s7 + $0x18] sm:$0xff] }
 0x447   :  { %2956 = vmatmul.msk.bf16.gmra.mxu1 %vm4840_vm0, %v1856_v9  ;;  %1668 = vmatpush.bf16.msra.mxu2 %v3068_v4  ;;  %v4356_v4 = vpop.permute.xlu1 %1528 }
 0x448   :  { %v1136_v2 = vmul.f32 1.442695, %v1106_v39 }
 0x44a   :  { %3237 = vpow2.f32 %v1136_v2 }
 0x44b   :  { %1669 = vmatpush.bf16.msra.mxu2 %v3067_v26 }
 0x44f   :  { %1670 = vmatpush.bf16.msra.mxu2 %v3066_v62 }
 0x450   :  { %v4314_v43 = vpop.eup %3237 }
 0x451   :  { %v1182_v23 = vsel %vm1043_vm3, %v4314_v43, 0.0 }
 0x452   :  { %1183 = vadd.xlane.f32.xlu2 %v1182_v23 }
 0x453   :  { %1671 = vmatpush.bf16.msra.mxu2 %v3065_v6 }
 0x457   :  { %2957 = vmatmul.msk.bf16.gmra.mxu1 %vm4841_vm8, %v1858_v17 }
 0x464   :  { %v4326_v61 = vpop.f32.mrf.mxu1 }
 0x467   :  { %2958 = vmatmul.msk.bf16.gmra.mxu1 %vm4842_vm2, %v1860_v45 }
 0x46a   :  { %1861 = vrot.lane.b32.xlu2 %v4039_v12, %s3343_s4 }
 0x46c   :  { %v4337_v0 = vpop.f32.mrf.mxu1 }
 0x471   :  { %v1178_v16 = vpop.xlane.xlu2 %1177 }
 0x472   :  { %1767 = vperm.xlu2 %3155, %v4151_v30   ;;  %3239 = vrcp.f32 %v1178_v16  ;;  %v1379_v30 = vand.u32 2147483648, %v1178_v16  ;;  %vm1373_vm11 = vweird.f32 %v1178_v16  ;;  %v1377_v38 = vand.u32 2147483647, %v1178_v16 }
 0x474   :  { %v4343_v51 = vpop.f32.mrf.mxu1  ;;  %v1380_v2 = vor.u32 1.1754944e-38, %v1379_v30  ;;  %vm1378_vm1 = vcmp.eq.f32.partialorder %v1377_v38, 8.507059e+37 }
 0x478   :  { %v3240_v54 = vpop.eup %3239 }
 0x479   :  { %v1369_v24 = vmul.f32 %v3240_v54, %v1178_v16  ;;  %v1181_v60 = vpop.xlane.xlu2 %1180  ;;  %vm1374_vm12 = vweird.f32 %v3240_v54 }
 0x47a   :  { %1771 = vperm.xlu2 %3155, %v4087_v37   ;;  %3241 = vrcp.f32 %v1181_v60  ;;  %v4352_v37 = vpop.xlane.xlu0 %1186  ;;  %vm1375_vm5 = vmor %vm1373_vm11, %vm1374_vm12  ;;  %v1394_v33 = vand.u32 2147483648, %v1181_v60  ;;  %v1392_v9 = vand.u32 2147483647, %v1181_v60  ;;  %vm1388_vm10 = vweird.f32 %v1181_v60 }
 0x47b   :  { %v1370_v12 = vsub.f32 1.0, %v1369_v24  ;;  %v1542_v24 = vmul.f32 %v4356_v4, %v4174_v59  ;;  %3243 = vrcp.f32 %v4352_v37  ;;  %vm1418_vm9 = vweird.f32 %v4352_v37 }
 0x47c   :  { %v4346_v58 = vpop.f32.mrf.mxu1  ;;  %vm1393_vm4 = vcmp.eq.f32.partialorder %v1392_v9, 8.507059e+37 }
 0x47d   :  { %v1371_v1 = vmul.f32 %v3240_v54, %v1370_v12 }
 0x47f   :  { %v1372_v29 = vadd.f32 %v3240_v54, %v1371_v1 }
 0x480   :  { %v3242_v52 = vpop.eup %3241 }
 0x481   :  { %v1384_v42 = vmul.f32 %v3242_v52, %v1181_v60  ;;  %vm1389_vm14 = vweird.f32 %v3242_v52  ;;  %v1376_v39 = vsel %vm1375_vm5, %v3240_v54, %v1372_v29 }
 0x482   :  { %3156 = vset.pattern.permute.xlu2 %v4828_v5  ;;  %vm1390_vm15 = vmor %vm1388_vm10, %vm1389_vm14  ;;  %v1395_v5 = vor.u32 1.1754944e-38, %v1394_v33  ;;  %v1381_v17 = vsel %vm1378_vm1, %v1380_v2, %v1376_v39  ;;  %v3244_v2 = vpop.eup %3243 }
 0x483   :  { %1538 = vperm.xlu2 %3156, %v4219_v46   ;;  %v1385_v48 = vsub.f32 1.0, %v1384_v42  ;;  %v1382_v16 = vmul.f32 %v4290_v21, %v1381_v17  ;;  %vm1419_vm7 = vweird.f32 %v3244_v2  ;;  %vm4846_vm14 = vmmov %vm4844_vm6 }
 0x484   :  { %v4354_v32 = vpop.f32.mrf.mxu1  ;;  %vm1420_vm0 = vmor %vm1418_vm9, %vm1419_vm7 }
 0x485   :  { %v1386_v10 = vmul.f32 %v3242_v52, %v1385_v48  ;;  %vm4847_vm1 = vmmov %vm4844_vm6 }
 0x486   :  { %vm4851_vm10 = vmmov %vm4847_vm1 }
 0x487   :  { %v1387_v23 = vadd.f32 %v3242_v52, %v1386_v10 }
 0x489   :  { %v1391_v45 = vsel %vm1390_vm15, %v3242_v52, %v1387_v23  ;;  %vm4855_vm15 = vmmov %vm4847_vm1 }
 0x48a   :  { %v1396_v26 = vsel %vm1393_vm4, %v1395_v5, %v1391_v45 }
 0x48b   :  { %v1397_v54 = vmul.f32 %v4297_v57, %v1396_v26 }
 0x48c   :  { %v4358_v62 = vpop.f32.mrf.mxu1  ;;  %v4360_v6 = vpop.permute.xlu0 %1523 }
 0x48d   :  { %4843 = vst [vmem:[#allocation11_spill] sm:$0xff] %v4358_v62  ;;  %v1541_v60 = vmul.f32 %v4360_v6, %v4166_v15  ;;  %v1434_v12 = vpack.c.bf16 %v1397_v54, %v1382_v16 }
 0x48f   :  { %v1553_v1 = vpack.c.bf16 %v1542_v24, %v1541_v60  ;;  %2879 = vmatmul.msk.bf16.gmra.mxu0 %vm1043_vm3, %v1434_v12  ;;  %v1424_v12 = vand.u32 2147483648, %v4352_v37 }
 0x491   :  { %2915 = vmatmul.msk.bf16.vlgmr.msra.gmra.mxu2 %vm4844_vm6, %v1553_v1 }
 0x494   :  { %v1908_v52 = vpop.f32.mrf.mxu1 }
 0x495   :  { %v4371_v29 = vadd.f32 %v1908_v52, %v3575_v11 }
 0x497   :  { %v1948_v21 = vsel %vm1043_vm3, %v4371_v29, -inf }
 0x498   :  { %1949 = vmax.xlane.f32.xlu1 %v1948_v21 }
 0x49c   :  { %v1910_v57 = vpop.f32.mrf.mxu1 }
 0x49d   :  { %v4376_v59 = vadd.f32 %v1910_v57, %v3585_v19 }
 0x49f   :  { %v1951_v15 = vsel %vm1043_vm3, %v4376_v59, -inf }
 0x4a4   :  { %v1913_v42 = vpop.f32.mrf.mxu1 }
 0x4a5   :  { %v4381_v38 = vadd.f32 %v1913_v42, %v3595_v27 }
 0x4a7   :  { %v1954_v11 = vsel %vm1043_vm3, %v4381_v38, -inf }
 0x4ac   :  { %v1915_v30 = vpop.f32.mrf.mxu1  ;;  %1952 = vmax.xlane.f32.xlu2 %v1951_v15  ;;  %v1425_v15 = vor.u32 1.1754944e-38, %v1424_v12 }
 0x4ad   :  { %v4389_v10 = vadd.f32 %v1915_v30, %v3605_v36  ;;  %v1414_v36 = vmul.f32 %v3244_v2, %v4352_v37 }
 0x4af   :  { %v1957_v27 = vsel %vm1043_vm3, %v4389_v10, -inf  ;;  %v1415_v5 = vsub.f32 1.0, %v1414_v36 }
 0x4b4   :  { %v1918_v48 = vpop.f32.mrf.mxu1  ;;  %1955 = vmax.xlane.f32.xlu2 %v1954_v11 }
 0x4b5   :  { %v4386_v33 = vadd.f32 %v1918_v48, %v3615_v49 }
 0x4b7   :  { %v1960_v19 = vsel %vm1043_vm3, %v4386_v33, -inf }
 0x4b8   :  { %1961 = vmax.xlane.f32.xlu1 %v1960_v19 }
 0x4bc   :  { %v1920_v9 = vpop.f32.mrf.mxu1  ;;  %1958 = vmax.xlane.f32.xlu2 %v1957_v27 }
 0x4bd   :  { %v4397_v39 = vadd.f32 %v1920_v9, %v3625_v40  ;;  %v1416_v40 = vmul.f32 %v3244_v2, %v1415_v5 }
 0x4bf   :  { %v1963_v49 = vsel %vm1043_vm3, %v4397_v39, -inf  ;;  %v1417_v54 = vadd.f32 %v3244_v2, %v1416_v40  ;;  %v3077_v40 = vld [vmem:[%s4780_s7 + $0xc0] sm:$0xff] }
 0x4c0   :  { %1964 = vmax.xlane.f32.xlu0 %v1963_v49 }
 0x4c1   :  { %v1421_v42 = vsel %vm1420_vm0, %v3244_v2, %v1417_v54 }
 0x4c4   :  { %v1923_v23 = vpop.f32.mrf.mxu1 }
 0x4c5   :  { %v4403_v17 = vadd.f32 %v1923_v23, %v3635_v3  ;;  %v1184_v45 = vpop.xlane.xlu2 %1183  ;;  %v1422_v3 = vand.u32 2147483647, %v4352_v37 }
 0x4c6   :  { %3245 = vrcp.f32 %v1184_v45  ;;  %v1409_v52 = vand.u32 2147483648, %v1184_v45  ;;  %v1407_v57 = vand.u32 2147483647, %v1184_v45  ;;  %vm1403_vm12 = vweird.f32 %v1184_v45 }
 0x4c7   :  { %v1966_v26 = vsel %vm1043_vm3, %v4403_v17, -inf  ;;  %vm1423_vm2 = vcmp.eq.f32.partialorder %v1422_v3, 8.507059e+37  ;;  %v4850_v3 = vld [vmem:[#allocation6_spill] sm:$0xff] }
 0x4c8   :  { %1967 = vmax.xlane.f32.xlu2 %v1966_v26  ;;  %v1410_v11 = vor.u32 1.1754944e-38, %v1409_v52  ;;  %v1426_v48 = vsel %vm1423_vm2, %v1425_v15, %v1421_v42  ;;  %vm1408_vm5 = vcmp.eq.f32.partialorder %v1407_v57, 8.507059e+37 }
 0x4c9   :  { %v1427_v49 = vmul.f32 %v4300_v14, %v1426_v48 }
 0x4cc   :  { %v3246_v16 = vpop.eup %3245  ;;  %v1925_v23 = vpop.f32.mrf.mxu1 }
 0x4cd   :  { %v1399_v24 = vmul.f32 %v3246_v16, %v1184_v45  ;;  %v1862_v60 = vpop.permute.xlu2 %1861  ;;  %vm1404_vm8 = vweird.f32 %v3246_v16  ;;  %v3080_v45 = vld [vmem:[%s4780_s7 + $0xd8] sm:$0xff] }
 0x4ce   :  { %2959 = vmatmul.msk.bf16.gmra.mxu1 %vm4845_vm13, %v1862_v60  ;;  %vm1405_vm11 = vmor %vm1403_vm12, %vm1404_vm8  ;;  %1830 = vmatpush.bf16.msrb.mxu2 %v3080_v45 }
 0x4cf   :  { %v1400_v1 = vsub.f32 1.0, %v1399_v24  ;;  %v4849_v24 = vld [vmem:[#allocation7_spill] sm:$0xff] }
 0x4d1   :  { %v1401_v21 = vmul.f32 %v3246_v16, %v1400_v1  ;;  %1779 = vperm.xlu1 %3158, %v4219_v46  }
 0x4d3   :  { %v1402_v30 = vadd.f32 %v3246_v16, %v1401_v21 }
 0x4d4   :  { %1775 = vperm.xlu0 %3157, %v4156_v22   ;;  %v4424_v22 = vpop.permute.xlu0 %1533 }
 0x4d5   :  { %v4413_v37 = vpop.permute.xlu2 %1767  ;;  %v1406_v19 = vsel %vm1405_vm11, %v3246_v16, %v1402_v30 }
 0x4d6   :  { %v1411_v27 = vsel %vm1408_vm5, %v1410_v11, %v1406_v19 }
 0x4d7   :  { %v1412_v9 = vmul.f32 %v4314_v43, %v1411_v27  ;;  %v1543_v43 = vmul.f32 %v4424_v22, %v4187_v8  ;;  %v3078_v8 = vld [vmem:[%s4780_s7 + $0xc8] sm:$0xff] }
 0x4d9   :  { %v1435_v46 = vpack.c.bf16 %v1427_v49, %v1412_v9 }
 0x4db   :  { %2880 = vmatmul.msk.bf16.gmra.mxu0 %vm1043_vm3, %v1435_v46 }
 0x4dd   :  { %v4418_v2 = vpop.permute.xlu2 %1771 }
 0x4de   :  { %2960 = vmatmul.msk.bf16.gmra.mxu1 %vm4846_vm14, %v4348_v7  ;;  %v1928_v7 = vpop.f32.mrf.mxu1 }
 0x4df   :  { %v4456_v1 = vadd.f32 %v1928_v7, %v4850_v3 }
 0x4e0   :  { %2342 = vrot.lane.b32.xlu2 %v3919_v18, %s3343_s4  ;;  %v3079_v18 = vld [vmem:[%s4780_s7 + $0xd0] sm:$0xff] }
 0x4e1   :  { %1831 = vmatpush.bf16.msrb.mxu2 %v3079_v18  ;;  %v1972_v52 = vsel %vm1043_vm3, %v4456_v1, -inf }
 0x4e5   :  { %v4426_v36 = vpop.permute.xlu2 %1538  ;;  %1832 = vmatpush.bf16.msrb.mxu2 %v3078_v8 }
 0x4e6   :  { %v1544_v14 = vmul.f32 %v4426_v36, %v4204_v50  ;;  %v4848_v50 = vld [vmem:[#allocation5_spill] sm:$0xff]  ;;  %v1930_v54 = vpop.f32.mrf.mxu1 }
 0x4e7   :  { %v4443_v26 = vadd.f32 %v1925_v23, %v4848_v50  ;;  %v4451_v60 = vadd.f32 %v1930_v54, %v4849_v24 }
 0x4e8   :  { %v1554_v5 = vpack.c.bf16 %v1544_v14, %v1543_v43 }
 0x4e9   :  { %1833 = vmatpush.bf16.msrb.mxu2 %v3077_v40  ;;  %v1969_v16 = vsel %vm1043_vm3, %v4443_v26, -inf  ;;  %v1975_v12 = vsel %vm1043_vm3, %v4451_v60, -inf }
 0x4ea   :  { %2916 = vmatmul.msk.bf16.gmra.mxu2 %vm4847_vm1, %v1554_v5 }
 0x4ee   :  { %v1933_v50 = vpop.f32.mrf.mxu1 }
 0x4fb   :  { %1970 = vmax.xlane.f32.xlu1 %v1969_v16 }
 0x503   :  { %1976 = vmax.xlane.f32.xlu1 %v1975_v12 }
 0x509   :  { %1973 = vmax.xlane.f32.xlu2 %v1972_v52 }
 0x50b   :  { %v1950_v21 = vpop.xlane.xlu1 %1949 }
 0x50c   :  { %v1996_v57 = vsub.f32 %v4371_v29, %v1950_v21  ;;  %v1511_v42 = vpop.f32.mrf.mxu0  ;;  %v1935_v21 = vpop.f32.mrf.mxu1 }
 0x50d   :  { %v1782_v48 = vmul.f32 %v4413_v37, %v1511_v42  ;;  %v4853_v42 = vld [vmem:[#allocation9_spill] sm:$0xff] }
 0x50e   :  { %v2012_v15 = vmul.f32 1.442695, %v1996_v57 }
 0x510   :  { %3247 = vpow2.f32 %v2012_v15  ;;  %v4490_v15 = vadd.f32 %v1935_v21, %v4853_v42 }
 0x514   :  { %v1513_v30 = vpop.f32.mrf.mxu0 }
 0x515   :  { %v1783_v19 = vmul.f32 %v4418_v2, %v1513_v30 }
 0x516   :  { %v4461_v11 = vpop.eup %3247 }
 0x517   :  { %v2044_v27 = vsel %vm1043_vm3, %v4461_v11, 0.0  ;;  %v1794_v9 = vpack.c.bf16 %v1783_v19, %v1782_v48  ;;  %v1981_v48 = vsel %vm1043_vm3, %v4490_v15, -inf  ;;  %v4854_v19 = vld [vmem:[#allocation10_spill] sm:$0xff] }
 0x518   :  { %2045 = vadd.xlane.f32.xlu0 %v2044_v27 }
 0x519   :  { %2951 = vmatmul.msk.bf16.vlgmr.msrb.gmra.mxu2 %vm4851_vm10, %v1794_v9 }
 0x51f   :  { %v1953_v49 = vpop.xlane.xlu2 %1952 }
 0x520   :  { %v1997_v29 = vsub.f32 %v4376_v59, %v1953_v49 }
 0x522   :  { %v2014_v46 = vmul.f32 1.442695, %v1997_v29 }
 0x524   :  { %3249 = vpow2.f32 %v2014_v46 }
 0x527   :  { %v1956_v43 = vpop.xlane.xlu2 %1955 }
 0x528   :  { %v1998_v14 = vsub.f32 %v4381_v38, %v1956_v43  ;;  %v4852_v38 = vld [vmem:[#allocation8_spill] sm:$0xff] }
 0x529   :  { %v4480_v16 = vadd.f32 %v1933_v50, %v4852_v38 }
 0x52a   :  { %v4470_v23 = vpop.eup %3249  ;;  %v2016_v5 = vmul.f32 1.442695, %v1998_v14 }
 0x52b   :  { %v2047_v45 = vsel %vm1043_vm3, %v4470_v23, 0.0  ;;  %v1978_v52 = vsel %vm1043_vm3, %v4480_v16, -inf }
 0x52c   :  { %3251 = vpow2.f32 %v2016_v5  ;;  %2048 = vadd.xlane.f32.xlu1 %v2047_v45 }
 0x52f   :  { %v1959_v18 = vpop.xlane.xlu2 %1958 }
 0x530   :  { %v1999_v8 = vsub.f32 %v4389_v10, %v1959_v18 }
 0x532   :  { %v4475_v7 = vpop.eup %3251  ;;  %v2018_v59 = vmul.f32 1.442695, %v1999_v8 }
 0x533   :  { %v2050_v40 = vsel %vm1043_vm3, %v4475_v7, 0.0  ;;  %v1965_v54 = vpop.xlane.xlu0 %1964 }
 0x534   :  { %3253 = vpow2.f32 %v2018_v59  ;;  %2051 = vadd.xlane.f32.xlu0 %v2050_v40  ;;  %v2001_v12 = vsub.f32 %v4397_v39, %v1965_v54 }
 0x536   :  { %v2022_v57 = vmul.f32 1.442695, %v2001_v12 }
 0x538   :  { %3255 = vpow2.f32 %v2022_v57 }
 0x53a   :  { %v4482_v24 = vpop.eup %3253 }
 0x53b   :  { %v1968_v3 = vpop.xlane.xlu2 %1967  ;;  %v2053_v10 = vsel %vm1043_vm3, %v4482_v24, 0.0 }
 0x53c   :  { %2054 = vadd.xlane.f32.xlu2 %v2053_v10  ;;  %1979 = vmax.xlane.f32.xlu0 %v1978_v52  ;;  %v2002_v39 = vsub.f32 %v4403_v17, %v1968_v3 }
 0x53e   :  { %v4497_v27 = vpop.eup %3255  ;;  %v2024_v9 = vmul.f32 1.442695, %v2002_v39 }
 0x53f   :  { %v2059_v29 = vsel %vm1043_vm3, %v4497_v27, 0.0 }
 0x540   :  { %3257 = vpow2.f32 %v2024_v9  ;;  %v1673_v9 = vpop.f32.mrf.mxu2 }
 0x543   :  { %v2343_v30 = vpop.permute.xlu2 %2342 }
 0x544   :  { %2376 = vmatpush.bf16.msra.mxu2 %v2343_v30  ;;  %1982 = vmax.xlane.f32.xlu0 %v1981_v48 }
 0x545   :  { %2340 = vrot.lane.b32.xlu1 %v4854_v19, %s3343_s4 }
 0x546   :  { %v4506_v17 = vpop.eup %3257  ;;  %v4523_v54 = vpop.permute.xlu0 %1775 }
 0x547   :  { %v2062_v45 = vsel %vm1043_vm3, %v4506_v17, 0.0 }
 0x54b   :  { %v1938_v49 = vpop.f32.mrf.mxu1 }
 0x54c   :  { %v4502_v46 = vadd.f32 %v1938_v49, %v4193_v55  ;;  %2060 = vadd.xlane.f32.xlu0 %v2059_v29  ;;  %v1962_v55 = vpop.xlane.xlu1 %1961 }
 0x54d   :  { %v2000_v40 = vsub.f32 %v4386_v33, %v1962_v55  ;;  %v4544_v55 = vpop.f32.mrf.mxu2 }
 0x54e   :  { %v1984_v43 = vsel %vm1043_vm3, %v4502_v46, -inf }
 0x54f   :  { %1985 = vmax.xlane.f32.xlu2 %v1984_v43  ;;  %v2020_v3 = vmul.f32 1.442695, %v2000_v40 }
 0x551   :  { %3259 = vpow2.f32 %v2020_v3  ;;  %v1674_v3 = vadd.f32 %v1673_v9, %v4318_v63 }
 0x553   :  { %v1940_v14 = vpop.f32.mrf.mxu1 }
 0x554   :  { %v4509_v5 = vadd.f32 %v1940_v14, %v4196_v13  ;;  %v4521_v38 = vpop.permute.xlu1 %1779 }
 0x556   :  { %v1987_v18 = vsel %vm1043_vm3, %v4509_v5, -inf }
 0x557   :  { %2063 = vadd.xlane.f32.xlu2 %v2062_v45  ;;  %1988 = vmax.xlane.f32.xlu0 %v1987_v18 }
 0x558   :  { %v1516_v8 = vpop.f32.mrf.mxu0 }
 0x559   :  { %v1784_v10 = vmul.f32 %v4523_v54, %v1516_v8 }
 0x55b   :  { %v1943_v50 = vpop.f32.mrf.mxu1 }
 0x55c   :  { %v4516_v59 = vadd.f32 %v1943_v50, %v4271_v53  ;;  %v4528_v53 = vpop.eup %3259 }
 0x55d   :  { %v2056_v57 = vsel %vm1043_vm3, %v4528_v53, 0.0 }
 0x55e   :  { %v1990_v13 = vsel %vm1043_vm3, %v4516_v59, -inf }
 0x55f   :  { %1991 = vmax.xlane.f32.xlu2 %v1990_v13 }
 0x560   :  { %v1518_v12 = vpop.f32.mrf.mxu0 }
 0x561   :  { %v1785_v52 = vmul.f32 %v4521_v38, %v1518_v12 }
 0x563   :  { %v1795_v21 = vpack.c.bf16 %v1785_v52, %v1784_v10  ;;  %v1945_v29 = vpop.f32.mrf.mxu1  ;;  %v1762_v10 = vadd.f32 %v4343_v51, %v1674_v3 }
 0x565   :  { %2952 = vmatmul.msk.bf16.gmra.mxu2 %vm4855_vm15, %v1795_v21 }
 0x56e   :  { %v1971_v33 = vpop.xlane.xlu1 %1970 }
 0x56f   :  { %v2003_v42 = vsub.f32 %v4443_v26, %v1971_v33  ;;  %2057 = vadd.xlane.f32.xlu1 %v2056_v57  ;;  %v4540_v26 = vadd.f32 %v1945_v29, %v4211_v47 }
 0x571   :  { %v2026_v30 = vmul.f32 1.442695, %v2003_v42 }
 0x573   :  { %3261 = vpow2.f32 %v2026_v30 }
 0x576   :  { %v1977_v48 = vpop.xlane.xlu1 %1976 }
 0x577   :  { %v2005_v39 = vsub.f32 %v4451_v60, %v1977_v48  ;;  %v1993_v60 = vsel %vm1043_vm3, %v4540_v26, -inf }
 0x579   :  { %v4534_v19 = vpop.eup %3261  ;;  %v2030_v43 = vmul.f32 1.442695, %v2005_v39 }
 0x57a   :  { %v2065_v49 = vsel %vm1043_vm3, %v4534_v19, 0.0 }
 0x57b   :  { %2066 = vadd.xlane.f32.xlu0 %v2065_v49  ;;  %3263 = vpow2.f32 %v2030_v43 }
 0x57c   :  { %v1974_v14 = vpop.xlane.xlu2 %1973 }
 0x57d   :  { %v2004_v45 = vsub.f32 %v4456_v1, %v1974_v14  ;;  %v4554_v1 = vpop.f32.mrf.mxu2 }
 0x57f   :  { %v2028_v18 = vmul.f32 1.442695, %v2004_v45 }
 0x581   :  { %3265 = vpow2.f32 %v2028_v18  ;;  %v4546_v8 = vpop.eup %3263 }
 0x582   :  { %v2071_v47 = vsel %vm1043_vm3, %v4546_v8, 0.0 }
 0x583   :  { %1994 = vmax.xlane.f32.xlu0 %v1993_v60 }
 0x585   :  { %v4556_v13 = vpop.f32.mrf.mxu2 }
 0x587   :  { %v4548_v50 = vpop.eup %3265 }
 0x588   :  { %v2068_v40 = vsel %vm1043_vm3, %v4548_v50, 0.0 }
 0x589   :  { %2069 = vadd.xlane.f32.xlu2 %v2068_v40 }
 0x58b   :  { %2072 = vadd.xlane.f32.xlu0 %v2071_v47  ;;  %v2046_v12 = vpop.xlane.xlu0 %2045 }
 0x58c   :  { %3267 = vrcp.f32 %v2046_v12  ;;  %v2103_v60 = vand.u32 2147483648, %v2046_v12  ;;  %vm2097_vm9 = vweird.f32 %v2046_v12  ;;  %v2101_v40 = vand.u32 2147483647, %v2046_v12 }
 0x58e   :  { %vm2102_vm2 = vcmp.eq.f32.partialorder %v2101_v40, 8.507059e+37 }
 0x592   :  { %v3268_v21 = vpop.eup %3267 }
 0x593   :  { %v2093_v42 = vmul.f32 %v3268_v21, %v2046_v12  ;;  %vm2098_vm6 = vweird.f32 %v3268_v21 }
 0x594   :  { %vm2099_vm0 = vmor %vm2097_vm9, %vm2098_vm6 }
 0x595   :  { %v2094_v30 = vsub.f32 1.0, %v2093_v42 }
 0x597   :  { %v2095_v29 = vmul.f32 %v3268_v21, %v2094_v30 }
 0x599   :  { %v2096_v9 = vadd.f32 %v3268_v21, %v2095_v29 }
 0x59b   :  { %v2100_v42 = vsel %vm2099_vm0, %v3268_v21, %v2096_v9 }
 0x59c   :  { %v1835_v52 = vpop.f32.mrf.mxu2 }
 0x59d   :  { %v4560_v33 = vadd.f32 %v1835_v52, %v1762_v10 }
 0x59f   :  { %v2049_v57 = vpop.xlane.xlu1 %2048 }
 0x5a0   :  { %3269 = vrcp.f32 %v2049_v57  ;;  %v2118_v51 = vand.u32 2147483648, %v2049_v57  ;;  %vm2112_vm7 = vweird.f32 %v2049_v57  ;;  %v2116_v45 = vand.u32 2147483647, %v2049_v57 }
 0x5a2   :  { %v2119_v52 = vor.u32 1.1754944e-38, %v2118_v51  ;;  %vm2117_vm8 = vcmp.eq.f32.partialorder %v2116_v45, 8.507059e+37 }
 0x5a6   :  { %v3270_v48 = vpop.eup %3269 }
 0x5a7   :  { %v2108_v39 = vmul.f32 %v3270_v48, %v2049_v57  ;;  %v4562_v49 = vpop.xlane.xlu0 %2051  ;;  %vm2113_vm4 = vweird.f32 %v3270_v48  ;;  %v2104_v57 = vor.u32 1.1754944e-38, %v2103_v60 }
 0x5a8   :  { %3271 = vrcp.f32 %v4562_v49  ;;  %vm2114_vm13 = vmor %vm2112_vm7, %vm2113_vm4  ;;  %vm2127_vm1 = vweird.f32 %v4562_v49 }
 0x5a9   :  { %v2109_v43 = vsub.f32 1.0, %v2108_v39 }
 0x5ab   :  { %v2110_v63 = vmul.f32 %v3270_v48, %v2109_v43 }
 0x5ad   :  { %v2111_v14 = vadd.f32 %v3270_v48, %v2110_v63  ;;  %v2105_v63 = vsel %vm2102_vm2, %v2104_v57, %v2100_v42 }
 0x5ae   :  { %v4565_v18 = vpop.eup %3271  ;;  %v2106_v51 = vmul.f32 %v4461_v11, %v2105_v63 }
 0x5af   :  { %v2115_v47 = vsel %vm2114_vm13, %v3270_v48, %v2111_v14  ;;  %v2055_v3 = vpop.xlane.xlu2 %2054  ;;  %v1980_v10 = vpop.xlane.xlu0 %1979  ;;  %v2123_v30 = vmul.f32 %v4565_v18, %v4562_v49  ;;  %vm2128_vm11 = vweird.f32 %v4565_v18 }
 0x5b0   :  { %3273 = vrcp.f32 %v2055_v3  ;;  %v2006_v39 = vsub.f32 %v4480_v16, %v1980_v10  ;;  %v2120_v29 = vsel %vm2117_vm8, %v2119_v52, %v2115_v47  ;;  %v2148_v11 = vand.u32 2147483648, %v2055_v3  ;;  %vm2129_vm10 = vmor %vm2127_vm1, %vm2128_vm11 }
 0x5b1   :  { %v2121_v12 = vmul.f32 %v4470_v23, %v2120_v29  ;;  %v2124_v48 = vsub.f32 1.0, %v2123_v30  ;;  %vm2142_vm5 = vweird.f32 %v2055_v3  ;;  %v2133_v30 = vand.u32 2147483648, %v4562_v49 }
 0x5b2   :  { %v2032_v43 = vmul.f32 1.442695, %v2006_v39  ;;  %v2131_v39 = vand.u32 2147483647, %v4562_v49  ;;  %v2149_v29 = vor.u32 1.1754944e-38, %v2148_v11 }
 0x5b3   :  { %v2125_v16 = vmul.f32 %v4565_v18, %v2124_v48  ;;  %v2332_v47 = vpack.c.bf16 %v2121_v12, %v2106_v51  ;;  %v2134_v12 = vor.u32 1.1754944e-38, %v2133_v30 }
 0x5b4   :  { %3275 = vpow2.f32 %v2032_v43  ;;  %vm2132_vm4 = vcmp.eq.f32.partialorder %v2131_v39, 8.507059e+37 }
 0x5b6   :  { %v3274_v14 = vpop.eup %3273 }
 0x5b7   :  { %v2138_v62 = vmul.f32 %v3274_v14, %v2055_v3  ;;  %v1983_v21 = vpop.xlane.xlu0 %1982  ;;  %v2341_v9 = vpop.permute.xlu1 %2340  ;;  %vm2143_vm12 = vweird.f32 %v3274_v14 }
 0x5b8   :  { %v2007_v45 = vsub.f32 %v4490_v15, %v1983_v21  ;;  %2377 = vmatpush.bf16.msra.mxu2 %v2341_v9  ;;  %v2126_v15 = vadd.f32 %v4565_v18, %v2125_v16  ;;  %vm2144_vm14 = vmor %vm2142_vm5, %vm2143_vm12 }
 0x5b9   :  { %v2139_v60 = vsub.f32 1.0, %v2138_v62  ;;  %v2146_v62 = vand.u32 2147483647, %v2055_v3 }
 0x5ba   :  { %v2034_v40 = vmul.f32 1.442695, %v2007_v45  ;;  %v4574_v10 = vpop.eup %3275  ;;  %v2130_v43 = vsel %vm2129_vm10, %v4565_v18, %v2126_v15 }
 0x5bb   :  { %v2140_v52 = vmul.f32 %v3274_v14, %v2139_v60  ;;  %2961 = vmatmul.msk.bf16.vlgmr.msra.gmra.mxu2 %vm1043_vm3, %v2332_v47  ;;  %v2074_v23 = vsel %vm1043_vm3, %v4574_v10, 0.0  ;;  %vm2147_vm15 = vcmp.eq.f32.partialorder %v2146_v62, 8.507059e+37  ;;  %v2135_v49 = vsel %vm2132_vm4, %v2134_v12, %v2130_v43 }
 0x5bc   :  { %3277 = vpow2.f32 %v2034_v40  ;;  %2075 = vadd.xlane.f32.xlu2 %v2074_v23  ;;  %v2136_v18 = vmul.f32 %v4475_v7, %v2135_v49  ;;  %v1679_v43 = vadd.f32 %v4554_v1, %v4326_v61 }
 0x5bd   :  { %v2141_v42 = vadd.f32 %v3274_v14, %v2140_v52 }
 0x5bf   :  { %v2145_v57 = vsel %vm2144_vm14, %v3274_v14, %v2141_v42  ;;  %v4587_v48 = vpop.xlane.xlu0 %2060 }
 0x5c0   :  { %v2150_v51 = vsel %vm2147_vm15, %v2149_v29, %v2145_v57  ;;  %vm2172_vm7 = vweird.f32 %v4587_v48  ;;  %v2176_v1 = vand.u32 2147483647, %v4587_v48 }
 0x5c1   :  { %v2151_v45 = vmul.f32 %v4482_v24, %v2150_v51 }
 0x5c2   :  { %v4585_v63 = vpop.eup %3277  ;;  %v1986_v3 = vpop.xlane.xlu2 %1985  ;;  %vm2177_vm0 = vcmp.eq.f32.partialorder %v2176_v1, 8.507059e+37 }
 0x5c3   :  { %v2008_v21 = vsub.f32 %v4502_v46, %v1986_v3  ;;  %v2077_v9 = vsel %vm1043_vm3, %v4585_v63, 0.0  ;;  %v2333_v16 = vpack.c.bf16 %v2151_v45, %v2136_v18  ;;  %v1764_v3 = vadd.f32 %v4354_v32, %v1679_v43 }
 0x5c4   :  { %2078 = vadd.xlane.f32.xlu1 %v2077_v9  ;;  %v2178_v18 = vand.u32 2147483648, %v4587_v48 }
 0x5c5   :  { %v2036_v14 = vmul.f32 1.442695, %v2008_v21 }
 0x5c7   :  { %3279 = vpow2.f32 %v2036_v14 }
 0x5ca   :  { %v4594_v60 = vpop.xlane.xlu2 %2063  ;;  %v1989_v47 = vpop.xlane.xlu0 %1988 }
 0x5cb   :  { %2962 = vmatmul.msk.bf16.gmra.mxu2 %vm1043_vm3, %v2333_v16  ;;  %v2009_v40 = vsub.f32 %v4509_v5, %v1989_v47  ;;  %vm2187_vm14 = vweird.f32 %v4594_v60 }
 0x5cd   :  { %v4598_v46 = vpop.eup %3279  ;;  %v2038_v52 = vmul.f32 1.442695, %v2009_v40 }
 0x5ce   :  { %v2080_v11 = vsel %vm1043_vm3, %v4598_v46, 0.0 }
 0x5cf   :  { %2081 = vadd.xlane.f32.xlu0 %v2080_v11  ;;  %3281 = vpow2.f32 %v2038_v52 }
 0x5d0   :  { %3283 = vrcp.f32 %v4587_v48 }
 0x5d2   :  { %v1992_v24 = vpop.xlane.xlu2 %1991 }
 0x5d3   :  { %v2010_v23 = vsub.f32 %v4516_v59, %v1992_v24  ;;  %v4613_v59 = vpop.f32.mrf.mxu2 }
 0x5d5   :  { %v2040_v7 = vmul.f32 1.442695, %v2010_v23  ;;  %v4604_v15 = vpop.eup %3281  ;;  %v2179_v23 = vor.u32 1.1754944e-38, %v2178_v18 }
 0x5d6   :  { %v2083_v5 = vsel %vm1043_vm3, %v4604_v15, 0.0  ;;  %v3284_v42 = vpop.eup %3283 }
 0x5d7   :  { %3285 = vpow2.f32 %v2040_v7  ;;  %2084 = vadd.xlane.f32.xlu2 %v2083_v5  ;;  %v2168_v30 = vmul.f32 %v3284_v42, %v4587_v48  ;;  %vm2173_vm6 = vweird.f32 %v3284_v42 }
 0x5d8   :  { %vm4625_vm13 = vmor %vm2172_vm7, %vm2173_vm6 }
 0x5d9   :  { %v2169_v57 = vsub.f32 1.0, %v2168_v30 }
 0x5db   :  { %v2170_v12 = vmul.f32 %v3284_v42, %v2169_v57 }
 0x5dd   :  { %v4608_v62 = vpop.eup %3285  ;;  %v2171_v9 = vadd.f32 %v3284_v42, %v2170_v12 }
 0x5de   :  { %v2086_v39 = vsel %vm1043_vm3, %v4608_v62, 0.0 }
 0x5df   :  { %2087 = vadd.xlane.f32.xlu1 %v2086_v39  ;;  %v2175_v47 = vsel %vm4625_vm13, %v3284_v42, %v2171_v9 }
 0x5e0   :  { %v2180_v48 = vsel %vm2177_vm0, %v2179_v23, %v2175_v47 }
 0x5e1   :  { %v2181_v43 = vmul.f32 %v4497_v27, %v2180_v48  ;;  %v2193_v27 = vand.u32 2147483648, %v4594_v60 }
 0x5e2   :  { %v2058_v29 = vpop.xlane.xlu1 %2057 }
 0x5e3   :  { %3287 = vrcp.f32 %v2058_v29  ;;  %v2163_v16 = vand.u32 2147483648, %v2058_v29  ;;  %v2161_v11 = vand.u32 2147483647, %v2058_v29  ;;  %vm2157_vm8 = vweird.f32 %v2058_v29 }
 0x5e4   :  { %3289 = vrcp.f32 %v4594_v60 }
 0x5e5   :  { %v2164_v5 = vor.u32 1.1754944e-38, %v2163_v16  ;;  %vm2162_vm12 = vcmp.eq.f32.partialorder %v2161_v11, 8.507059e+37 }
 0x5e8   :  { %v1840_v51 = vpop.f32.mrf.mxu2 }
 0x5e9   :  { %v3288_v21 = vpop.eup %3287  ;;  %v4619_v49 = vadd.f32 %v1840_v51, %v1764_v3 }
 0x5ea   :  { %v2153_v14 = vmul.f32 %v3288_v21, %v2058_v29  ;;  %v4621_v45 = vpop.eup %3289  ;;  %vm2158_vm9 = vweird.f32 %v3288_v21 }
 0x5eb   :  { %v2183_v40 = vmul.f32 %v4621_v45, %v4594_v60  ;;  %vm2159_vm2 = vmor %vm2157_vm8, %vm2158_vm9  ;;  %vm2188_vm11 = vweird.f32 %v4621_v45 }
 0x5ec   :  { %v2154_v32 = vsub.f32 1.0, %v2153_v14  ;;  %vm4643_vm1 = vmor %vm2187_vm14, %vm2188_vm11 }
 0x5ed   :  { %v2184_v30 = vsub.f32 1.0, %v2183_v40 }
 0x5ee   :  { %v2155_v52 = vmul.f32 %v3288_v21, %v2154_v32  ;;  %v2067_v24 = vpop.xlane.xlu0 %2066 }
 0x5ef   :  { %3291 = vrcp.f32 %v2067_v24  ;;  %v2185_v3 = vmul.f32 %v4621_v45, %v2184_v30  ;;  %v2206_v32 = vand.u32 2147483647, %v2067_v24  ;;  %vm2202_vm10 = vweird.f32 %v2067_v24 }
 0x5f0   :  { %v2156_v7 = vadd.f32 %v3288_v21, %v2155_v52 }
 0x5f1   :  { %vm2207_vm4 = vcmp.eq.f32.partialorder %v2206_v32, 8.507059e+37 }
 0x5f2   :  { %v2160_v39 = vsel %vm2159_vm2, %v3288_v21, %v2156_v7  ;;  %v2186_v21 = vadd.f32 %v4621_v45, %v2185_v3 }
 0x5f3   :  { %v2165_v57 = vsel %vm2162_vm12, %v2164_v5, %v2160_v39  ;;  %v2194_v5 = vor.u32 1.1754944e-38, %v2193_v27 }
 0x5f4   :  { %v2166_v42 = vmul.f32 %v4528_v53, %v2165_v57  ;;  %v2208_v53 = vand.u32 2147483648, %v2067_v24  ;;  %v2190_v23 = vsel %vm4643_vm1, %v4621_v45, %v2186_v21 }
 0x5f5   :  { %v3292_v12 = vpop.eup %3291 }
 0x5f6   :  { %v2198_v51 = vmul.f32 %v3292_v12, %v2067_v24  ;;  %v1995_v9 = vpop.xlane.xlu0 %1994  ;;  %v2334_v14 = vpack.c.bf16 %v2181_v43, %v2166_v42  ;;  %vm2203_vm5 = vweird.f32 %v3292_v12  ;;  %v2209_v52 = vor.u32 1.1754944e-38, %v2208_v53 }
 0x5f7   :  { %v2011_v18 = vsub.f32 %v4540_v26, %v1995_v9  ;;  %v2191_v26 = vand.u32 2147483647, %v4594_v60  ;;  %vm2204_vm15 = vmor %vm2202_vm10, %vm2203_vm5 }
 0x5f8   :  { %v2199_v29 = vsub.f32 1.0, %v2198_v51  ;;  %2963 = vmatmul.msk.bf16.gmra.mxu2 %vm1043_vm3, %v2334_v14 }
 0x5f9   :  { %v2042_v61 = vmul.f32 1.442695, %v2011_v18  ;;  %vm2192_vm6 = vcmp.eq.f32.partialorder %v2191_v26, 8.507059e+37 }
 0x5fa   :  { %v2200_v1 = vmul.f32 %v3292_v12, %v2199_v29  ;;  %v2195_v60 = vsel %vm2192_vm6, %v2194_v5, %v2190_v23  ;;  %v3082_v5 = vld [vmem:[%s4780_s7 + $0x28] sm:$0xff] }
 0x5fb   :  { %3293 = vpow2.f32 %v2042_v61  ;;  %v2196_v43 = vmul.f32 %v4506_v17, %v2195_v60 }
 0x5fc   :  { %v2201_v47 = vadd.f32 %v3292_v12, %v2200_v1  ;;  %v2070_v40 = vpop.xlane.xlu2 %2069 }
 0x5fd   :  { %3295 = vrcp.f32 %v2070_v40  ;;  %vm2217_vm9 = vweird.f32 %v2070_v40  ;;  %v2221_v1 = vand.u32 2147483647, %v2070_v40 }
 0x5fe   :  { %v2073_v11 = vpop.xlane.xlu0 %2072  ;;  %v2205_v7 = vsel %vm2204_vm15, %v3292_v12, %v2201_v47 }
 0x5ff   :  { %3297 = vrcp.f32 %v2073_v11  ;;  %v2210_v48 = vsel %vm2207_vm4, %v2209_v52, %v2205_v7  ;;  %v2238_v18 = vand.u32 2147483648, %v2073_v11  ;;  %v2236_v21 = vand.u32 2147483647, %v2073_v11 }
 0x600   :  { %v2211_v39 = vmul.f32 %v4534_v19, %v2210_v48  ;;  %v2223_v19 = vand.u32 2147483648, %v2070_v40  ;;  %vm2232_vm8 = vweird.f32 %v2073_v11  ;;  %vm2222_vm11 = vcmp.eq.f32.partialorder %v2221_v1, 8.507059e+37  ;;  %v4673_v48 = vpop.f32.mrf.mxu2 }
 0x601   :  { %v4651_v30 = vpop.eup %3293  ;;  %v2239_v17 = vor.u32 1.1754944e-38, %v2238_v18  ;;  %vm2237_vm12 = vcmp.eq.f32.partialorder %v2236_v21, 8.507059e+37 }
 0x602   :  { %v2089_v24 = vsel %vm1043_vm3, %v4651_v30, 0.0  ;;  %v2335_v51 = vpack.c.bf16 %v2211_v39, %v2196_v43  ;;  %v2224_v16 = vor.u32 1.1754944e-38, %v2223_v19 }
 0x603   :  { %v3296_v57 = vpop.eup %3295  ;;  %2090 = vadd.xlane.f32.xlu0 %v2089_v24 }
 0x604   :  { %v2213_v42 = vmul.f32 %v3296_v57, %v2070_v40  ;;  %vm2218_vm7 = vweird.f32 %v3296_v57  ;;  %v3084_v40 = vld [vmem:[%s4780_s7 + $0x38] sm:$0xff] }
 0x605   :  { %v3298_v45 = vpop.eup %3297  ;;  %vm2219_vm0 = vmor %vm2217_vm9, %vm2218_vm7  ;;  %2467 = vmatpush.bf16.msrb.mxu3 %v3084_v40 }
 0x606   :  { %v2214_v12 = vsub.f32 1.0, %v2213_v42  ;;  %v2228_v3 = vmul.f32 %v3298_v45, %v2073_v11  ;;  %vm2233_vm13 = vweird.f32 %v3298_v45  ;;  %v3083_v11 = vld [vmem:[%s4780_s7 + $0x30] sm:$0xff] }
 0x607   :  { %vm2234_vm2 = vmor %vm2232_vm8, %vm2233_vm13  ;;  %vm4862_vm13 = vcmask 523264  }
 0x608   :  { %v2215_v9 = vmul.f32 %v3296_v57, %v2214_v12  ;;  %v2229_v14 = vsub.f32 1.0, %v2228_v3  ;;  %2964 = vmatmul.msk.bf16.gmra.mxu2 %vm1043_vm3, %v2335_v51 }
 0x609   :  { %2468 = vmatpush.bf16.msrb.mxu3 %v3083_v11 }
 0x60a   :  { %v2216_v29 = vadd.f32 %v3296_v57, %v2215_v9  ;;  %v2230_v61 = vmul.f32 %v3298_v45, %v2229_v14 }
 0x60c   :  { %v2231_v53 = vadd.f32 %v3298_v45, %v2230_v61  ;;  %v2220_v27 = vsel %vm2219_vm0, %v3296_v57, %v2216_v29 }
 0x60d   :  { %v2225_v47 = vsel %vm2222_vm11, %v2224_v16, %v2220_v27  ;;  %2469 = vmatpush.bf16.msrb.mxu3 %v3082_v5 }
 0x60e   :  { %v2235_v32 = vsel %vm2234_vm2, %v3298_v45, %v2231_v53  ;;  %v2226_v23 = vmul.f32 %v4548_v50, %v2225_v47 }
 0x60f   :  { %v2240_v26 = vsel %vm2237_vm12, %v2239_v17, %v2235_v32 }
 0x610   :  { %v2241_v52 = vmul.f32 %v4546_v8, %v2240_v26  ;;  %v3081_v8 = vld [vmem:[%s4780_s7 + $0x20] sm:$0xff] }
 0x611   :  { %2470 = vmatpush.bf16.msrb.mxu3 %v3081_v8 }
 0x612   :  { %v2336_v7 = vpack.c.bf16 %v2241_v52, %v2226_v23 }
 0x618   :  { %2965 = vmatmul.msk.bf16.gmra.mxu2 %vm1043_vm3, %v2336_v7 }
 0x62f   :  { %v2076_v50 = vpop.xlane.xlu2 %2075 }
 0x630   :  { %3299 = vrcp.f32 %v2076_v50  ;;  %v2253_v51 = vand.u32 2147483648, %v2076_v50  ;;  %vm2247_vm14 = vweird.f32 %v2076_v50  ;;  %v2251_v9 = vand.u32 2147483647, %v2076_v50 }
 0x632   :  { %v2254_v53 = vor.u32 1.1754944e-38, %v2253_v51  ;;  %vm2252_vm15 = vcmp.eq.f32.partialorder %v2251_v9, 8.507059e+37 }
 0x636   :  { %v3300_v60 = vpop.eup %3299 }
 0x637   :  { %v2079_v24 = vpop.xlane.xlu1 %2078  ;;  %v2243_v39 = vmul.f32 %v3300_v60, %v2076_v50  ;;  %vm2248_vm5 = vweird.f32 %v3300_v60 }
 0x638   :  { %3301 = vrcp.f32 %v2079_v24  ;;  %vm4675_vm1 = vmor %vm2247_vm14, %vm2248_vm5  ;;  %v2266_v29 = vand.u32 2147483647, %v2079_v24  ;;  %v2268_v61 = vand.u32 2147483648, %v2079_v24  ;;  %vm2262_vm4 = vweird.f32 %v2079_v24 }
 0x639   :  { %v2244_v57 = vsub.f32 1.0, %v2243_v39 }
 0x63a   :  { %v2269_v27 = vor.u32 1.1754944e-38, %v2268_v61  ;;  %vm2267_vm7 = vcmp.eq.f32.partialorder %v2266_v29, 8.507059e+37 }
 0x63b   :  { %v2245_v42 = vmul.f32 %v3300_v60, %v2244_v57 }
 0x63d   :  { %v2246_v12 = vadd.f32 %v3300_v60, %v2245_v42 }
 0x63e   :  { %v3302_v43 = vpop.eup %3301  ;;  %v2379_v45 = vpop.f32.mrf.mxu2 }
 0x63f   :  { %v2258_v3 = vmul.f32 %v3302_v43, %v2079_v24  ;;  %v2250_v19 = vsel %vm4675_vm1, %v3300_v60, %v2246_v12  ;;  %vm2263_vm10 = vweird.f32 %v3302_v43  ;;  %v2419_v47 = vmul.f32 %v2379_v45, %v4360_v6  ;;  %vm4865_vm1 = vmmov %vm4862_vm13 }
 0x640   :  { %vm2264_vm6 = vmor %vm2262_vm4, %vm2263_vm10  ;;  %v2255_v16 = vsel %vm2252_vm15, %v2254_v53, %v2250_v19 }
 0x641   :  { %v2259_v14 = vsub.f32 1.0, %v2258_v3  ;;  %v2256_v11 = vmul.f32 %v4574_v10, %v2255_v16  ;;  %v3087_v16 = vld [vmem:[%s4780_s7 + $0x70] sm:$0xff] }
 0x642   :  { %v2082_v21 = vpop.xlane.xlu0 %2081 }
 0x643   :  { %v2260_v1 = vmul.f32 %v3302_v43, %v2259_v14  ;;  %3303 = vrcp.f32 %v2082_v21  ;;  %vm2277_vm0 = vweird.f32 %v2082_v21  ;;  %v2281_v10 = vand.u32 2147483647, %v2082_v21 }
 0x645   :  { %v2261_v17 = vadd.f32 %v3302_v43, %v2260_v1  ;;  %vm2282_vm12 = vcmp.eq.f32.partialorder %v2281_v10, 8.507059e+37  ;;  %v3088_v1 = vld [vmem:[%s4780_s7 + $0x78] sm:$0xff] }
 0x646   :  { %v2381_v32 = vpop.f32.mrf.mxu2  ;;  %2534 = vmatpush.bf16.msrb.mxu0 %v3088_v1 }
 0x647   :  { %v2265_v26 = vsel %vm2264_vm6, %v3302_v43, %v2261_v17  ;;  %v2420_v52 = vmul.f32 %v2381_v32, %v4356_v4  ;;  %v2283_v43 = vand.u32 2147483648, %v2082_v21 }
 0x648   :  { %v2270_v23 = vsel %vm2267_vm7, %v2269_v27, %v2265_v26 }
 0x649   :  { %v3304_v7 = vpop.eup %3303  ;;  %v2431_v40 = vpack.c.bf16 %v2420_v52, %v2419_v47  ;;  %v2271_v5 = vmul.f32 %v4585_v63, %v2270_v23  ;;  %v2284_v61 = vor.u32 1.1754944e-38, %v2283_v43  ;;  %v3086_v47 = vld [vmem:[%s4780_s7 + $0x68] sm:$0xff]  ;;  %v3085_v52 = vld [vmem:[%s4780_s7 + $0x60] sm:$0xff] }
 0x64a   :  { %v2273_v8 = vmul.f32 %v3304_v7, %v2082_v21  ;;  %v2085_v50 = vpop.xlane.xlu2 %2084  ;;  %vm2278_vm9 = vweird.f32 %v3304_v7  ;;  %2535 = vmatpush.bf16.msrb.mxu0 %v3087_v16 }
 0x64b   :  { %2985 = vmatmul.msk.bf16.vlgmr.msrb.gmra.mxu3 %vm4862_vm13, %v2431_v40  ;;  %v2337_v60 = vpack.c.bf16 %v2271_v5, %v2256_v11  ;;  %3305 = vrcp.f32 %v2085_v50  ;;  %vm4687_vm8 = vmor %vm2277_vm0, %vm2278_vm9  ;;  %v2296_v12 = vand.u32 2147483647, %v2085_v50  ;;  %v2298_v3 = vand.u32 2147483648, %v2085_v50  ;;  %v3092_v11 = vld [vmem:[%s4780_s7 + $0xb8] sm:$0xff] }
 0x64c   :  { %v2274_v24 = vsub.f32 1.0, %v2273_v8  ;;  %vm2292_vm11 = vweird.f32 %v2085_v50  ;;  %2601 = vmatpush.bf16.msra.mxu3 %v3092_v11 }
 0x64d   :  { %2966 = vmatmul.msk.bf16.gmra.mxu2 %vm1043_vm3, %v2337_v60  ;;  %v2299_v53 = vor.u32 1.1754944e-38, %v2298_v3  ;;  %vm2297_vm14 = vcmp.eq.f32.partialorder %v2296_v12, 8.507059e+37 }
 0x64e   :  { %v2384_v39 = vpop.f32.mrf.mxu2  ;;  %v2275_v6 = vmul.f32 %v3304_v7, %v2274_v24  ;;  %2536 = vmatpush.bf16.msrb.mxu0 %v3086_v47 }
 0x64f   :  { %v2421_v51 = vmul.f32 %v2384_v39, %v4424_v22 }
 0x650   :  { %v2276_v4 = vadd.f32 %v3304_v7, %v2275_v6  ;;  %v3090_v6 = vld [vmem:[%s4780_s7 + $0xa8] sm:$0xff] }
 0x651   :  { %v3306_v57 = vpop.eup %3305 }
 0x652   :  { %v2288_v42 = vmul.f32 %v3306_v57, %v2085_v50  ;;  %v2280_v14 = vsel %vm4687_vm8, %v3304_v7, %v2276_v4  ;;  %vm2293_vm2 = vweird.f32 %v3306_v57  ;;  %2537 = vmatpush.bf16.msrb.mxu0 %v3085_v52  ;;  %v3091_v50 = vld [vmem:[%s4780_s7 + $0xb0] sm:$0xff]  ;;  %vm4866_vm8 = vmmov %vm4865_vm1 }
 0x653   :  { %vm2294_vm5 = vmor %vm2292_vm11, %vm2293_vm2  ;;  %v2285_v22 = vsel %vm2282_vm12, %v2284_v61, %v2280_v14  ;;  %2602 = vmatpush.bf16.msra.mxu3 %v3091_v50  ;;  %v3089_v61 = vld [vmem:[%s4780_s7 + $0xa0] sm:$0xff] }
 0x654   :  { %v2289_v45 = vsub.f32 1.0, %v2288_v42  ;;  %vm4867_vm2 = vmmov %vm4865_vm1 }
 0x655   :  { %vm4868_vm12 = vmmov %vm4865_vm1 }
 0x656   :  { %v2386_v9 = vpop.f32.mrf.mxu2  ;;  %v2290_v18 = vmul.f32 %v3306_v57, %v2289_v45  ;;  %vm4870_vm11 = vmmov %vm4865_vm1 }
 0x657   :  { %v2422_v29 = vmul.f32 %v2386_v9, %v4426_v36  ;;  %v2286_v36 = vmul.f32 %v4598_v46, %v2285_v22  ;;  %v2088_v46 = vpop.xlane.xlu1 %2087  ;;  %2603 = vmatpush.bf16.msra.mxu3 %v3090_v6 }
 0x658   :  { %v2291_v21 = vadd.f32 %v3306_v57, %v2290_v18  ;;  %3307 = vrcp.f32 %v2088_v46  ;;  %v2313_v4 = vand.u32 2147483648, %v2088_v46  ;;  %vm2307_vm15 = vweird.f32 %v2088_v46 }
 0x659   :  { %v2432_v19 = vpack.c.bf16 %v2422_v29, %v2421_v51 }
 0x65a   :  { %v2295_v17 = vsel %vm2294_vm5, %v3306_v57, %v2291_v21  ;;  %v2311_v57 = vand.u32 2147483647, %v2088_v46  ;;  %v2314_v12 = vor.u32 1.1754944e-38, %v2313_v4  ;;  %vm4871_vm5 = vmmov %vm4865_vm1 }
 0x65b   :  { %2986 = vmatmul.msk.bf16.gmra.mxu3 %vm4865_vm1, %v2432_v19  ;;  %v2300_v27 = vsel %vm2297_vm14, %v2299_v53, %v2295_v17  ;;  %vm4872_vm14 = vmmov %vm4865_vm1 }
 0x65c   :  { %v2301_v32 = vmul.f32 %v4604_v15, %v2300_v27  ;;  %vm2312_vm7 = vcmp.eq.f32.partialorder %v2311_v57, 8.507059e+37  ;;  %2604 = vmatpush.bf16.msra.mxu3 %v3089_v61 }
 0x65e   :  { %v2338_v26 = vpack.c.bf16 %v2301_v32, %v2286_v36  ;;  %v3308_v15 = vpop.eup %3307 }
 0x65f   :  { %v2303_v23 = vmul.f32 %v3308_v15, %v2088_v46  ;;  %vm2308_vm10 = vweird.f32 %v3308_v15 }
 0x660   :  { %2967 = vmatmul.msk.bf16.gmra.mxu2 %vm1043_vm3, %v2338_v26  ;;  %vm2309_vm4 = vmor %vm2307_vm15, %vm2308_vm10 }
 0x661   :  { %v2304_v7 = vsub.f32 1.0, %v2303_v23  ;;  %vm4874_vm10 = vmmov %vm4865_vm1 }
 0x662   :  { %vm4875_vm15 = vmmov %vm4865_vm1 }
 0x663   :  { %v2305_v5 = vmul.f32 %v3308_v15, %v2304_v7 }
 0x665   :  { %v2306_v24 = vadd.f32 %v3308_v15, %v2305_v5 }
 0x667   :  { %v2310_v10 = vsel %vm2309_vm4, %v3308_v15, %v2306_v24 }
 0x668   :  { %v2315_v18 = vsel %vm2312_vm7, %v2314_v12, %v2310_v10 }
 0x669   :  { %v2316_v53 = vmul.f32 %v4608_v62, %v2315_v18 }
 0x676   :  { %v2091_v40 = vpop.xlane.xlu0 %2090 }
 0x677   :  { %3309 = vrcp.f32 %v2091_v40  ;;  %v2328_v43 = vand.u32 2147483648, %v2091_v40  ;;  %v2326_v63 = vand.u32 2147483647, %v2091_v40  ;;  %vm2322_vm13 = vweird.f32 %v2091_v40 }
 0x679   :  { %v2329_v29 = vor.u32 1.1754944e-38, %v2328_v43  ;;  %vm2327_vm0 = vcmp.eq.f32.partialorder %v2326_v63, 8.507059e+37  ;;  %v1676_v63 = vadd.f32 %v4544_v55, %v4321_v34  ;;  %v1681_v55 = vadd.f32 %v4556_v13, %v4337_v0 }
 0x67b   :  { %v2389_v8 = vpop.f32.mrf.mxu2 }
 0x67c   :  { %v2486_v9 = vmul.f32 %v2389_v8, %v4224_v56 }
 0x67d   :  { %v3310_v60 = vpop.eup %3309 }
 0x67e   :  { %v2318_v39 = vmul.f32 %v3310_v60, %v2091_v40  ;;  %vm2323_vm6 = vweird.f32 %v3310_v60 }
 0x67f   :  { %vm2324_vm9 = vmor %vm2322_vm13, %vm2323_vm6 }
 0x680   :  { %v2319_v42 = vsub.f32 1.0, %v2318_v39 }
 0x682   :  { %v2320_v45 = vmul.f32 %v3310_v60, %v2319_v42 }
 0x683   :  { %v2391_v3 = vpop.f32.mrf.mxu2 }
 0x684   :  { %v2321_v51 = vadd.f32 %v3310_v60, %v2320_v45  ;;  %v2487_v14 = vmul.f32 %v2391_v3, %v4222_v41 }
 0x686   :  { %v2325_v21 = vsel %vm2324_vm9, %v3310_v60, %v2321_v51  ;;  %v2498_v19 = vpack.c.bf16 %v2487_v14, %v2486_v9 }
 0x687   :  { %v2330_v1 = vsel %vm2327_vm0, %v2329_v29, %v2325_v21 }
 0x688   :  { %3003 = vmatmul.msk.bf16.vlgmr.msrb.gmra.mxu0 %vm4866_vm8, %v2498_v19  ;;  %v2331_v56 = vmul.f32 %v4651_v30, %v2330_v1  ;;  %v3096_v30 = vld [vmem:[%s4780_s7 + $0xf8] sm:$0xff] }
 0x689   :  { %2668 = vmatpush.bf16.msra.mxu0 %v3096_v30 }
 0x68a   :  { %v2339_v22 = vpack.c.bf16 %v2331_v56, %v2316_v53  ;;  %v4873_v53 = vld [vmem:[#allocation11_spill] sm:$0xff] }
 0x68b   :  { %v2394_v41 = vpop.f32.mrf.mxu2 }
 0x68c   :  { %2968 = vmatmul.msk.bf16.gmra.mxu2 %vm1043_vm3, %v2339_v22  ;;  %v2488_v27 = vmul.f32 %v2394_v41, %v4267_v31  ;;  %v3095_v31 = vld [vmem:[%s4780_s7 + $0xf0] sm:$0xff]  ;;  %vm4869_vm3 = vmmov %vm4865_vm1 }
 0x68d   :  { %2669 = vmatpush.bf16.msra.mxu0 %v3095_v31 }
 0x693   :  { %v2396_v17 = vpop.f32.mrf.mxu2 }
 0x694   :  { %v2489_v36 = vmul.f32 %v2396_v17, %v4277_v20  ;;  %v3094_v20 = vld [vmem:[%s4780_s7 + $0xe8] sm:$0xff] }
 0x695   :  { %2670 = vmatpush.bf16.msra.mxu0 %v3094_v20 }
 0x696   :  { %v2499_v32 = vpack.c.bf16 %v2489_v36, %v2488_v27 }
 0x698   :  { %3004 = vmatmul.msk.bf16.gmra.mxu0 %vm4867_vm2, %v2499_v32 }
 0x69b   :  { %v2399_v16 = vpop.f32.mrf.mxu2 }
 0x69c   :  { %v2553_v47 = vmul.f32 %v2399_v16, %v4259_v28  ;;  %v3093_v28 = vld [vmem:[%s4780_s7 + $0xe0] sm:$0xff]  ;;  %s3344_s7 = smov [#allocation2]  }
 0x69d   :  { %2671 = vmatpush.bf16.msra.mxu0 %v3093_v28  ;;  %s2695_s13 = sshll.u32 %s3344_s7, 4  ;;  %s2696_s13 = int_to_ptr.vmem [resolvable:$true] %s2695_s13 }
 0x6a3   :  { %v2401_v26 = vpop.f32.mrf.mxu2 }
 0x6a4   :  { %v2554_v62 = vmul.f32 %v2401_v26, %v4282_v44 }
 0x6a6   :  { %v2565_v52 = vpack.c.bf16 %v2554_v62, %v2553_v47 }
 0x6a8   :  { %3021 = vmatmul.msk.bf16.vlgmr.msra.gmra.mxu3 %vm4868_vm12, %v2565_v52 }
 0x6d0   :  { %v2404_v44 = vpop.f32.mrf.mxu2 }
 0x6d1   :  { %v2555_v15 = vmul.f32 %v2404_v44, %v4264_v25 }
 0x6d8   :  { %v2406_v46 = vpop.f32.mrf.mxu2 }
 0x6d9   :  { %v2556_v23 = vmul.f32 %v2406_v46, %v4292_v35  ;;  %v2472_v35 = vpop.f32.mrf.mxu3 }
 0x6da   :  { %v2482_v12 = vadd.f32 %v2472_v35, %v4560_v33 }
 0x6db   :  { %v2566_v7 = vpack.c.bf16 %v2556_v23, %v2555_v15 }
 0x6dd   :  { %3022 = vmatmul.msk.bf16.gmra.mxu3 %vm4869_vm3, %v2566_v7 }
 0x6e1   :  { %v2474_v4 = vpop.f32.mrf.mxu3 }
 0x6e3   :  { %v2409_v40 = vpop.f32.mrf.mxu2 }
 0x6e4   :  { %v2620_v5 = vmul.f32 %v2409_v40, %v4413_v37 }
 0x6e9   :  { %v2477_v43 = vpop.f32.mrf.mxu3 }
 0x6eb   :  { %v2411_v11 = vpop.f32.mrf.mxu2 }
 0x6ec   :  { %v2621_v8 = vmul.f32 %v2411_v11, %v4418_v2 }
 0x6ee   :  { %v2632_v50 = vpack.c.bf16 %v2621_v8, %v2620_v5 }
 0x6f0   :  { %3039 = vmatmul.msk.bf16.vlgmr.msra.gmra.mxu0 %vm4870_vm11, %v2632_v50 }
 0x6f1   :  { %v2479_v10 = vpop.f32.mrf.mxu3 }
 0x705   :  { %v2539_v57 = vpop.f32.mrf.mxu0 }
 0x70d   :  { %v2541_v42 = vpop.f32.mrf.mxu0 }
 0x70f   :  { %v2414_v60 = vpop.f32.mrf.mxu2 }
 0x710   :  { %v2622_v39 = vmul.f32 %v2414_v60, %v4523_v54  ;;  %v2549_v54 = vadd.f32 %v2539_v57, %v2482_v12 }
 0x715   :  { %v2544_v37 = vpop.f32.mrf.mxu0 }
 0x717   :  { %v2416_v24 = vpop.f32.mrf.mxu2 }
 0x718   :  { %v2623_v25 = vmul.f32 %v2416_v24, %v4521_v38  ;;  %v1763_v38 = vadd.f32 %v4346_v58, %v1676_v63  ;;  %v2484_v58 = vadd.f32 %v2477_v43, %v4619_v49 }
 0x71a   :  { %v2633_v6 = vpack.c.bf16 %v2623_v25, %v2622_v39  ;;  %v1846_v9 = vadd.f32 %v4613_v59, %v1763_v38  ;;  %v2551_v33 = vadd.f32 %v2544_v37, %v2484_v58  ;;  %v1765_v59 = vadd.f32 %v4873_v53, %v1681_v55 }
 0x71c   :  { %3040 = vmatmul.msk.bf16.gmra.mxu0 %vm4871_vm5, %v2633_v6  ;;  %v2483_v18 = vadd.f32 %v2474_v4, %v1846_v9  ;;  %v1848_v41 = vadd.f32 %v4673_v48, %v1765_v59 }
 0x71d   :  { %v2546_v2 = vpop.f32.mrf.mxu0 }
 0x71e   :  { %v2550_v61 = vadd.f32 %v2541_v42, %v2483_v18  ;;  %v2485_v27 = vadd.f32 %v2479_v10, %v1848_v41 }
 0x720   :  { %v2552_v32 = vadd.f32 %v2546_v2, %v2485_v27 }
 0x72b   :  { %v2606_v45 = vpop.f32.mrf.mxu3 }
 0x72c   :  { %v2616_v3 = vadd.f32 %v2606_v45, %v2549_v54 }
 0x733   :  { %v2608_v29 = vpop.f32.mrf.mxu3 }
 0x734   :  { %v2617_v21 = vadd.f32 %v2608_v29, %v2550_v61 }
 0x760   :  { %v2611_v34 = vpop.f32.mrf.mxu3 }
 0x761   :  { %v2618_v56 = vadd.f32 %v2611_v34, %v2551_v33 }
 0x768   :  { %v2613_v36 = vpop.f32.mrf.mxu3 }
 0x769   :  { %v2619_v0 = vadd.f32 %v2613_v36, %v2552_v32 }
 0x76d   :  { %v2673_v51 = vpop.f32.mrf.mxu0 }
 0x76e   :  { %v2683_v14 = vadd.f32 %v2673_v51, %v2616_v3 }
 0x770   :  { %2687 = vst.msk [vmem:[#allocation2] sm:$0xff] %vm4872_vm14, %v2683_v14 }
 0x775   :  { %v2675_v19 = vpop.f32.mrf.mxu0 }
 0x776   :  { %v2684_v1 = vadd.f32 %v2675_v19, %v2617_v21 }
 0x778   :  { %2688 = vst.msk [vmem:[#allocation2 + $0x8] sm:$0xff] %vm4865_vm1, %v2684_v1 }
 0x799   :  { %v2678_v22 = vpop.f32.mrf.mxu0 }
 0x79a   :  { %v2685_v17 = vadd.f32 %v2678_v22, %v2618_v56 }
 0x79c   :  { %2689 = vst.msk [vmem:[#allocation2 + $0x10] sm:$0xff] %vm4874_vm10, %v2685_v17 }
 0x7a1   :  { %v2680_v13 = vpop.f32.mrf.mxu0 }
 0x7a2   :  { %v2686_v49 = vadd.f32 %v2680_v13, %v2619_v0 }
 0x7a4   :  { %2690 = vst.msk [vmem:[#allocation2 + $0x18] sm:$0xff] %vm4875_vm15, %v2686_v49 }
 0x7a5   :  { %2703 = dma.vmem_to_hbm [thread:$0]  %s2696_s13, 512, %s2698_s16, [#allocation3], %s3345_s17, %s3345_s17, %s3346_s18  }
 0x7a6   :  { %3335 = dma.done.wait [#allocation3], 512  }
 0x7a7   :  { %3336 = vsyncadd [#allocation3], 4294966784 }
 0x7a8   :  { %2708 = vsyncpa [#allocation3], 1 }

</bundles_post_ra>
